<compile_context>
chip_gen: v7x
topology: tpu7x:2x2x1
jax: 0.10.0
libtpu: 0.0.40
codegen_flags: <defaults>
</compile_context>

<pallas_src>
import jax
import jax.numpy as jnp
from jax import lax
from jax.experimental import pallas as pl
from jax.experimental.pallas import tpu as pltpu

# ---------------- scaled-down "uni" ViT configuration ----------------------
B, C, H, W = 4, 3, 16, 16      # input images, NCHW
PS = 8                         # LocalFeatureExtractorFM patch_size (256 -> 8)
CROP = 4                       # CenterCrop(224) analogue (224 -> 4)
VP = 2                         # ViT patch size (16 -> 2)
D = 32                         # embed dim (1024 -> 32)
NH = 4                         # attention heads (16 -> 4)
HD = D // NH
DM = 4 * D                     # MLP hidden dim (mlp_ratio=4)
DEPTH = 2                      # transformer depth (24 -> 2)
GRID = CROP // VP
T = GRID * GRID                # spatial tokens per tile
T1 = T + 1                     # + cls token
PDIM = C * VP * VP             # flattened ViT-patch dim
LS_INIT = 1e-5                 # init_values for 'uni' (LayerScale)
EPS = 1e-6                     # timm LayerNorm eps
SCALE = HD ** -0.5

TILE_B = 8                     # tiles per grid step: NT = 40 (8-sublane aligned)
NT = TILE_B * T1               # tokens per grid step (cls rows first)
NSP = TILE_B * T               # spatial-token rows per grid step
NEG = -1e9                     # additive cross-tile mask (safe even in bf16)


def _layer_norm(h, w, b):
    # var = E[h^2] - mu^2: two independent reductions over the same pass
    # instead of the dependent (h - mu)^2 reduction.
    mu = jnp.mean(h, axis=-1, keepdims=True)
    var = jnp.maximum(jnp.mean(h * h, axis=-1, keepdims=True) - mu * mu, 0.0)
    return (h - mu) * lax.rsqrt(var + EPS) * w + b


def _gelu(x):
    # TODO(synk): timm uses exact (erf) GELU; tanh approximation keeps the
    # transcendental on the TPU EUP path.
    return 0.5 * x * (1.0 + jnp.tanh(0.7978845608028654 * (x + 0.044715 * x * x * x)))


def vit_tiles_kernel(tok_ref, w_emb_ref, b_emb_ref, cls_ref, possp_ref,
                     bias_ref, ln1w_ref, ln1b_ref, wqkv_ref, bqkv_ref,
                     wproj_ref, bproj_ref, ls1_ref, ln2w_ref, ln2b_ref,
                     wfc1_ref, bfc1_ref, wfc2_ref, bfc2_ref, ls2_ref,
                     lnfw_ref, lnfb_ref, out_ref):
    f32 = jnp.float32
    bf16 = jnp.bfloat16

    # ---- patch embedding for TILE_B tiles at once ----
    tok = tok_ref[0]                                              # (NSP, PDIM) bf16
    emb = jnp.dot(tok, w_emb_ref[...],
                  preferred_element_type=f32) + b_emb_ref[...]   # (NSP, D) f32
    # cls rows (cls token + pos[0], one per tile) go first so pooling is a
    # static sublane slice; spatial rows get their tiled positional embedding.
    x = jnp.concatenate([cls_ref[...], emb + possp_ref[...]], axis=0)   # (NT, D)

    bias = bias_ref[...]                                          # (NT, NT) block mask

    # ---- transformer blocks (pre-LN + LayerScale, as in timm 'uni') ----
    for d in range(DEPTH):
        # attention
        h = _layer_norm(x, ln1w_ref[d], ln1b_ref[d])
        qkv = jnp.dot(h.astype(bf16), wqkv_ref[d],
                      preferred_element_type=f32) + bqkv_ref[d]   # (NT, 3D) f32
        qkvb = qkv.astype(bf16)                                   # cast once
        heads = []
        for hh in range(NH):
            q_h = qkvb[:, hh * HD:(hh + 1) * HD]
            k_h = qkvb[:, D + hh * HD:D + (hh + 1) * HD]
            v_h = qkvb[:, 2 * D + hh * HD:2 * D + (hh + 1) * HD]
            # q @ k^T without an explicit transpose: contract the last dims.
            s = lax.dot_general(q_h, k_h, (((1,), (1,)), ((), ())),
                                preferred_element_type=f32) * SCALE + bias
            s = s - jnp.max(s, axis=-1, keepdims=True)
            p = jnp.exp(s)
            p = p * pl.reciprocal(jnp.sum(p, axis=-1, keepdims=True),
                                  approx=True)
            heads.append(jnp.dot(p.astype(bf16), v_h,
                                 preferred_element_type=f32))     # (NT, HD) f32
        # concatenate heads on the lane axis; one K=D projection matmul.
        o = jnp.concatenate(heads, axis=-1).astype(bf16)          # (NT, D) bf16
        proj = jnp.dot(o, wproj_ref[d],
                       preferred_element_type=f32) + bproj_ref[d]
        x = x + ls1_ref[d] * proj

        # MLP
        h2 = _layer_norm(x, ln2w_ref[d], ln2b_ref[d])
        m = jnp.dot(h2.astype(bf16), wfc1_ref[d],
                    preferred_element_type=f32) + bfc1_ref[d]
        m = _gelu(m)
        m = jnp.dot(m.astype(bf16), wfc2_ref[d],
                    preferred_element_type=f32) + bfc2_ref[d]
        x = x + ls2_ref[d] * m

    # ---- final norm + cls-token pooling (num_classes=0) ----
    # only the TILE_B cls rows (rows 0..TILE_B-1) need the final LayerNorm.
    pooled = _layer_norm(x[:TILE_B, :], lnfw_ref[...], lnfb_ref[...])  # (TILE_B, D)
    # lane-dense store: flatten the per-tile features into one 256-lane slab.
    # (At real scale D>=128 this flatten is unnecessary — store (TILE_B, D).)
    flat = jnp.concatenate([pooled[t:t + 1, :] for t in range(TILE_B)],
                           axis=-1)                               # (1, TILE_B*D)
    out_ref[0] = flat


def init_params(key):
    ks = iter(jax.random.split(key, 16))
    std = 0.02

    def nrm(shape):
        return std * jax.random.normal(next(ks), shape, jnp.float32)

    p = {}
    wc = nrm((D, C, VP, VP))                       # timm patch_embed.proj weight
    p["w_emb"] = wc.reshape(D, PDIM).T             # (PDIM, D) matmul form
    p["b_emb"] = jnp.zeros((1, D), jnp.float32)
    p["cls"] = nrm((1, D))
    p["pos"] = nrm((T1, D))
    p["ln1_w"] = jnp.ones((DEPTH, 1, D), jnp.float32)
    p["ln1_b"] = jnp.zeros((DEPTH, 1, D), jnp.float32)
    p["w_qkv"] = nrm((DEPTH, D, 3 * D))
    p["b_qkv"] = jnp.zeros((DEPTH, 1, 3 * D), jnp.float32)
    p["w_proj"] = nrm((DEPTH, D, D))
    p["b_proj"] = jnp.zeros((DEPTH, 1, D), jnp.float32)
    p["ls1"] = jnp.full((DEPTH, 1, D), LS_INIT, jnp.float32)
    p["ln2_w"] = jnp.ones((DEPTH, 1, D), jnp.float32)
    p["ln2_b"] = jnp.zeros((DEPTH, 1, D), jnp.float32)
    p["w_fc1"] = nrm((DEPTH, D, DM))
    p["b_fc1"] = jnp.zeros((DEPTH, 1, DM), jnp.float32)
    p["w_fc2"] = nrm((DEPTH, DM, D))
    p["b_fc2"] = jnp.zeros((DEPTH, 1, D), jnp.float32)
    p["ls2"] = jnp.full((DEPTH, 1, D), LS_INIT, jnp.float32)
    p["lnf_w"] = jnp.ones((1, D), jnp.float32)
    p["lnf_b"] = jnp.zeros((1, D), jnp.float32)
    return p


def _full_spec(arr):
    nd = arr.ndim
    # TODO(synk): once weights are streamed per layer, mark the true constants
    # here with pipeline_mode=pl.Buffered(1) to halve their VMEM footprint.
    return pl.BlockSpec(arr.shape, lambda i, _nd=nd: (0,) * _nd)


@jax.jit
def local_feature_extractor_fm(x, params):
    f32, bf16 = jnp.float32, jnp.bfloat16
    b, c, h, w = x.shape
    p1, p2 = h // PS, w // PS
    n = b * p1 * p2
    assert n % TILE_B == 0, (n, TILE_B)
    nb = n // TILE_B

    # torch: x.unfold(2,ps,ps).unfold(3,ps,ps); rearrange 'b c p1 p2 w h -> (b p1 p2) c w h'
    xp = x.reshape(b, c, p1, PS, p2, PS).transpose(0, 2, 4, 1, 3, 5)
    xp = xp.reshape(n, c, PS, PS)

    # CenterCrop(224) analogue
    off = (PS - CROP) // 2
    xc = xp[:, :, off:off + CROP, off:off + CROP]            # (n, C, CROP, CROP)

    # ViT patchify: im2col of the stride-VP patch-embed conv (layout plumbing,
    # left to XLA at toy scale — see TODO at top of file).
    tok = xc.reshape(n, c, GRID, VP, GRID, VP).transpose(0, 2, 4, 1, 3, 5)
    tok = tok.reshape(n, T, PDIM)
    # fold TILE_B tiles per grid step onto the token (sublane) axis; the cls
    # rows are synthesized inside the kernel (no zero rows written to HBM).
    tok = tok.reshape(nb, NSP, PDIM).astype(bf16)            # (nb, NSP, PDIM)

    # ---- precomputed per-block constants (tiny) ----
    cls_rows = jnp.tile(params["cls"] + params["pos"][:1], (TILE_B, 1))  # (TILE_B, D)
    pos_sp = jnp.tile(params["pos"][1:], (TILE_B, 1))                    # (NSP, D)
    row = jnp.arange(NT)
    tile_id = jnp.where(row < TILE_B, row, (row - TILE_B) // T)
    attn_bias = jnp.where(tile_id[:, None] == tile_id[None, :],
                          0.0, NEG).astype(f32)                          # (NT, NT)

    kp = [
        params["w_emb"].astype(bf16), params["b_emb"], cls_rows, pos_sp,
        attn_bias,
        params["ln1_w"], params["ln1_b"],
        params["w_qkv"].astype(bf16), params["b_qkv"],
        params["w_proj"].astype(bf16), params["b_proj"], params["ls1"],
        params["ln2_w"], params["ln2_b"],
        params["w_fc1"].astype(bf16), params["b_fc1"],
        params["w_fc2"].astype(bf16), params["b_fc2"], params["ls2"],
        params["lnf_w"], params["lnf_b"],
    ]

    in_specs = [pl.BlockSpec((1, NSP, PDIM), lambda i: (i, 0, 0))]
    in_specs += [_full_spec(p) for p in kp]

    # TODO(synk): beyond toy size set vmem_limit_bytes (16/32 MiB scoped
    # defaults on v5e/v6e) sized to the resident + streamed buffers.
    out = pl.pallas_call(
        vit_tiles_kernel,
        out_shape=jax.ShapeDtypeStruct((nb, 1, TILE_B * D), f32),
        grid=(nb,),
        in_specs=in_specs,
        out_specs=pl.BlockSpec((1, 1, TILE_B * D), lambda i: (i, 0, 0)),
        compiler_params=pltpu.CompilerParams(
            dimension_semantics=("parallel",)),
    )(tok, *kp)

    return out.reshape(n, D)        # (.detach().cpu() in torch -> just return)


if __name__ == "__main__":
    key = jax.random.PRNGKey(0)
    kx, kparam = jax.random.split(key)
    x = jax.random.normal(kx, (B, C, H, W), jnp.float32)
    params = init_params(kparam)

    feats = local_feature_extractor_fm(x, params)
    jax.block_until_ready(feats)

    n_expected = B * (H // PS) * (W // PS)
    assert feats.shape == (n_expected, D), feats.shape
    assert bool(jnp.all(jnp.isfinite(feats)))
    print("KERNEL_OK")
</pallas_src>

<mosaic_0001>
module attributes {stable_mosaic.version = 11 : i64} {
  func.func @vit_tiles_kernel(%arg0: i32, %arg1: memref<1x32x12xbf16, #tpu.memory_space<vmem>>, %arg2: memref<12x32xbf16, #tpu.memory_space<vmem>>, %arg3: memref<1x32xf32, #tpu.memory_space<vmem>>, %arg4: memref<8x32xf32, #tpu.memory_space<vmem>>, %arg5: memref<32x32xf32, #tpu.memory_space<vmem>>, %arg6: memref<40x40xf32, #tpu.memory_space<vmem>>, %arg7: memref<2x1x32xf32, #tpu.memory_space<vmem>>, %arg8: memref<2x1x32xf32, #tpu.memory_space<vmem>>, %arg9: memref<2x32x96xbf16, #tpu.memory_space<vmem>>, %arg10: memref<2x1x96xf32, #tpu.memory_space<vmem>>, %arg11: memref<2x32x32xbf16, #tpu.memory_space<vmem>>, %arg12: memref<2x1x32xf32, #tpu.memory_space<vmem>>, %arg13: memref<2x1x32xf32, #tpu.memory_space<vmem>>, %arg14: memref<2x1x32xf32, #tpu.memory_space<vmem>>, %arg15: memref<2x1x32xf32, #tpu.memory_space<vmem>>, %arg16: memref<2x32x128xbf16, #tpu.memory_space<vmem>>, %arg17: memref<2x1x128xf32, #tpu.memory_space<vmem>>, %arg18: memref<2x128x32xbf16, #tpu.memory_space<vmem>>, %arg19: memref<2x1x32xf32, #tpu.memory_space<vmem>>, %arg20: memref<2x1x32xf32, #tpu.memory_space<vmem>>, %arg21: memref<1x32xf32, #tpu.memory_space<vmem>>, %arg22: memref<1x32xf32, #tpu.memory_space<vmem>>, %arg23: memref<1x1x256xf32, #tpu.memory_space<vmem>>) attributes {dimension_semantics = [#tpu.dimension_semantics<parallel>], iteration_bounds = array<i64: 2>, scalar_prefetch = 0 : i64, scratch_operands = 0 : i64, tpu.core_type = #tpu.core_type<tc>, window_params = [{transform_indices = @transform_0, window_bounds = array<i64: 1, 32, 12>}, {pipeline_mode = #tpu.pipeline_mode<synchronous>, transform_indices = @transform_1, window_bounds = array<i64: 12, 32>}, {pipeline_mode = #tpu.pipeline_mode<synchronous>, transform_indices = @transform_2, window_bounds = array<i64: 1, 32>}, {pipeline_mode = #tpu.pipeline_mode<synchronous>, transform_indices = @transform_3, window_bounds = array<i64: 8, 32>}, {pipeline_mode = #tpu.pipeline_mode<synchronous>, transform_indices = @transform_4, window_bounds = array<i64: 32, 32>}, {pipeline_mode = #tpu.pipeline_mode<synchronous>, transform_indices = @transform_5, window_bounds = array<i64: 40, 40>}, {pipeline_mode = #tpu.pipeline_mode<synchronous>, transform_indices = @transform_6, window_bounds = array<i64: 2, 1, 32>}, {pipeline_mode = #tpu.pipeline_mode<synchronous>, transform_indices = @transform_7, window_bounds = array<i64: 2, 1, 32>}, {pipeline_mode = #tpu.pipeline_mode<synchronous>, transform_indices = @transform_8, window_bounds = array<i64: 2, 32, 96>}, {pipeline_mode = #tpu.pipeline_mode<synchronous>, transform_indices = @transform_9, window_bounds = array<i64: 2, 1, 96>}, {pipeline_mode = #tpu.pipeline_mode<synchronous>, transform_indices = @transform_10, window_bounds = array<i64: 2, 32, 32>}, {pipeline_mode = #tpu.pipeline_mode<synchronous>, transform_indices = @transform_11, window_bounds = array<i64: 2, 1, 32>}, {pipeline_mode = #tpu.pipeline_mode<synchronous>, transform_indices = @transform_12, window_bounds = array<i64: 2, 1, 32>}, {pipeline_mode = #tpu.pipeline_mode<synchronous>, transform_indices = @transform_13, window_bounds = array<i64: 2, 1, 32>}, {pipeline_mode = #tpu.pipeline_mode<synchronous>, transform_indices = @transform_14, window_bounds = array<i64: 2, 1, 32>}, {pipeline_mode = #tpu.pipeline_mode<synchronous>, transform_indices = @transform_15, window_bounds = array<i64: 2, 32, 128>}, {pipeline_mode = #tpu.pipeline_mode<synchronous>, transform_indices = @transform_16, window_bounds = array<i64: 2, 1, 128>}, {pipeline_mode = #tpu.pipeline_mode<synchronous>, transform_indices = @transform_17, window_bounds = array<i64: 2, 128, 32>}, {pipeline_mode = #tpu.pipeline_mode<synchronous>, transform_indices = @transform_18, window_bounds = array<i64: 2, 1, 32>}, {pipeline_mode = #tpu.pipeline_mode<synchronous>, transform_indices = @transform_19, window_bounds = array<i64: 2, 1, 32>}, {pipeline_mode = #tpu.pipeline_mode<synchronous>, transform_indices = @transform_20, window_bounds = array<i64: 1, 32>}, {pipeline_mode = #tpu.pipeline_mode<synchronous>, transform_indices = @transform_21, window_bounds = array<i64: 1, 32>}, {transform_indices = @transform_22, window_bounds = array<i64: 1, 1, 256>}]} {
    %c0 = arith.constant 0 : index
    %c0_0 = arith.constant 0 : index
    %c0_1 = arith.constant 0 : index
    %0 = vector.load %arg1[%c0, %c0_0, %c0_1] : memref<1x32x12xbf16, #tpu.memory_space<vmem>>, vector<1x32x12xbf16>
    %1 = vector.shape_cast %0 : vector<1x32x12xbf16> to vector<32x12xbf16>
    %c0_2 = arith.constant 0 : index
    %c0_3 = arith.constant 0 : index
    %2 = vector.load %arg2[%c0_2, %c0_3] : memref<12x32xbf16, #tpu.memory_space<vmem>>, vector<12x32xbf16>
    %cst = arith.constant dense<0.000000e+00> : vector<32x32xf32>
    %3 = tpu.matmul %1, %2, %cst {dimension_numbers = #tpu.dot_dimension_numbers<[1], [0], [0], [1], [0, 0, 1, 1], [], []>} : vector<32x12xbf16>, vector<12x32xbf16>, vector<32x32xf32> -> vector<32x32xf32>
    %c0_4 = arith.constant 0 : index
    %c0_5 = arith.constant 0 : index
    %4 = vector.load %arg3[%c0_4, %c0_5] : memref<1x32xf32, #tpu.memory_space<vmem>>, vector<1x32xf32>
    %5 = vector.broadcast %4 : vector<1x32xf32> to vector<32x32xf32>
    %6 = arith.addf %3, %5 : vector<32x32xf32>
    %c0_6 = arith.constant 0 : index
    %c0_7 = arith.constant 0 : index
    %7 = vector.load %arg4[%c0_6, %c0_7] : memref<8x32xf32, #tpu.memory_space<vmem>>, vector<8x32xf32>
    %c0_8 = arith.constant 0 : index
    %c0_9 = arith.constant 0 : index
    %8 = vector.load %arg5[%c0_8, %c0_9] : memref<32x32xf32, #tpu.memory_space<vmem>>, vector<32x32xf32>
    %9 = arith.addf %6, %8 : vector<32x32xf32>
    %10 = tpu.concatenate %7, %9 in 0 : vector<8x32xf32>, vector<32x32xf32> -> vector<40x32xf32>
    %c0_10 = arith.constant 0 : index
    %c0_11 = arith.constant 0 : index
    %11 = vector.load %arg6[%c0_10, %c0_11] : memref<40x40xf32, #tpu.memory_space<vmem>>, vector<40x40xf32>
    %c0_12 = arith.constant 0 : index
    %c0_13 = arith.constant 0 : index
    %c0_14 = arith.constant 0 : index
    %12 = vector.load %arg7[%c0_12, %c0_13, %c0_14] : memref<2x1x32xf32, #tpu.memory_space<vmem>>, vector<1x1x32xf32>
    %13 = vector.shape_cast %12 : vector<1x1x32xf32> to vector<1x32xf32>
    %c0_15 = arith.constant 0 : index
    %c0_16 = arith.constant 0 : index
    %c0_17 = arith.constant 0 : index
    %14 = vector.load %arg8[%c0_15, %c0_16, %c0_17] : memref<2x1x32xf32, #tpu.memory_space<vmem>>, vector<1x1x32xf32>
    %15 = vector.shape_cast %14 : vector<1x1x32xf32> to vector<1x32xf32>
    %cst_18 = arith.constant dense<0.000000e+00> : vector<40xf32>
    %16 = vector.multi_reduction <add>, %10, %cst_18 [1] : vector<40x32xf32> to vector<40xf32>
    %17 = vector.shape_cast %16 : vector<40xf32> to vector<40x1xf32>
    %cst_19 = arith.constant 3.200000e+01 : f32
    %18 = vector.broadcast %cst_19 : f32 to vector<40x1xf32>
    %19 = arith.divf %17, %18 : vector<40x1xf32>
    %20 = arith.mulf %10, %10 : vector<40x32xf32>
    %cst_20 = arith.constant dense<0.000000e+00> : vector<40xf32>
    %21 = vector.multi_reduction <add>, %20, %cst_20 [1] : vector<40x32xf32> to vector<40xf32>
    %22 = vector.shape_cast %21 : vector<40xf32> to vector<40x1xf32>
    %cst_21 = arith.constant 3.200000e+01 : f32
    %23 = vector.broadcast %cst_21 : f32 to vector<40x1xf32>
    %24 = arith.divf %22, %23 : vector<40x1xf32>
    %25 = arith.mulf %19, %19 : vector<40x1xf32>
    %26 = arith.subf %24, %25 : vector<40x1xf32>
    %cst_22 = arith.constant 0.000000e+00 : f32
    %27 = vector.broadcast %cst_22 : f32 to vector<40x1xf32>
    %28 = arith.maximumf %26, %27 : vector<40x1xf32>
    %29 = vector.broadcast %19 : vector<40x1xf32> to vector<40x32xf32>
    %30 = arith.subf %10, %29 : vector<40x32xf32>
    %cst_23 = arith.constant 9.99999997E-7 : f32
    %31 = vector.broadcast %cst_23 : f32 to vector<40x1xf32>
    %32 = arith.addf %28, %31 : vector<40x1xf32>
    %33 = math.rsqrt %32 : vector<40x1xf32>
    %34 = vector.broadcast %33 : vector<40x1xf32> to vector<40x32xf32>
    %35 = arith.mulf %30, %34 : vector<40x32xf32>
    %36 = vector.broadcast %13 : vector<1x32xf32> to vector<40x32xf32>
    %37 = arith.mulf %35, %36 : vector<40x32xf32>
    %38 = vector.broadcast %15 : vector<1x32xf32> to vector<40x32xf32>
    %39 = arith.addf %37, %38 : vector<40x32xf32>
    %40 = arith.truncf %39 : vector<40x32xf32> to vector<40x32xbf16>
    %c0_24 = arith.constant 0 : index
    %c0_25 = arith.constant 0 : index
    %c0_26 = arith.constant 0 : index
    %41 = vector.load %arg9[%c0_24, %c0_25, %c0_26] : memref<2x32x96xbf16, #tpu.memory_space<vmem>>, vector<1x32x96xbf16>
    %42 = vector.shape_cast %41 : vector<1x32x96xbf16> to vector<32x96xbf16>
    %cst_27 = arith.constant dense<0.000000e+00> : vector<40x96xf32>
    %43 = tpu.matmul %40, %42, %cst_27 {dimension_numbers = #tpu.dot_dimension_numbers<[1], [0], [0], [1], [0, 0, 1, 1], [], []>} : vector<40x32xbf16>, vector<32x96xbf16>, vector<40x96xf32> -> vector<40x96xf32>
    %c0_28 = arith.constant 0 : index
    %c0_29 = arith.constant 0 : index
    %c0_30 = arith.constant 0 : index
    %44 = vector.load %arg10[%c0_28, %c0_29, %c0_30] : memref<2x1x96xf32, #tpu.memory_space<vmem>>, vector<1x1x96xf32>
    %45 = vector.shape_cast %44 : vector<1x1x96xf32> to vector<1x96xf32>
    %46 = vector.broadcast %45 : vector<1x96xf32> to vector<40x96xf32>
    %47 = arith.addf %43, %46 : vector<40x96xf32>
    %48 = arith.truncf %47 : vector<40x96xf32> to vector<40x96xbf16>
    %49 = vector.extract_strided_slice %48 {offsets = [0, 0], sizes = [40, 8], strides = [1, 1]} : vector<40x96xbf16> to vector<40x8xbf16>
    %50 = vector.extract_strided_slice %48 {offsets = [0, 32], sizes = [40, 8], strides = [1, 1]} : vector<40x96xbf16> to vector<40x8xbf16>
    %51 = vector.extract_strided_slice %48 {offsets = [0, 64], sizes = [40, 8], strides = [1, 1]} : vector<40x96xbf16> to vector<40x8xbf16>
    %cst_31 = arith.constant dense<0.000000e+00> : vector<40x40xf32>
    %52 = tpu.matmul %49, %50, %cst_31 {dimension_numbers = #tpu.dot_dimension_numbers<[1], [1], [0], [0], [0, 0, 1, 0], [], []>} : vector<40x8xbf16>, vector<40x8xbf16>, vector<40x40xf32> -> vector<40x40xf32>
    %cst_32 = arith.constant 0.353553385 : f32
    %53 = vector.broadcast %cst_32 : f32 to vector<40x40xf32>
    %54 = arith.mulf %52, %53 : vector<40x40xf32>
    %55 = arith.addf %54, %11 : vector<40x40xf32>
    %cst_33 = arith.constant dense<0xFF800000> : vector<40xf32>
    %56 = vector.multi_reduction <maximumf>, %55, %cst_33 [1] : vector<40x40xf32> to vector<40xf32>
    %57 = vector.shape_cast %56 : vector<40xf32> to vector<40x1xf32>
    %58 = vector.broadcast %57 : vector<40x1xf32> to vector<40x40xf32>
    %59 = arith.subf %55, %58 : vector<40x40xf32>
    %60 = math.exp %59 : vector<40x40xf32>
    %cst_34 = arith.constant dense<0.000000e+00> : vector<40xf32>
    %61 = vector.multi_reduction <add>, %60, %cst_34 [1] : vector<40x40xf32> to vector<40xf32>
    %62 = vector.shape_cast %61 : vector<40xf32> to vector<40x1xf32>
    %63 = tpu.reciprocal %62 {approx = true} : vector<40x1xf32> -> vector<40x1xf32>
    %64 = vector.broadcast %63 : vector<40x1xf32> to vector<40x40xf32>
    %65 = arith.mulf %60, %64 : vector<40x40xf32>
    %66 = arith.truncf %65 : vector<40x40xf32> to vector<40x40xbf16>
    %cst_35 = arith.constant dense<0.000000e+00> : vector<40x8xf32>
    %67 = tpu.matmul %66, %51, %cst_35 {dimension_numbers = #tpu.dot_dimension_numbers<[1], [0], [0], [1], [0, 0, 1, 1], [], []>} : vector<40x40xbf16>, vector<40x8xbf16>, vector<40x8xf32> -> vector<40x8xf32>
    %68 = vector.extract_strided_slice %48 {offsets = [0, 8], sizes = [40, 8], strides = [1, 1]} : vector<40x96xbf16> to vector<40x8xbf16>
    %69 = vector.extract_strided_slice %48 {offsets = [0, 40], sizes = [40, 8], strides = [1, 1]} : vector<40x96xbf16> to vector<40x8xbf16>
    %70 = vector.extract_strided_slice %48 {offsets = [0, 72], sizes = [40, 8], strides = [1, 1]} : vector<40x96xbf16> to vector<40x8xbf16>
    %cst_36 = arith.constant dense<0.000000e+00> : vector<40x40xf32>
    %71 = tpu.matmul %68, %69, %cst_36 {dimension_numbers = #tpu.dot_dimension_numbers<[1], [1], [0], [0], [0, 0, 1, 0], [], []>} : vector<40x8xbf16>, vector<40x8xbf16>, vector<40x40xf32> -> vector<40x40xf32>
    %cst_37 = arith.constant 0.353553385 : f32
    %72 = vector.broadcast %cst_37 : f32 to vector<40x40xf32>
    %73 = arith.mulf %71, %72 : vector<40x40xf32>
    %74 = arith.addf %73, %11 : vector<40x40xf32>
    %cst_38 = arith.constant dense<0xFF800000> : vector<40xf32>
    %75 = vector.multi_reduction <maximumf>, %74, %cst_38 [1] : vector<40x40xf32> to vector<40xf32>
    %76 = vector.shape_cast %75 : vector<40xf32> to vector<40x1xf32>
    %77 = vector.broadcast %76 : vector<40x1xf32> to vector<40x40xf32>
    %78 = arith.subf %74, %77 : vector<40x40xf32>
    %79 = math.exp %78 : vector<40x40xf32>
    %cst_39 = arith.constant dense<0.000000e+00> : vector<40xf32>
    %80 = vector.multi_reduction <add>, %79, %cst_39 [1] : vector<40x40xf32> to vector<40xf32>
    %81 = vector.shape_cast %80 : vector<40xf32> to vector<40x1xf32>
    %82 = tpu.reciprocal %81 {approx = true} : vector<40x1xf32> -> vector<40x1xf32>
    %83 = vector.broadcast %82 : vector<40x1xf32> to vector<40x40xf32>
    %84 = arith.mulf %79, %83 : vector<40x40xf32>
    %85 = arith.truncf %84 : vector<40x40xf32> to vector<40x40xbf16>
    %cst_40 = arith.constant dense<0.000000e+00> : vector<40x8xf32>
    %86 = tpu.matmul %85, %70, %cst_40 {dimension_numbers = #tpu.dot_dimension_numbers<[1], [0], [0], [1], [0, 0, 1, 1], [], []>} : vector<40x40xbf16>, vector<40x8xbf16>, vector<40x8xf32> -> vector<40x8xf32>
    %87 = vector.extract_strided_slice %48 {offsets = [0, 16], sizes = [40, 8], strides = [1, 1]} : vector<40x96xbf16> to vector<40x8xbf16>
    %88 = vector.extract_strided_slice %48 {offsets = [0, 48], sizes = [40, 8], strides = [1, 1]} : vector<40x96xbf16> to vector<40x8xbf16>
    %89 = vector.extract_strided_slice %48 {offsets = [0, 80], sizes = [40, 8], strides = [1, 1]} : vector<40x96xbf16> to vector<40x8xbf16>
    %cst_41 = arith.constant dense<0.000000e+00> : vector<40x40xf32>
    %90 = tpu.matmul %87, %88, %cst_41 {dimension_numbers = #tpu.dot_dimension_numbers<[1], [1], [0], [0], [0, 0, 1, 0], [], []>} : vector<40x8xbf16>, vector<40x8xbf16>, vector<40x40xf32> -> vector<40x40xf32>
    %cst_42 = arith.constant 0.353553385 : f32
    %91 = vector.broadcast %cst_42 : f32 to vector<40x40xf32>
    %92 = arith.mulf %90, %91 : vector<40x40xf32>
    %93 = arith.addf %92, %11 : vector<40x40xf32>
    %cst_43 = arith.constant dense<0xFF800000> : vector<40xf32>
    %94 = vector.multi_reduction <maximumf>, %93, %cst_43 [1] : vector<40x40xf32> to vector<40xf32>
    %95 = vector.shape_cast %94 : vector<40xf32> to vector<40x1xf32>
    %96 = vector.broadcast %95 : vector<40x1xf32> to vector<40x40xf32>
    %97 = arith.subf %93, %96 : vector<40x40xf32>
    %98 = math.exp %97 : vector<40x40xf32>
    %cst_44 = arith.constant dense<0.000000e+00> : vector<40xf32>
    %99 = vector.multi_reduction <add>, %98, %cst_44 [1] : vector<40x40xf32> to vector<40xf32>
    %100 = vector.shape_cast %99 : vector<40xf32> to vector<40x1xf32>
    %101 = tpu.reciprocal %100 {approx = true} : vector<40x1xf32> -> vector<40x1xf32>
    %102 = vector.broadcast %101 : vector<40x1xf32> to vector<40x40xf32>
    %103 = arith.mulf %98, %102 : vector<40x40xf32>
    %104 = arith.truncf %103 : vector<40x40xf32> to vector<40x40xbf16>
    %cst_45 = arith.constant dense<0.000000e+00> : vector<40x8xf32>
    %105 = tpu.matmul %104, %89, %cst_45 {dimension_numbers = #tpu.dot_dimension_numbers<[1], [0], [0], [1], [0, 0, 1, 1], [], []>} : vector<40x40xbf16>, vector<40x8xbf16>, vector<40x8xf32> -> vector<40x8xf32>
    %106 = vector.extract_strided_slice %48 {offsets = [0, 24], sizes = [40, 8], strides = [1, 1]} : vector<40x96xbf16> to vector<40x8xbf16>
    %107 = vector.extract_strided_slice %48 {offsets = [0, 56], sizes = [40, 8], strides = [1, 1]} : vector<40x96xbf16> to vector<40x8xbf16>
    %108 = vector.extract_strided_slice %48 {offsets = [0, 88], sizes = [40, 8], strides = [1, 1]} : vector<40x96xbf16> to vector<40x8xbf16>
    %cst_46 = arith.constant dense<0.000000e+00> : vector<40x40xf32>
    %109 = tpu.matmul %106, %107, %cst_46 {dimension_numbers = #tpu.dot_dimension_numbers<[1], [1], [0], [0], [0, 0, 1, 0], [], []>} : vector<40x8xbf16>, vector<40x8xbf16>, vector<40x40xf32> -> vector<40x40xf32>
    %cst_47 = arith.constant 0.353553385 : f32
    %110 = vector.broadcast %cst_47 : f32 to vector<40x40xf32>
    %111 = arith.mulf %109, %110 : vector<40x40xf32>
    %112 = arith.addf %111, %11 : vector<40x40xf32>
    %cst_48 = arith.constant dense<0xFF800000> : vector<40xf32>
    %113 = vector.multi_reduction <maximumf>, %112, %cst_48 [1] : vector<40x40xf32> to vector<40xf32>
    %114 = vector.shape_cast %113 : vector<40xf32> to vector<40x1xf32>
    %115 = vector.broadcast %114 : vector<40x1xf32> to vector<40x40xf32>
    %116 = arith.subf %112, %115 : vector<40x40xf32>
    %117 = math.exp %116 : vector<40x40xf32>
    %cst_49 = arith.constant dense<0.000000e+00> : vector<40xf32>
    %118 = vector.multi_reduction <add>, %117, %cst_49 [1] : vector<40x40xf32> to vector<40xf32>
    %119 = vector.shape_cast %118 : vector<40xf32> to vector<40x1xf32>
    %120 = tpu.reciprocal %119 {approx = true} : vector<40x1xf32> -> vector<40x1xf32>
    %121 = vector.broadcast %120 : vector<40x1xf32> to vector<40x40xf32>
    %122 = arith.mulf %117, %121 : vector<40x40xf32>
    %123 = arith.truncf %122 : vector<40x40xf32> to vector<40x40xbf16>
    %cst_50 = arith.constant dense<0.000000e+00> : vector<40x8xf32>
    %124 = tpu.matmul %123, %108, %cst_50 {dimension_numbers = #tpu.dot_dimension_numbers<[1], [0], [0], [1], [0, 0, 1, 1], [], []>} : vector<40x40xbf16>, vector<40x8xbf16>, vector<40x8xf32> -> vector<40x8xf32>
    %125 = tpu.concatenate %67, %86, %105, %124 in 1 : vector<40x8xf32>, vector<40x8xf32>, vector<40x8xf32>, vector<40x8xf32> -> vector<40x32xf32>
    %126 = arith.truncf %125 : vector<40x32xf32> to vector<40x32xbf16>
    %c0_51 = arith.constant 0 : index
    %c0_52 = arith.constant 0 : index
    %c0_53 = arith.constant 0 : index
    %127 = vector.load %arg11[%c0_51, %c0_52, %c0_53] : memref<2x32x32xbf16, #tpu.memory_space<vmem>>, vector<1x32x32xbf16>
    %128 = vector.shape_cast %127 : vector<1x32x32xbf16> to vector<32x32xbf16>
    %cst_54 = arith.constant dense<0.000000e+00> : vector<40x32xf32>
    %129 = tpu.matmul %126, %128, %cst_54 {dimension_numbers = #tpu.dot_dimension_numbers<[1], [0], [0], [1], [0, 0, 1, 1], [], []>} : vector<40x32xbf16>, vector<32x32xbf16>, vector<40x32xf32> -> vector<40x32xf32>
    %c0_55 = arith.constant 0 : index
    %c0_56 = arith.constant 0 : index
    %c0_57 = arith.constant 0 : index
    %130 = vector.load %arg12[%c0_55, %c0_56, %c0_57] : memref<2x1x32xf32, #tpu.memory_space<vmem>>, vector<1x1x32xf32>
    %131 = vector.shape_cast %130 : vector<1x1x32xf32> to vector<1x32xf32>
    %132 = vector.broadcast %131 : vector<1x32xf32> to vector<40x32xf32>
    %133 = arith.addf %129, %132 : vector<40x32xf32>
    %c0_58 = arith.constant 0 : index
    %c0_59 = arith.constant 0 : index
    %c0_60 = arith.constant 0 : index
    %134 = vector.load %arg13[%c0_58, %c0_59, %c0_60] : memref<2x1x32xf32, #tpu.memory_space<vmem>>, vector<1x1x32xf32>
    %135 = vector.shape_cast %134 : vector<1x1x32xf32> to vector<1x32xf32>
    %136 = vector.broadcast %135 : vector<1x32xf32> to vector<40x32xf32>
    %137 = arith.mulf %136, %133 : vector<40x32xf32>
    %138 = arith.addf %10, %137 : vector<40x32xf32>
    %c0_61 = arith.constant 0 : index
    %c0_62 = arith.constant 0 : index
    %c0_63 = arith.constant 0 : index
    %139 = vector.load %arg14[%c0_61, %c0_62, %c0_63] : memref<2x1x32xf32, #tpu.memory_space<vmem>>, vector<1x1x32xf32>
    %140 = vector.shape_cast %139 : vector<1x1x32xf32> to vector<1x32xf32>
    %c0_64 = arith.constant 0 : index
    %c0_65 = arith.constant 0 : index
    %c0_66 = arith.constant 0 : index
    %141 = vector.load %arg15[%c0_64, %c0_65, %c0_66] : memref<2x1x32xf32, #tpu.memory_space<vmem>>, vector<1x1x32xf32>
    %142 = vector.shape_cast %141 : vector<1x1x32xf32> to vector<1x32xf32>
    %cst_67 = arith.constant dense<0.000000e+00> : vector<40xf32>
    %143 = vector.multi_reduction <add>, %138, %cst_67 [1] : vector<40x32xf32> to vector<40xf32>
    %144 = vector.shape_cast %143 : vector<40xf32> to vector<40x1xf32>
    %cst_68 = arith.constant 3.200000e+01 : f32
    %145 = vector.broadcast %cst_68 : f32 to vector<40x1xf32>
    %146 = arith.divf %144, %145 : vector<40x1xf32>
    %147 = arith.mulf %138, %138 : vector<40x32xf32>
    %cst_69 = arith.constant dense<0.000000e+00> : vector<40xf32>
    %148 = vector.multi_reduction <add>, %147, %cst_69 [1] : vector<40x32xf32> to vector<40xf32>
    %149 = vector.shape_cast %148 : vector<40xf32> to vector<40x1xf32>
    %cst_70 = arith.constant 3.200000e+01 : f32
    %150 = vector.broadcast %cst_70 : f32 to vector<40x1xf32>
    %151 = arith.divf %149, %150 : vector<40x1xf32>
    %152 = arith.mulf %146, %146 : vector<40x1xf32>
    %153 = arith.subf %151, %152 : vector<40x1xf32>
    %cst_71 = arith.constant 0.000000e+00 : f32
    %154 = vector.broadcast %cst_71 : f32 to vector<40x1xf32>
    %155 = arith.maximumf %153, %154 : vector<40x1xf32>
    %156 = vector.broadcast %146 : vector<40x1xf32> to vector<40x32xf32>
    %157 = arith.subf %138, %156 : vector<40x32xf32>
    %cst_72 = arith.constant 9.99999997E-7 : f32
    %158 = vector.broadcast %cst_72 : f32 to vector<40x1xf32>
    %159 = arith.addf %155, %158 : vector<40x1xf32>
    %160 = math.rsqrt %159 : vector<40x1xf32>
    %161 = vector.broadcast %160 : vector<40x1xf32> to vector<40x32xf32>
    %162 = arith.mulf %157, %161 : vector<40x32xf32>
    %163 = vector.broadcast %140 : vector<1x32xf32> to vector<40x32xf32>
    %164 = arith.mulf %162, %163 : vector<40x32xf32>
    %165 = vector.broadcast %142 : vector<1x32xf32> to vector<40x32xf32>
    %166 = arith.addf %164, %165 : vector<40x32xf32>
    %167 = arith.truncf %166 : vector<40x32xf32> to vector<40x32xbf16>
    %c0_73 = arith.constant 0 : index
    %c0_74 = arith.constant 0 : index
    %c0_75 = arith.constant 0 : index
    %168 = vector.load %arg16[%c0_73, %c0_74, %c0_75] : memref<2x32x128xbf16, #tpu.memory_space<vmem>>, vector<1x32x128xbf16>
    %169 = vector.shape_cast %168 : vector<1x32x128xbf16> to vector<32x128xbf16>
    %cst_76 = arith.constant dense<0.000000e+00> : vector<40x128xf32>
    %170 = tpu.matmul %167, %169, %cst_76 {dimension_numbers = #tpu.dot_dimension_numbers<[1], [0], [0], [1], [0, 0, 1, 1], [], []>} : vector<40x32xbf16>, vector<32x128xbf16>, vector<40x128xf32> -> vector<40x128xf32>
    %c0_77 = arith.constant 0 : index
    %c0_78 = arith.constant 0 : index
    %c0_79 = arith.constant 0 : index
    %171 = vector.load %arg17[%c0_77, %c0_78, %c0_79] : memref<2x1x128xf32, #tpu.memory_space<vmem>>, vector<1x1x128xf32>
    %172 = vector.shape_cast %171 : vector<1x1x128xf32> to vector<1x128xf32>
    %173 = vector.broadcast %172 : vector<1x128xf32> to vector<40x128xf32>
    %174 = arith.addf %170, %173 : vector<40x128xf32>
    %cst_80 = arith.constant 5.000000e-01 : f32
    %175 = vector.broadcast %cst_80 : f32 to vector<40x128xf32>
    %176 = arith.mulf %175, %174 : vector<40x128xf32>
    %cst_81 = arith.constant 4.471500e-02 : f32
    %177 = vector.broadcast %cst_81 : f32 to vector<40x128xf32>
    %178 = arith.mulf %177, %174 : vector<40x128xf32>
    %179 = arith.mulf %178, %174 : vector<40x128xf32>
    %180 = arith.mulf %179, %174 : vector<40x128xf32>
    %181 = arith.addf %174, %180 : vector<40x128xf32>
    %cst_82 = arith.constant 0.797884583 : f32
    %182 = vector.broadcast %cst_82 : f32 to vector<40x128xf32>
    %183 = arith.mulf %182, %181 : vector<40x128xf32>
    %184 = math.tanh %183 : vector<40x128xf32>
    %cst_83 = arith.constant 1.000000e+00 : f32
    %185 = vector.broadcast %cst_83 : f32 to vector<40x128xf32>
    %186 = arith.addf %185, %184 : vector<40x128xf32>
    %187 = arith.mulf %176, %186 : vector<40x128xf32>
    %188 = arith.truncf %187 : vector<40x128xf32> to vector<40x128xbf16>
    %c0_84 = arith.constant 0 : index
    %c0_85 = arith.constant 0 : index
    %c0_86 = arith.constant 0 : index
    %189 = vector.load %arg18[%c0_84, %c0_85, %c0_86] : memref<2x128x32xbf16, #tpu.memory_space<vmem>>, vector<1x128x32xbf16>
    %190 = vector.shape_cast %189 : vector<1x128x32xbf16> to vector<128x32xbf16>
    %cst_87 = arith.constant dense<0.000000e+00> : vector<40x32xf32>
    %191 = tpu.matmul %188, %190, %cst_87 {dimension_numbers = #tpu.dot_dimension_numbers<[1], [0], [0], [1], [0, 0, 1, 1], [], []>} : vector<40x128xbf16>, vector<128x32xbf16>, vector<40x32xf32> -> vector<40x32xf32>
    %c0_88 = arith.constant 0 : index
    %c0_89 = arith.constant 0 : index
    %c0_90 = arith.constant 0 : index
    %192 = vector.load %arg19[%c0_88, %c0_89, %c0_90] : memref<2x1x32xf32, #tpu.memory_space<vmem>>, vector<1x1x32xf32>
    %193 = vector.shape_cast %192 : vector<1x1x32xf32> to vector<1x32xf32>
    %194 = vector.broadcast %193 : vector<1x32xf32> to vector<40x32xf32>
    %195 = arith.addf %191, %194 : vector<40x32xf32>
    %c0_91 = arith.constant 0 : index
    %c0_92 = arith.constant 0 : index
    %c0_93 = arith.constant 0 : index
    %196 = vector.load %arg20[%c0_91, %c0_92, %c0_93] : memref<2x1x32xf32, #tpu.memory_space<vmem>>, vector<1x1x32xf32>
    %197 = vector.shape_cast %196 : vector<1x1x32xf32> to vector<1x32xf32>
    %198 = vector.broadcast %197 : vector<1x32xf32> to vector<40x32xf32>
    %199 = arith.mulf %198, %195 : vector<40x32xf32>
    %200 = arith.addf %138, %199 : vector<40x32xf32>
    %c1 = arith.constant 1 : index
    %c0_94 = arith.constant 0 : index
    %c0_95 = arith.constant 0 : index
    %201 = vector.load %arg7[%c1, %c0_94, %c0_95] : memref<2x1x32xf32, #tpu.memory_space<vmem>>, vector<1x1x32xf32>
    %202 = vector.shape_cast %201 : vector<1x1x32xf32> to vector<1x32xf32>
    %c1_96 = arith.constant 1 : index
    %c0_97 = arith.constant 0 : index
    %c0_98 = arith.constant 0 : index
    %203 = vector.load %arg8[%c1_96, %c0_97, %c0_98] : memref<2x1x32xf32, #tpu.memory_space<vmem>>, vector<1x1x32xf32>
    %204 = vector.shape_cast %203 : vector<1x1x32xf32> to vector<1x32xf32>
    %cst_99 = arith.constant dense<0.000000e+00> : vector<40xf32>
    %205 = vector.multi_reduction <add>, %200, %cst_99 [1] : vector<40x32xf32> to vector<40xf32>
    %206 = vector.shape_cast %205 : vector<40xf32> to vector<40x1xf32>
    %cst_100 = arith.constant 3.200000e+01 : f32
    %207 = vector.broadcast %cst_100 : f32 to vector<40x1xf32>
    %208 = arith.divf %206, %207 : vector<40x1xf32>
    %209 = arith.mulf %200, %200 : vector<40x32xf32>
    %cst_101 = arith.constant dense<0.000000e+00> : vector<40xf32>
    %210 = vector.multi_reduction <add>, %209, %cst_101 [1] : vector<40x32xf32> to vector<40xf32>
    %211 = vector.shape_cast %210 : vector<40xf32> to vector<40x1xf32>
    %cst_102 = arith.constant 3.200000e+01 : f32
    %212 = vector.broadcast %cst_102 : f32 to vector<40x1xf32>
    %213 = arith.divf %211, %212 : vector<40x1xf32>
    %214 = arith.mulf %208, %208 : vector<40x1xf32>
    %215 = arith.subf %213, %214 : vector<40x1xf32>
    %cst_103 = arith.constant 0.000000e+00 : f32
    %216 = vector.broadcast %cst_103 : f32 to vector<40x1xf32>
    %217 = arith.maximumf %215, %216 : vector<40x1xf32>
    %218 = vector.broadcast %208 : vector<40x1xf32> to vector<40x32xf32>
    %219 = arith.subf %200, %218 : vector<40x32xf32>
    %cst_104 = arith.constant 9.99999997E-7 : f32
    %220 = vector.broadcast %cst_104 : f32 to vector<40x1xf32>
    %221 = arith.addf %217, %220 : vector<40x1xf32>
    %222 = math.rsqrt %221 : vector<40x1xf32>
    %223 = vector.broadcast %222 : vector<40x1xf32> to vector<40x32xf32>
    %224 = arith.mulf %219, %223 : vector<40x32xf32>
    %225 = vector.broadcast %202 : vector<1x32xf32> to vector<40x32xf32>
    %226 = arith.mulf %224, %225 : vector<40x32xf32>
    %227 = vector.broadcast %204 : vector<1x32xf32> to vector<40x32xf32>
    %228 = arith.addf %226, %227 : vector<40x32xf32>
    %229 = arith.truncf %228 : vector<40x32xf32> to vector<40x32xbf16>
    %c1_105 = arith.constant 1 : index
    %c0_106 = arith.constant 0 : index
    %c0_107 = arith.constant 0 : index
    %230 = vector.load %arg9[%c1_105, %c0_106, %c0_107] : memref<2x32x96xbf16, #tpu.memory_space<vmem>>, vector<1x32x96xbf16>
    %231 = vector.shape_cast %230 : vector<1x32x96xbf16> to vector<32x96xbf16>
    %cst_108 = arith.constant dense<0.000000e+00> : vector<40x96xf32>
    %232 = tpu.matmul %229, %231, %cst_108 {dimension_numbers = #tpu.dot_dimension_numbers<[1], [0], [0], [1], [0, 0, 1, 1], [], []>} : vector<40x32xbf16>, vector<32x96xbf16>, vector<40x96xf32> -> vector<40x96xf32>
    %c1_109 = arith.constant 1 : index
    %c0_110 = arith.constant 0 : index
    %c0_111 = arith.constant 0 : index
    %233 = vector.load %arg10[%c1_109, %c0_110, %c0_111] : memref<2x1x96xf32, #tpu.memory_space<vmem>>, vector<1x1x96xf32>
    %234 = vector.shape_cast %233 : vector<1x1x96xf32> to vector<1x96xf32>
    %235 = vector.broadcast %234 : vector<1x96xf32> to vector<40x96xf32>
    %236 = arith.addf %232, %235 : vector<40x96xf32>
    %237 = arith.truncf %236 : vector<40x96xf32> to vector<40x96xbf16>
    %238 = vector.extract_strided_slice %237 {offsets = [0, 0], sizes = [40, 8], strides = [1, 1]} : vector<40x96xbf16> to vector<40x8xbf16>
    %239 = vector.extract_strided_slice %237 {offsets = [0, 32], sizes = [40, 8], strides = [1, 1]} : vector<40x96xbf16> to vector<40x8xbf16>
    %240 = vector.extract_strided_slice %237 {offsets = [0, 64], sizes = [40, 8], strides = [1, 1]} : vector<40x96xbf16> to vector<40x8xbf16>
    %cst_112 = arith.constant dense<0.000000e+00> : vector<40x40xf32>
    %241 = tpu.matmul %238, %239, %cst_112 {dimension_numbers = #tpu.dot_dimension_numbers<[1], [1], [0], [0], [0, 0, 1, 0], [], []>} : vector<40x8xbf16>, vector<40x8xbf16>, vector<40x40xf32> -> vector<40x40xf32>
    %cst_113 = arith.constant 0.353553385 : f32
    %242 = vector.broadcast %cst_113 : f32 to vector<40x40xf32>
    %243 = arith.mulf %241, %242 : vector<40x40xf32>
    %244 = arith.addf %243, %11 : vector<40x40xf32>
    %cst_114 = arith.constant dense<0xFF800000> : vector<40xf32>
    %245 = vector.multi_reduction <maximumf>, %244, %cst_114 [1] : vector<40x40xf32> to vector<40xf32>
    %246 = vector.shape_cast %245 : vector<40xf32> to vector<40x1xf32>
    %247 = vector.broadcast %246 : vector<40x1xf32> to vector<40x40xf32>
    %248 = arith.subf %244, %247 : vector<40x40xf32>
    %249 = math.exp %248 : vector<40x40xf32>
    %cst_115 = arith.constant dense<0.000000e+00> : vector<40xf32>
    %250 = vector.multi_reduction <add>, %249, %cst_115 [1] : vector<40x40xf32> to vector<40xf32>
    %251 = vector.shape_cast %250 : vector<40xf32> to vector<40x1xf32>
    %252 = tpu.reciprocal %251 {approx = true} : vector<40x1xf32> -> vector<40x1xf32>
    %253 = vector.broadcast %252 : vector<40x1xf32> to vector<40x40xf32>
    %254 = arith.mulf %249, %253 : vector<40x40xf32>
    %255 = arith.truncf %254 : vector<40x40xf32> to vector<40x40xbf16>
    %cst_116 = arith.constant dense<0.000000e+00> : vector<40x8xf32>
    %256 = tpu.matmul %255, %240, %cst_116 {dimension_numbers = #tpu.dot_dimension_numbers<[1], [0], [0], [1], [0, 0, 1, 1], [], []>} : vector<40x40xbf16>, vector<40x8xbf16>, vector<40x8xf32> -> vector<40x8xf32>
    %257 = vector.extract_strided_slice %237 {offsets = [0, 8], sizes = [40, 8], strides = [1, 1]} : vector<40x96xbf16> to vector<40x8xbf16>
    %258 = vector.extract_strided_slice %237 {offsets = [0, 40], sizes = [40, 8], strides = [1, 1]} : vector<40x96xbf16> to vector<40x8xbf16>
    %259 = vector.extract_strided_slice %237 {offsets = [0, 72], sizes = [40, 8], strides = [1, 1]} : vector<40x96xbf16> to vector<40x8xbf16>
    %cst_117 = arith.constant dense<0.000000e+00> : vector<40x40xf32>
    %260 = tpu.matmul %257, %258, %cst_117 {dimension_numbers = #tpu.dot_dimension_numbers<[1], [1], [0], [0], [0, 0, 1, 0], [], []>} : vector<40x8xbf16>, vector<40x8xbf16>, vector<40x40xf32> -> vector<40x40xf32>
    %cst_118 = arith.constant 0.353553385 : f32
    %261 = vector.broadcast %cst_118 : f32 to vector<40x40xf32>
    %262 = arith.mulf %260, %261 : vector<40x40xf32>
    %263 = arith.addf %262, %11 : vector<40x40xf32>
    %cst_119 = arith.constant dense<0xFF800000> : vector<40xf32>
    %264 = vector.multi_reduction <maximumf>, %263, %cst_119 [1] : vector<40x40xf32> to vector<40xf32>
    %265 = vector.shape_cast %264 : vector<40xf32> to vector<40x1xf32>
    %266 = vector.broadcast %265 : vector<40x1xf32> to vector<40x40xf32>
    %267 = arith.subf %263, %266 : vector<40x40xf32>
    %268 = math.exp %267 : vector<40x40xf32>
    %cst_120 = arith.constant dense<0.000000e+00> : vector<40xf32>
    %269 = vector.multi_reduction <add>, %268, %cst_120 [1] : vector<40x40xf32> to vector<40xf32>
    %270 = vector.shape_cast %269 : vector<40xf32> to vector<40x1xf32>
    %271 = tpu.reciprocal %270 {approx = true} : vector<40x1xf32> -> vector<40x1xf32>
    %272 = vector.broadcast %271 : vector<40x1xf32> to vector<40x40xf32>
    %273 = arith.mulf %268, %272 : vector<40x40xf32>
    %274 = arith.truncf %273 : vector<40x40xf32> to vector<40x40xbf16>
    %cst_121 = arith.constant dense<0.000000e+00> : vector<40x8xf32>
    %275 = tpu.matmul %274, %259, %cst_121 {dimension_numbers = #tpu.dot_dimension_numbers<[1], [0], [0], [1], [0, 0, 1, 1], [], []>} : vector<40x40xbf16>, vector<40x8xbf16>, vector<40x8xf32> -> vector<40x8xf32>
    %276 = vector.extract_strided_slice %237 {offsets = [0, 16], sizes = [40, 8], strides = [1, 1]} : vector<40x96xbf16> to vector<40x8xbf16>
    %277 = vector.extract_strided_slice %237 {offsets = [0, 48], sizes = [40, 8], strides = [1, 1]} : vector<40x96xbf16> to vector<40x8xbf16>
    %278 = vector.extract_strided_slice %237 {offsets = [0, 80], sizes = [40, 8], strides = [1, 1]} : vector<40x96xbf16> to vector<40x8xbf16>
    %cst_122 = arith.constant dense<0.000000e+00> : vector<40x40xf32>
    %279 = tpu.matmul %276, %277, %cst_122 {dimension_numbers = #tpu.dot_dimension_numbers<[1], [1], [0], [0], [0, 0, 1, 0], [], []>} : vector<40x8xbf16>, vector<40x8xbf16>, vector<40x40xf32> -> vector<40x40xf32>
    %cst_123 = arith.constant 0.353553385 : f32
    %280 = vector.broadcast %cst_123 : f32 to vector<40x40xf32>
    %281 = arith.mulf %279, %280 : vector<40x40xf32>
    %282 = arith.addf %281, %11 : vector<40x40xf32>
    %cst_124 = arith.constant dense<0xFF800000> : vector<40xf32>
    %283 = vector.multi_reduction <maximumf>, %282, %cst_124 [1] : vector<40x40xf32> to vector<40xf32>
    %284 = vector.shape_cast %283 : vector<40xf32> to vector<40x1xf32>
    %285 = vector.broadcast %284 : vector<40x1xf32> to vector<40x40xf32>
    %286 = arith.subf %282, %285 : vector<40x40xf32>
    %287 = math.exp %286 : vector<40x40xf32>
    %cst_125 = arith.constant dense<0.000000e+00> : vector<40xf32>
    %288 = vector.multi_reduction <add>, %287, %cst_125 [1] : vector<40x40xf32> to vector<40xf32>
    %289 = vector.shape_cast %288 : vector<40xf32> to vector<40x1xf32>
    %290 = tpu.reciprocal %289 {approx = true} : vector<40x1xf32> -> vector<40x1xf32>
    %291 = vector.broadcast %290 : vector<40x1xf32> to vector<40x40xf32>
    %292 = arith.mulf %287, %291 : vector<40x40xf32>
    %293 = arith.truncf %292 : vector<40x40xf32> to vector<40x40xbf16>
    %cst_126 = arith.constant dense<0.000000e+00> : vector<40x8xf32>
    %294 = tpu.matmul %293, %278, %cst_126 {dimension_numbers = #tpu.dot_dimension_numbers<[1], [0], [0], [1], [0, 0, 1, 1], [], []>} : vector<40x40xbf16>, vector<40x8xbf16>, vector<40x8xf32> -> vector<40x8xf32>
    %295 = vector.extract_strided_slice %237 {offsets = [0, 24], sizes = [40, 8], strides = [1, 1]} : vector<40x96xbf16> to vector<40x8xbf16>
    %296 = vector.extract_strided_slice %237 {offsets = [0, 56], sizes = [40, 8], strides = [1, 1]} : vector<40x96xbf16> to vector<40x8xbf16>
    %297 = vector.extract_strided_slice %237 {offsets = [0, 88], sizes = [40, 8], strides = [1, 1]} : vector<40x96xbf16> to vector<40x8xbf16>
    %cst_127 = arith.constant dense<0.000000e+00> : vector<40x40xf32>
    %298 = tpu.matmul %295, %296, %cst_127 {dimension_numbers = #tpu.dot_dimension_numbers<[1], [1], [0], [0], [0, 0, 1, 0], [], []>} : vector<40x8xbf16>, vector<40x8xbf16>, vector<40x40xf32> -> vector<40x40xf32>
    %cst_128 = arith.constant 0.353553385 : f32
    %299 = vector.broadcast %cst_128 : f32 to vector<40x40xf32>
    %300 = arith.mulf %298, %299 : vector<40x40xf32>
    %301 = arith.addf %300, %11 : vector<40x40xf32>
    %cst_129 = arith.constant dense<0xFF800000> : vector<40xf32>
    %302 = vector.multi_reduction <maximumf>, %301, %cst_129 [1] : vector<40x40xf32> to vector<40xf32>
    %303 = vector.shape_cast %302 : vector<40xf32> to vector<40x1xf32>
    %304 = vector.broadcast %303 : vector<40x1xf32> to vector<40x40xf32>
    %305 = arith.subf %301, %304 : vector<40x40xf32>
    %306 = math.exp %305 : vector<40x40xf32>
    %cst_130 = arith.constant dense<0.000000e+00> : vector<40xf32>
    %307 = vector.multi_reduction <add>, %306, %cst_130 [1] : vector<40x40xf32> to vector<40xf32>
    %308 = vector.shape_cast %307 : vector<40xf32> to vector<40x1xf32>
    %309 = tpu.reciprocal %308 {approx = true} : vector<40x1xf32> -> vector<40x1xf32>
    %310 = vector.broadcast %309 : vector<40x1xf32> to vector<40x40xf32>
    %311 = arith.mulf %306, %310 : vector<40x40xf32>
    %312 = arith.truncf %311 : vector<40x40xf32> to vector<40x40xbf16>
    %cst_131 = arith.constant dense<0.000000e+00> : vector<40x8xf32>
    %313 = tpu.matmul %312, %297, %cst_131 {dimension_numbers = #tpu.dot_dimension_numbers<[1], [0], [0], [1], [0, 0, 1, 1], [], []>} : vector<40x40xbf16>, vector<40x8xbf16>, vector<40x8xf32> -> vector<40x8xf32>
    %314 = tpu.concatenate %256, %275, %294, %313 in 1 : vector<40x8xf32>, vector<40x8xf32>, vector<40x8xf32>, vector<40x8xf32> -> vector<40x32xf32>
    %315 = arith.truncf %314 : vector<40x32xf32> to vector<40x32xbf16>
    %c1_132 = arith.constant 1 : index
    %c0_133 = arith.constant 0 : index
    %c0_134 = arith.constant 0 : index
    %316 = vector.load %arg11[%c1_132, %c0_133, %c0_134] : memref<2x32x32xbf16, #tpu.memory_space<vmem>>, vector<1x32x32xbf16>
    %317 = vector.shape_cast %316 : vector<1x32x32xbf16> to vector<32x32xbf16>
    %cst_135 = arith.constant dense<0.000000e+00> : vector<40x32xf32>
    %318 = tpu.matmul %315, %317, %cst_135 {dimension_numbers = #tpu.dot_dimension_numbers<[1], [0], [0], [1], [0, 0, 1, 1], [], []>} : vector<40x32xbf16>, vector<32x32xbf16>, vector<40x32xf32> -> vector<40x32xf32>
    %c1_136 = arith.constant 1 : index
    %c0_137 = arith.constant 0 : index
    %c0_138 = arith.constant 0 : index
    %319 = vector.load %arg12[%c1_136, %c0_137, %c0_138] : memref<2x1x32xf32, #tpu.memory_space<vmem>>, vector<1x1x32xf32>
    %320 = vector.shape_cast %319 : vector<1x1x32xf32> to vector<1x32xf32>
    %321 = vector.broadcast %320 : vector<1x32xf32> to vector<40x32xf32>
    %322 = arith.addf %318, %321 : vector<40x32xf32>
    %c1_139 = arith.constant 1 : index
    %c0_140 = arith.constant 0 : index
    %c0_141 = arith.constant 0 : index
    %323 = vector.load %arg13[%c1_139, %c0_140, %c0_141] : memref<2x1x32xf32, #tpu.memory_space<vmem>>, vector<1x1x32xf32>
    %324 = vector.shape_cast %323 : vector<1x1x32xf32> to vector<1x32xf32>
    %325 = vector.broadcast %324 : vector<1x32xf32> to vector<40x32xf32>
    %326 = arith.mulf %325, %322 : vector<40x32xf32>
    %327 = arith.addf %200, %326 : vector<40x32xf32>
    %c1_142 = arith.constant 1 : index
    %c0_143 = arith.constant 0 : index
    %c0_144 = arith.constant 0 : index
    %328 = vector.load %arg14[%c1_142, %c0_143, %c0_144] : memref<2x1x32xf32, #tpu.memory_space<vmem>>, vector<1x1x32xf32>
    %329 = vector.shape_cast %328 : vector<1x1x32xf32> to vector<1x32xf32>
    %c1_145 = arith.constant 1 : index
    %c0_146 = arith.constant 0 : index
    %c0_147 = arith.constant 0 : index
    %330 = vector.load %arg15[%c1_145, %c0_146, %c0_147] : memref<2x1x32xf32, #tpu.memory_space<vmem>>, vector<1x1x32xf32>
    %331 = vector.shape_cast %330 : vector<1x1x32xf32> to vector<1x32xf32>
    %cst_148 = arith.constant dense<0.000000e+00> : vector<40xf32>
    %332 = vector.multi_reduction <add>, %327, %cst_148 [1] : vector<40x32xf32> to vector<40xf32>
    %333 = vector.shape_cast %332 : vector<40xf32> to vector<40x1xf32>
    %cst_149 = arith.constant 3.200000e+01 : f32
    %334 = vector.broadcast %cst_149 : f32 to vector<40x1xf32>
    %335 = arith.divf %333, %334 : vector<40x1xf32>
    %336 = arith.mulf %327, %327 : vector<40x32xf32>
    %cst_150 = arith.constant dense<0.000000e+00> : vector<40xf32>
    %337 = vector.multi_reduction <add>, %336, %cst_150 [1] : vector<40x32xf32> to vector<40xf32>
    %338 = vector.shape_cast %337 : vector<40xf32> to vector<40x1xf32>
    %cst_151 = arith.constant 3.200000e+01 : f32
    %339 = vector.broadcast %cst_151 : f32 to vector<40x1xf32>
    %340 = arith.divf %338, %339 : vector<40x1xf32>
    %341 = arith.mulf %335, %335 : vector<40x1xf32>
    %342 = arith.subf %340, %341 : vector<40x1xf32>
    %cst_152 = arith.constant 0.000000e+00 : f32
    %343 = vector.broadcast %cst_152 : f32 to vector<40x1xf32>
    %344 = arith.maximumf %342, %343 : vector<40x1xf32>
    %345 = vector.broadcast %335 : vector<40x1xf32> to vector<40x32xf32>
    %346 = arith.subf %327, %345 : vector<40x32xf32>
    %cst_153 = arith.constant 9.99999997E-7 : f32
    %347 = vector.broadcast %cst_153 : f32 to vector<40x1xf32>
    %348 = arith.addf %344, %347 : vector<40x1xf32>
    %349 = math.rsqrt %348 : vector<40x1xf32>
    %350 = vector.broadcast %349 : vector<40x1xf32> to vector<40x32xf32>
    %351 = arith.mulf %346, %350 : vector<40x32xf32>
    %352 = vector.broadcast %329 : vector<1x32xf32> to vector<40x32xf32>
    %353 = arith.mulf %351, %352 : vector<40x32xf32>
    %354 = vector.broadcast %331 : vector<1x32xf32> to vector<40x32xf32>
    %355 = arith.addf %353, %354 : vector<40x32xf32>
    %356 = arith.truncf %355 : vector<40x32xf32> to vector<40x32xbf16>
    %c1_154 = arith.constant 1 : index
    %c0_155 = arith.constant 0 : index
    %c0_156 = arith.constant 0 : index
    %357 = vector.load %arg16[%c1_154, %c0_155, %c0_156] : memref<2x32x128xbf16, #tpu.memory_space<vmem>>, vector<1x32x128xbf16>
    %358 = vector.shape_cast %357 : vector<1x32x128xbf16> to vector<32x128xbf16>
    %cst_157 = arith.constant dense<0.000000e+00> : vector<40x128xf32>
    %359 = tpu.matmul %356, %358, %cst_157 {dimension_numbers = #tpu.dot_dimension_numbers<[1], [0], [0], [1], [0, 0, 1, 1], [], []>} : vector<40x32xbf16>, vector<32x128xbf16>, vector<40x128xf32> -> vector<40x128xf32>
    %c1_158 = arith.constant 1 : index
    %c0_159 = arith.constant 0 : index
    %c0_160 = arith.constant 0 : index
    %360 = vector.load %arg17[%c1_158, %c0_159, %c0_160] : memref<2x1x128xf32, #tpu.memory_space<vmem>>, vector<1x1x128xf32>
    %361 = vector.shape_cast %360 : vector<1x1x128xf32> to vector<1x128xf32>
    %362 = vector.broadcast %361 : vector<1x128xf32> to vector<40x128xf32>
    %363 = arith.addf %359, %362 : vector<40x128xf32>
    %cst_161 = arith.constant 5.000000e-01 : f32
    %364 = vector.broadcast %cst_161 : f32 to vector<40x128xf32>
    %365 = arith.mulf %364, %363 : vector<40x128xf32>
    %cst_162 = arith.constant 4.471500e-02 : f32
    %366 = vector.broadcast %cst_162 : f32 to vector<40x128xf32>
    %367 = arith.mulf %366, %363 : vector<40x128xf32>
    %368 = arith.mulf %367, %363 : vector<40x128xf32>
    %369 = arith.mulf %368, %363 : vector<40x128xf32>
    %370 = arith.addf %363, %369 : vector<40x128xf32>
    %cst_163 = arith.constant 0.797884583 : f32
    %371 = vector.broadcast %cst_163 : f32 to vector<40x128xf32>
    %372 = arith.mulf %371, %370 : vector<40x128xf32>
    %373 = math.tanh %372 : vector<40x128xf32>
    %cst_164 = arith.constant 1.000000e+00 : f32
    %374 = vector.broadcast %cst_164 : f32 to vector<40x128xf32>
    %375 = arith.addf %374, %373 : vector<40x128xf32>
    %376 = arith.mulf %365, %375 : vector<40x128xf32>
    %377 = arith.truncf %376 : vector<40x128xf32> to vector<40x128xbf16>
    %c1_165 = arith.constant 1 : index
    %c0_166 = arith.constant 0 : index
    %c0_167 = arith.constant 0 : index
    %378 = vector.load %arg18[%c1_165, %c0_166, %c0_167] : memref<2x128x32xbf16, #tpu.memory_space<vmem>>, vector<1x128x32xbf16>
    %379 = vector.shape_cast %378 : vector<1x128x32xbf16> to vector<128x32xbf16>
    %cst_168 = arith.constant dense<0.000000e+00> : vector<40x32xf32>
    %380 = tpu.matmul %377, %379, %cst_168 {dimension_numbers = #tpu.dot_dimension_numbers<[1], [0], [0], [1], [0, 0, 1, 1], [], []>} : vector<40x128xbf16>, vector<128x32xbf16>, vector<40x32xf32> -> vector<40x32xf32>
    %c1_169 = arith.constant 1 : index
    %c0_170 = arith.constant 0 : index
    %c0_171 = arith.constant 0 : index
    %381 = vector.load %arg19[%c1_169, %c0_170, %c0_171] : memref<2x1x32xf32, #tpu.memory_space<vmem>>, vector<1x1x32xf32>
    %382 = vector.shape_cast %381 : vector<1x1x32xf32> to vector<1x32xf32>
    %383 = vector.broadcast %382 : vector<1x32xf32> to vector<40x32xf32>
    %384 = arith.addf %380, %383 : vector<40x32xf32>
    %c1_172 = arith.constant 1 : index
    %c0_173 = arith.constant 0 : index
    %c0_174 = arith.constant 0 : index
    %385 = vector.load %arg20[%c1_172, %c0_173, %c0_174] : memref<2x1x32xf32, #tpu.memory_space<vmem>>, vector<1x1x32xf32>
    %386 = vector.shape_cast %385 : vector<1x1x32xf32> to vector<1x32xf32>
    %387 = vector.broadcast %386 : vector<1x32xf32> to vector<40x32xf32>
    %388 = arith.mulf %387, %384 : vector<40x32xf32>
    %389 = arith.addf %327, %388 : vector<40x32xf32>
    %390 = vector.extract_strided_slice %389 {offsets = [0, 0], sizes = [8, 32], strides = [1, 1]} : vector<40x32xf32> to vector<8x32xf32>
    %c0_175 = arith.constant 0 : index
    %c0_176 = arith.constant 0 : index
    %391 = vector.load %arg21[%c0_175, %c0_176] : memref<1x32xf32, #tpu.memory_space<vmem>>, vector<1x32xf32>
    %c0_177 = arith.constant 0 : index
    %c0_178 = arith.constant 0 : index
    %392 = vector.load %arg22[%c0_177, %c0_178] : memref<1x32xf32, #tpu.memory_space<vmem>>, vector<1x32xf32>
    %cst_179 = arith.constant dense<0.000000e+00> : vector<8xf32>
    %393 = vector.multi_reduction <add>, %390, %cst_179 [1] : vector<8x32xf32> to vector<8xf32>
    %394 = vector.shape_cast %393 : vector<8xf32> to vector<8x1xf32>
    %cst_180 = arith.constant 3.200000e+01 : f32
    %395 = vector.broadcast %cst_180 : f32 to vector<8x1xf32>
    %396 = arith.divf %394, %395 : vector<8x1xf32>
    %397 = arith.mulf %390, %390 : vector<8x32xf32>
    %cst_181 = arith.constant dense<0.000000e+00> : vector<8xf32>
    %398 = vector.multi_reduction <add>, %397, %cst_181 [1] : vector<8x32xf32> to vector<8xf32>
    %399 = vector.shape_cast %398 : vector<8xf32> to vector<8x1xf32>
    %cst_182 = arith.constant 3.200000e+01 : f32
    %400 = vector.broadcast %cst_182 : f32 to vector<8x1xf32>
    %401 = arith.divf %399, %400 : vector<8x1xf32>
    %402 = arith.mulf %396, %396 : vector<8x1xf32>
    %403 = arith.subf %401, %402 : vector<8x1xf32>
    %cst_183 = arith.constant 0.000000e+00 : f32
    %404 = vector.broadcast %cst_183 : f32 to vector<8x1xf32>
    %405 = arith.maximumf %403, %404 : vector<8x1xf32>
    %406 = vector.broadcast %396 : vector<8x1xf32> to vector<8x32xf32>
    %407 = arith.subf %390, %406 : vector<8x32xf32>
    %cst_184 = arith.constant 9.99999997E-7 : f32
    %408 = vector.broadcast %cst_184 : f32 to vector<8x1xf32>
    %409 = arith.addf %405, %408 : vector<8x1xf32>
    %410 = math.rsqrt %409 : vector<8x1xf32>
    %411 = vector.broadcast %410 : vector<8x1xf32> to vector<8x32xf32>
    %412 = arith.mulf %407, %411 : vector<8x32xf32>
    %413 = vector.broadcast %391 : vector<1x32xf32> to vector<8x32xf32>
    %414 = arith.mulf %412, %413 : vector<8x32xf32>
    %415 = vector.broadcast %392 : vector<1x32xf32> to vector<8x32xf32>
    %416 = arith.addf %414, %415 : vector<8x32xf32>
    %417 = vector.extract_strided_slice %416 {offsets = [0, 0], sizes = [1, 32], strides = [1, 1]} : vector<8x32xf32> to vector<1x32xf32>
    %418 = vector.extract_strided_slice %416 {offsets = [1, 0], sizes = [1, 32], strides = [1, 1]} : vector<8x32xf32> to vector<1x32xf32>
    %419 = vector.extract_strided_slice %416 {offsets = [2, 0], sizes = [1, 32], strides = [1, 1]} : vector<8x32xf32> to vector<1x32xf32>
    %420 = vector.extract_strided_slice %416 {offsets = [3, 0], sizes = [1, 32], strides = [1, 1]} : vector<8x32xf32> to vector<1x32xf32>
    %421 = vector.extract_strided_slice %416 {offsets = [4, 0], sizes = [1, 32], strides = [1, 1]} : vector<8x32xf32> to vector<1x32xf32>
    %422 = vector.extract_strided_slice %416 {offsets = [5, 0], sizes = [1, 32], strides = [1, 1]} : vector<8x32xf32> to vector<1x32xf32>
    %423 = vector.extract_strided_slice %416 {offsets = [6, 0], sizes = [1, 32], strides = [1, 1]} : vector<8x32xf32> to vector<1x32xf32>
    %424 = vector.extract_strided_slice %416 {offsets = [7, 0], sizes = [1, 32], strides = [1, 1]} : vector<8x32xf32> to vector<1x32xf32>
    %425 = tpu.concatenate %417, %418, %419, %420, %421, %422, %423, %424 in 1 : vector<1x32xf32>, vector<1x32xf32>, vector<1x32xf32>, vector<1x32xf32>, vector<1x32xf32>, vector<1x32xf32>, vector<1x32xf32>, vector<1x32xf32> -> vector<1x256xf32>
    %c0_185 = arith.constant 0 : index
    %c0_186 = arith.constant 0 : index
    %c0_187 = arith.constant 0 : index
    %426 = vector.load %arg23[%c0_185, %c0_186, %c0_187] : memref<1x1x256xf32, #tpu.memory_space<vmem>>, vector<1x1x256xf32>
    %427 = vector.shape_cast %426 : vector<1x1x256xf32> to vector<1x256xf32>
    %428 = vector.shape_cast %425 : vector<1x256xf32> to vector<1x1x256xf32>
    tpu.vector_store %arg23[%c0_185, %c0_186, %c0_187], %428 {strides = array<i32>} : memref<1x1x256xf32, #tpu.memory_space<vmem>>, vector<1x1x256xf32>,
    return
  }
  func.func @transform_0(%arg0: i32) -> (i32, i32, i32) {
    %c0_i32 = arith.constant 0 : i32
    %c0_i32_0 = arith.constant 0 : i32
    %c0_i32_1 = arith.constant 0 : i32
    return %arg0, %c0_i32, %c0_i32_0 : i32, i32, i32
  }
  func.func @transform_1(%arg0: i32) -> (i32, i32) {
    %c0_i32 = arith.constant 0 : i32
    %c0_i32_0 = arith.constant 0 : i32
    %c0_i32_1 = arith.constant 0 : i32
    return %c0_i32, %c0_i32_0 : i32, i32
  }
  func.func @transform_2(%arg0: i32) -> (i32, i32) {
    %c0_i32 = arith.constant 0 : i32
    %c0_i32_0 = arith.constant 0 : i32
    %c0_i32_1 = arith.constant 0 : i32
    return %c0_i32, %c0_i32_0 : i32, i32
  }
  func.func @transform_3(%arg0: i32) -> (i32, i32) {
    %c0_i32 = arith.constant 0 : i32
    %c0_i32_0 = arith.constant 0 : i32
    %c0_i32_1 = arith.constant 0 : i32
    return %c0_i32, %c0_i32_0 : i32, i32
  }
  func.func @transform_4(%arg0: i32) -> (i32, i32) {
    %c0_i32 = arith.constant 0 : i32
    %c0_i32_0 = arith.constant 0 : i32
    %c0_i32_1 = arith.constant 0 : i32
    return %c0_i32, %c0_i32_0 : i32, i32
  }
  func.func @transform_5(%arg0: i32) -> (i32, i32) {
    %c0_i32 = arith.constant 0 : i32
    %c0_i32_0 = arith.constant 0 : i32
    %c0_i32_1 = arith.constant 0 : i32
    return %c0_i32, %c0_i32_0 : i32, i32
  }
  func.func @transform_6(%arg0: i32) -> (i32, i32, i32) {
    %c0_i32 = arith.constant 0 : i32
    %c0_i32_0 = arith.constant 0 : i32
    %c0_i32_1 = arith.constant 0 : i32
    %c0_i32_2 = arith.constant 0 : i32
    return %c0_i32, %c0_i32_0, %c0_i32_1 : i32, i32, i32
  }
  func.func @transform_7(%arg0: i32) -> (i32, i32, i32) {
    %c0_i32 = arith.constant 0 : i32
    %c0_i32_0 = arith.constant 0 : i32
    %c0_i32_1 = arith.constant 0 : i32
    %c0_i32_2 = arith.constant 0 : i32
    return %c0_i32, %c0_i32_0, %c0_i32_1 : i32, i32, i32
  }
  func.func @transform_8(%arg0: i32) -> (i32, i32, i32) {
    %c0_i32 = arith.constant 0 : i32
    %c0_i32_0 = arith.constant 0 : i32
    %c0_i32_1 = arith.constant 0 : i32
    %c0_i32_2 = arith.constant 0 : i32
    return %c0_i32, %c0_i32_0, %c0_i32_1 : i32, i32, i32
  }
  func.func @transform_9(%arg0: i32) -> (i32, i32, i32) {
    %c0_i32 = arith.constant 0 : i32
    %c0_i32_0 = arith.constant 0 : i32
    %c0_i32_1 = arith.constant 0 : i32
    %c0_i32_2 = arith.constant 0 : i32
    return %c0_i32, %c0_i32_0, %c0_i32_1 : i32, i32, i32
  }
  func.func @transform_10(%arg0: i32) -> (i32, i32, i32) {
    %c0_i32 = arith.constant 0 : i32
    %c0_i32_0 = arith.constant 0 : i32
    %c0_i32_1 = arith.constant 0 : i32
    %c0_i32_2 = arith.constant 0 : i32
    return %c0_i32, %c0_i32_0, %c0_i32_1 : i32, i32, i32
  }
  func.func @transform_11(%arg0: i32) -> (i32, i32, i32) {
    %c0_i32 = arith.constant 0 : i32
    %c0_i32_0 = arith.constant 0 : i32
    %c0_i32_1 = arith.constant 0 : i32
    %c0_i32_2 = arith.constant 0 : i32
    return %c0_i32, %c0_i32_0, %c0_i32_1 : i32, i32, i32
  }
  func.func @transform_12(%arg0: i32) -> (i32, i32, i32) {
    %c0_i32 = arith.constant 0 : i32
    %c0_i32_0 = arith.constant 0 : i32
    %c0_i32_1 = arith.constant 0 : i32
    %c0_i32_2 = arith.constant 0 : i32
    return %c0_i32, %c0_i32_0, %c0_i32_1 : i32, i32, i32
  }
  func.func @transform_13(%arg0: i32) -> (i32, i32, i32) {
    %c0_i32 = arith.constant 0 : i32
    %c0_i32_0 = arith.constant 0 : i32
    %c0_i32_1 = arith.constant 0 : i32
    %c0_i32_2 = arith.constant 0 : i32
    return %c0_i32, %c0_i32_0, %c0_i32_1 : i32, i32, i32
  }
  func.func @transform_14(%arg0: i32) -> (i32, i32, i32) {
    %c0_i32 = arith.constant 0 : i32
    %c0_i32_0 = arith.constant 0 : i32
    %c0_i32_1 = arith.constant 0 : i32
    %c0_i32_2 = arith.constant 0 : i32
    return %c0_i32, %c0_i32_0, %c0_i32_1 : i32, i32, i32
  }
  func.func @transform_15(%arg0: i32) -> (i32, i32, i32) {
    %c0_i32 = arith.constant 0 : i32
    %c0_i32_0 = arith.constant 0 : i32
    %c0_i32_1 = arith.constant 0 : i32
    %c0_i32_2 = arith.constant 0 : i32
    return %c0_i32, %c0_i32_0, %c0_i32_1 : i32, i32, i32
  }
  func.func @transform_16(%arg0: i32) -> (i32, i32, i32) {
    %c0_i32 = arith.constant 0 : i32
    %c0_i32_0 = arith.constant 0 : i32
    %c0_i32_1 = arith.constant 0 : i32
    %c0_i32_2 = arith.constant 0 : i32
    return %c0_i32, %c0_i32_0, %c0_i32_1 : i32, i32, i32
  }
  func.func @transform_17(%arg0: i32) -> (i32, i32, i32) {
    %c0_i32 = arith.constant 0 : i32
    %c0_i32_0 = arith.constant 0 : i32
    %c0_i32_1 = arith.constant 0 : i32
    %c0_i32_2 = arith.constant 0 : i32
    return %c0_i32, %c0_i32_0, %c0_i32_1 : i32, i32, i32
  }
  func.func @transform_18(%arg0: i32) -> (i32, i32, i32) {
    %c0_i32 = arith.constant 0 : i32
    %c0_i32_0 = arith.constant 0 : i32
    %c0_i32_1 = arith.constant 0 : i32
    %c0_i32_2 = arith.constant 0 : i32
    return %c0_i32, %c0_i32_0, %c0_i32_1 : i32, i32, i32
  }
  func.func @transform_19(%arg0: i32) -> (i32, i32, i32) {
    %c0_i32 = arith.constant 0 : i32
    %c0_i32_0 = arith.constant 0 : i32
    %c0_i32_1 = arith.constant 0 : i32
    %c0_i32_2 = arith.constant 0 : i32
    return %c0_i32, %c0_i32_0, %c0_i32_1 : i32, i32, i32
  }
  func.func @transform_20(%arg0: i32) -> (i32, i32) {
    %c0_i32 = arith.constant 0 : i32
    %c0_i32_0 = arith.constant 0 : i32
    %c0_i32_1 = arith.constant 0 : i32
    return %c0_i32, %c0_i32_0 : i32, i32
  }
  func.func @transform_21(%arg0: i32) -> (i32, i32) {
    %c0_i32 = arith.constant 0 : i32
    %c0_i32_0 = arith.constant 0 : i32
    %c0_i32_1 = arith.constant 0 : i32
    return %c0_i32, %c0_i32_0 : i32, i32
  }
  func.func @transform_22(%arg0: i32) -> (i32, i32, i32) {
    %c0_i32 = arith.constant 0 : i32
    %c0_i32_0 = arith.constant 0 : i32
    %c0_i32_1 = arith.constant 0 : i32
    return %arg0, %c0_i32, %c0_i32_0 : i32, i32, i32
  }
}

</mosaic_0001>

<bundles_post_ra>
// kernel: local_feature_extractor_fm.1
= control target key start
LH: loop header
LB: loop body
LE: loop exit
PB: predicated region body
PF: predicated region fallthrough
CT: control target
= control target key end

     0   :  { %s7023_s0 = inlined_call_operand.vmem [shape: bf16[2,32,12], index: 0, kind: input, shape index: {}]   ;;  %s7024_s1 = inlined_call_operand.vmem [shape: bf16[12,32], index: 1, kind: input, shape index: {}]   ;;  %s7025_s2 = inlined_call_operand.vmem [shape: f32[1,32], index: 2, kind: input, shape index: {}]   ;;  %s7026_s3 = inlined_call_operand.vmem [shape: f32[8,32], index: 3, kind: input, shape index: {}]   ;;  %s7027_s4 = inlined_call_operand.vmem [shape: f32[32,32], index: 4, kind: input, shape index: {}]   ;;  %s7028_s5 = inlined_call_operand.vmem [shape: f32[40,40], index: 5, kind: input, shape index: {}]   ;;  %s7029_s6 = inlined_call_operand.vmem [shape: f32[2,1,32], index: 6, kind: input, shape index: {}]   ;;  %s7030_s7 = inlined_call_operand.vmem [shape: f32[2,1,32], index: 7, kind: input, shape index: {}]   ;;  %s7031_s8 = inlined_call_operand.vmem [shape: bf16[2,32,96], index: 8, kind: input, shape index: {}]   ;;  %s7032_s9 = inlined_call_operand.vmem [shape: f32[2,1,96], index: 9, kind: input, shape index: {}]   ;;  %s7033_s10 = inlined_call_operand.vmem [shape: bf16[2,32,32], index: 10, kind: input, shape index: {}]   ;;  %s7034_s11 = inlined_call_operand.vmem [shape: f32[2,1,32], index: 11, kind: input, shape index: {}]   ;;  %s7035_s12 = inlined_call_operand.vmem [shape: f32[2,1,32], index: 12, kind: input, shape index: {}]   ;;  %s7036_s13 = inlined_call_operand.vmem [shape: f32[2,1,32], index: 13, kind: input, shape index: {}]   ;;  %s7037_s14 = inlined_call_operand.vmem [shape: f32[2,1,32], index: 14, kind: input, shape index: {}]   ;;  %s7038_s15 = inlined_call_operand.vmem [shape: bf16[2,32,128], index: 15, kind: input, shape index: {}]   ;;  %s7039_s16 = inlined_call_operand.vmem [shape: f32[2,1,128], index: 16, kind: input, shape index: {}]   ;;  %s7040_s17 = inlined_call_operand.vmem [shape: bf16[2,128,32], index: 17, kind: input, shape index: {}]   ;;  %s7041_s18 = inlined_call_operand.vmem [shape: f32[2,1,32], index: 18, kind: input, shape index: {}]   ;;  %s7042_s19 = inlined_call_operand.vmem [shape: f32[2,1,32], index: 19, kind: input, shape index: {}]   ;;  %s7043_s20 = inlined_call_operand.vmem [shape: f32[1,32], index: 20, kind: input, shape index: {}]   ;;  %s7044_s21 = inlined_call_operand.vmem [shape: f32[1,32], index: 21, kind: input, shape index: {}]   ;;  %s7045_s22 = inlined_call_operand.vmem [shape: f32[2,1,256], index: 22, kind: output, shape index: {}]  }
   0x1   :  { %7078 = sst [smem:[#allocation2_spill]] %s7023_s0 }
   0x2   :  { %7079 = sst [smem:[#allocation3_spill]] %s7024_s1 }
   0x3   :  { %7080 = sst [smem:[#allocation4_spill]] %s7025_s2 }
   0x4   :  { %7081 = sst [smem:[#allocation5_spill]] %s7026_s3  ;;  %s5562_s3 = smov 0  }
   0x5   :  { %7082 = sst [smem:[#allocation6_spill]] %s7027_s4 }
   0x6   :  { %7083 = sst [smem:[#allocation7_spill]] %s7028_s5 }
   0x7   :  { %7084 = sst [smem:[#allocation8_spill]] %s7029_s6 }
   0x8 LB: > { %s4307_s28 = sadd.s32 4294967295, %s5427_s3   ;;  %p4311_p0 = scmp.ge.s32.totalorder %s5427_s3, 1  ;;  %s5427_s3 = sphi %s5562_s3, %s32_s3  }
   0x9   : > { %p612_p1 = scmp.lt.s32.totalorder %s5427_s3, 3 }
   0xb   : > { %p613_p2 = pnand %p4311_p0, %p612_p1 }
   0xc   : > { %s7085_s4 = sld [smem:[#allocation3_spill]] (!%p613_p2)  ;;  %vm718_vm0 = vcmask (!%p613_p2), 1045504   ;;  %p673_p3 = scmp.lt.s32.totalorder (!%p613_p2), %s4307_s28, 1  ;;  %vm787_vm1 = vcmask (!%p613_p2), 261120   ;;  %vm711_vm2 = vcmask (!%p613_p2), 97280   ;;  %v5165_v37 = vld [vmem:[%s7031_s8] sm:$0xff] (!%p613_p2)  }
   0xd   : > { %616 = sbr.rel (%p613_p2) target bundleno = 5365 (0x14f5), region = 108  ;;  %s7086_s1 = sld [smem:[#allocation5_spill]] (!%p613_p2)  ;;  %v5429_v38 = vmov (!%p613_p2), 0.0   ;;  %v5166_v39 = vld [vmem:[%s7031_s8 + $0x8] sm:$0xff] (!%p613_p2)   ;;  %vm5430_vm3 = vmmov (!%p613_p2), 0   ;;  %vm994_vm4 = vcmask (!%p613_p2), 64512  }
   0xe   : > { %s7087_s25 = sld [smem:[#allocation2_spill]] (!%p613_p2)  ;;  %s7088_s29 = sld [smem:[#allocation4_spill]] (!%p613_p2)  ;;  %4669 = vmatprep.subr.bf16.mxu1 (!%p613_p2), %v5429_v38  ;;  %4675 = vmatprep.mubr.msk.bf16.mxu1 (!%p613_p2), %vm5430_vm3, %v5429_v38  ;;  %vm1155_vm5 = vcmask (!%p613_p2), 1043456   ;;  %vm1079_vm6 = vcmask (!%p613_p2), 326656   ;;  %vm1970_vm7 = vcmask (!%p613_p2), 130048   ;;  %vm1976_vm8 = vcmask (!%p613_p2), 195584  }
   0xf   : > { %s7089_s0 = sld [smem:[#allocation6_spill]] (!%p613_p2)  ;;  %s7090_s24 = sld [smem:[#allocation8_spill]] (!%p613_p2)  ;;  %vm4224_vm9 = vcmask (!%p613_p2), 523264   ;;  %vm4226_vm10 = vcmask (!%p613_p2), 785408  }
  0x10   : > { %s7076_s2 = smov (!%p613_p2), 96   ;;  %s7074_s27 = smov (!%p613_p2), 88  }
  0x11   : > { %s7054_s30 = smov (!%p613_p2), 112   ;;  %s7052_s23 = smov (!%p613_p2), 104  }
  0x12   : > { %v5162_v0 = vld [vmem:[%s7085_s4] sm:$0x3f] (!%p613_p2)   ;;  %s7072_s4 = smov (!%p613_p2), 80   ;;  %s7050_s6 = smov (!%p613_p2), 64  }
  0x13   : > { %v5576_v1 = vld [vmem:[%s7086_s1] sm:$0xff] (!%p613_p2)  ;;  %5075 = vmatprep.subr.msk.bf16.mxu0 (!%p613_p2), %vm718_vm0, %v5162_v0  ;;  %v720_v2 = vsel (!%p613_p2), %vm718_vm0, %v5162_v0, 0 }
  0x14   : > { %v788_v3 = vsel %vm787_vm1, %v5576_v1, 0.0  ;;  %v809_v4 = vmul.f32 %v5576_v1, %v5576_v1  ;;  %4630 = vmatpush3.bf16.msra.mxu0 %v720_v2  ;;  %s7107_s28 = smov (!%p673_p3, %s4307_s28), 1  ;;  %v4315_v8 = vld [vmem:[%s7088_s29] ss:$0 sm:$0xff]  ;;  %s7064_s29 = smov 120  }
  0x15   : > { %789 = vadd.xlane.f32.xlu0 %v788_v3  ;;  %s4477_s5 = sshll.u32 %s7107_s28, 4  ;;  %v772_v11 = vld [vmem:[%s7089_s0] sm:$0xff]  ;;  %v773_v15 = vld [vmem:[%s7089_s0 + $0x8] sm:$0xff]  ;;  %v774_v19 = vld [vmem:[%s7089_s0 + $0x10] sm:$0xff]  ;;  %4635 = vmatprep.subr.bf16.mxu0 %v5429_v38 }
  0x16   : > { %v814_v5 = vsel %vm787_vm1, %v809_v4, 0.0  ;;  %s677_s26 = scalar_lea.vmem %s7087_s25, %s4477_s5  ;;  %v775_v26 = vld [vmem:[%s7089_s0 + $0x18] sm:$0xff]  ;;  %s7056_s5 = smov 72  }
  0x17   : > { %815 = vadd.xlane.f32.xlu1 %v814_v5  ;;  %v5163_v6 = vld [vmem:[%s677_s26] sm:$0xff]   ;;  %v5164_v7 = vld [vmem:[%s677_s26 + $0x8] sm:$0xff]   ;;  %s7062_s25 = smov 56   ;;  %s7058_s26 = smov 40  }
  0x18   : > { %4631 = vmatprep.mubr.msk.bf16.mxu0 %vm711_vm2, %v5163_v6 }
  0x19   : > { %4632 = vmatmul.mubr.msk.bf16.vlgmr.msra.gmra.mrb[0].mxu0 %vm711_vm2, %v5164_v7 }
  0x1a   : > { %4636 = vmatpush3.bf16.msra.mxu0 %v5165_v37  ;;  %4639 = vmatprep.mubr.msk.bf16.mxu0 %vm5430_vm3, %v5429_v38 }
  0x1b   : > { %4637 = vmatprep.subr.bf16.mxu0 %v5429_v38 }
  0x1e   : > { %4638 = vmatpush3.bf16.msra.mxu0 %v5166_v39 }
  0x1f   : > { %4651 = vmatprep.subr.bf16.mxu0 %v5429_v38 }
  0xa2   : > { %v790_v40 = vpop.xlane.xlu0 %789 }
  0xa3   : > { %v804_v41 = vmul.f32 0.03125, %v790_v40 }
  0xa4   : > { %v816_v42 = vpop.xlane.xlu1 %815 }
  0xa5   : > { %v834_v43 = vmul.f32 %v804_v41, %v804_v41  ;;  %v829_v44 = vmul.f32 0.03125, %v816_v42 }
  0xa7   : > { %v839_v45 = vsub.f32 %v829_v44, %v834_v43 }
  0xa9   : > { %v844_v46 = vmax.f32 %v839_v45, 0.0 }
  0xab   : > { %v854_v48 = vadd.f32 1e-06, %v844_v46 }
  0xad   : > { %5193 = vrsqrt.f32 %v854_v48 }
  0xec   : > { %v4633_v9 = vpop.f32.mrb[0].mxu0 }
  0xed   : > { %v756_v10 = vpop.f32.mrb[1].mxu0  ;;  %v765_v16 = vadd.f32 %v4633_v9, %v4315_v8 }
  0xee   : > { %v757_v12 = vadd.f32 %v4315_v8, %v756_v10  ;;  %v4634_v13 = vpop.f32.mrb[2].mxu0  ;;  %v5194_v10 = vpop.eup %5193 }
  0xef   : > { %v759_v14 = vpop.f32.mrb[3].mxu0  ;;  %v5609_v23 = vadd.f32 %v774_v19, %v765_v16  ;;  %v768_v24 = vadd.f32 %v4634_v13, %v4315_v8  ;;  %v4321_v19 = vld [vmem:[%s7090_s24] ss:$0 sm:$0xff] }
  0xf0   : > { %v5598_v17 = vadd.f32 %v772_v11, %v757_v12  ;;  %v760_v18 = vadd.f32 %v4315_v8, %v759_v14  ;;  %v849_v8 = vsub.f32 %v5576_v1, %v804_v41 }
  0xf1   : > { %v5619_v29 = vadd.f32 %v775_v26, %v768_v24  ;;  %v797_v30 = vsel %vm787_vm1, %v5609_v23, 0.0  ;;  %v812_v31 = vmul.f32 %v5609_v23, %v5609_v23 }
  0xf2   : > { %v5603_v20 = vadd.f32 %v773_v15, %v760_v18  ;;  %v791_v21 = vsel %vm787_vm1, %v5598_v17, 0.0  ;;  %v810_v22 = vmul.f32 %v5598_v17, %v5598_v17  ;;  %v864_v16 = vmul.f32 %v5194_v10, %v849_v8 }
  0xf3   : > { %792 = vadd.xlane.f32.xlu0 %v791_v21  ;;  %v823_v33 = vsel %vm787_vm1, %v812_v31, 0.0  ;;  %v813_v34 = vmul.f32 %v5619_v29, %v5619_v29  ;;  %v800_v35 = vsel %vm787_vm1, %v5619_v29, 0.0 }
  0xf4   : > { %v817_v25 = vsel %vm787_vm1, %v810_v22, 0.0  ;;  %v794_v27 = vsel %vm787_vm1, %v5603_v20, 0.0  ;;  %v811_v28 = vmul.f32 %v5603_v20, %v5603_v20  ;;  %v875_v26 = vmul.f32 %v4321_v19, %v864_v16 }
  0xf5   : > { %818 = vadd.xlane.f32.xlu1 %v817_v25  ;;  %v826_v36 = vsel %vm787_vm1, %v813_v34, 0.0 }
  0xf6   : > { %v820_v32 = vsel %vm787_vm1, %v811_v28, 0.0 }
  0xf7   : > { %795 = vadd.xlane.f32.xlu0 %v794_v27  ;;  %v4322_v27 = vld [vmem:[%s7030_s7] ss:$0 sm:$0xff] }
  0xf8   : > { %v886_v31 = vadd.f32 %v4322_v27, %v875_v26 }
  0xf9   : > { %798 = vadd.xlane.f32.xlu1 %v797_v30 }
  0xfb   : > { %821 = vadd.xlane.f32.xlu0 %v820_v32 }
  0xfd   : > { %824 = vadd.xlane.f32.xlu1 %v823_v33 }
  0xff   : > { %801 = vadd.xlane.f32.xlu0 %v800_v35 }
 0x101   : > { %827 = vadd.xlane.f32.xlu1 %v826_v36 }
 0x180   : > { %v793_v47 = vpop.xlane.xlu0 %792 }
 0x181   : > { %v805_v49 = vmul.f32 0.03125, %v793_v47 }
 0x182   : > { %v819_v50 = vpop.xlane.xlu1 %818 }
 0x183   : > { %v835_v51 = vmul.f32 %v805_v49, %v805_v49  ;;  %v830_v52 = vmul.f32 0.03125, %v819_v50  ;;  %v850_v21 = vsub.f32 %v5598_v17, %v805_v49 }
 0x184   : > { %v796_v53 = vpop.xlane.xlu0 %795 }
 0x185   : > { %v840_v54 = vsub.f32 %v830_v52, %v835_v51  ;;  %v806_v55 = vmul.f32 0.03125, %v796_v53  ;;  %v4323_v51 = vld [vmem:[%s7032_s9] ss:$0 sm:$0xff] }
 0x186   : > { %v799_v56 = vpop.xlane.xlu1 %798 }
 0x187   : > { %v845_v57 = vmax.f32 %v840_v54, 0.0  ;;  %v807_v58 = vmul.f32 0.03125, %v799_v56  ;;  %v836_v61 = vmul.f32 %v806_v55, %v806_v55  ;;  %v851_v30 = vsub.f32 %v5603_v20, %v806_v55 }
 0x188   : > { %v822_v59 = vpop.xlane.xlu0 %821 }
 0x189   : > { %v855_v60 = vadd.f32 1e-06, %v845_v57  ;;  %v831_v62 = vmul.f32 0.03125, %v822_v59  ;;  %v837_v0 = vmul.f32 %v807_v58, %v807_v58  ;;  %v852_v34 = vsub.f32 %v5609_v23, %v807_v58 }
 0x18a   : > { %v825_v63 = vpop.xlane.xlu1 %824 }
 0x18b   : > { %5195 = vrsqrt.f32 %v855_v60  ;;  %v841_v2 = vsub.f32 %v831_v62, %v836_v61  ;;  %v832_v3 = vmul.f32 0.03125, %v825_v63 }
 0x18c   : > { %v802_v4 = vpop.xlane.xlu0 %801 }
 0x18d   : > { %v846_v5 = vmax.f32 %v841_v2, 0.0  ;;  %v842_v6 = vsub.f32 %v832_v3, %v837_v0  ;;  %v808_v7 = vmul.f32 0.03125, %v802_v4 }
 0x18e   : > { %v828_v9 = vpop.xlane.xlu1 %827 }
 0x18f   : > { %v856_v11 = vadd.f32 1e-06, %v846_v5  ;;  %v847_v12 = vmax.f32 %v842_v6, 0.0  ;;  %v838_v13 = vmul.f32 %v808_v7, %v808_v7  ;;  %v833_v14 = vmul.f32 0.03125, %v828_v9 }
 0x190   : > { %v853_v42 = vsub.f32 %v5619_v29, %v808_v7 }
 0x191   : > { %5197 = vrsqrt.f32 %v856_v11  ;;  %v857_v15 = vadd.f32 1e-06, %v847_v12  ;;  %v843_v18 = vsub.f32 %v833_v14, %v838_v13 }
 0x193   : > { %5199 = vrsqrt.f32 %v857_v15  ;;  %v848_v22 = vmax.f32 %v843_v18, 0.0 }
 0x195   : > { %v5196_v24 = vpop.eup %5195  ;;  %v858_v25 = vadd.f32 1e-06, %v848_v22 }
 0x196   : > { %v865_v1 = vmul.f32 %v5196_v24, %v850_v21 }
 0x197   : > { %5201 = vrsqrt.f32 %v858_v25 }
 0x198   : > { %v876_v28 = vmul.f32 %v4321_v19, %v865_v1 }
 0x19a   : > { %v887_v32 = vadd.f32 %v4322_v27, %v876_v28 }
 0x19b   : > { %v5198_v33 = vpop.eup %5197 }
 0x19c   : > { %v891_v35 = vpack.c.bf16 %v887_v32, %v886_v31  ;;  %v866_v36 = vmul.f32 %v5198_v33, %v851_v30 }
 0x19d   : > { %v5200_v37 = vpop.eup %5199 }
 0x19e   : > { %4640 = vmatmul.mubr.msk.bf16.vlgmr.msra.gmra.mrb[4].mxu0 %vm787_vm1, %v891_v35  ;;  %v867_v39 = vmul.f32 %v5200_v37, %v852_v34  ;;  %v877_v40 = vmul.f32 %v4321_v19, %v866_v36 }
 0x19f   : > { %4643 = vmatprep.mubr.msk.bf16.mxu0 %vm5430_vm3, %v5429_v38 }
 0x1a0   : > { %v878_v41 = vmul.f32 %v4321_v19, %v867_v39  ;;  %v888_v44 = vadd.f32 %v4322_v27, %v877_v40 }
 0x1a1   : > { %v5202_v43 = vpop.eup %5201 }
 0x1a2   : > { %v889_v45 = vadd.f32 %v4322_v27, %v878_v41  ;;  %v868_v46 = vmul.f32 %v5202_v43, %v853_v42 }
 0x1a4   : > { %v892_v47 = vpack.c.bf16 %v889_v45, %v888_v44  ;;  %v879_v48 = vmul.f32 %v4321_v19, %v868_v46 }
 0x1a6   : > { %4644 = vmatmul.mubr.msk.bf16.gmra.mrb[8].mxu0 %vm787_vm1, %v892_v47  ;;  %v890_v49 = vadd.f32 %v4322_v27, %v879_v48 }
 0x1a7   : > { %4647 = vmatprep.mubr.msk.bf16.mxu0 %vm5430_vm3, %v5429_v38 }
 0x1a8   : > { %v893_v50 = vpack.c.bf16 %v890_v49, %v890_v49 }
 0x1ae   : > { %4648 = vmatmul.mubr.msk.bf16.gmra.mrb[12].mxu0 %vm787_vm1, %v893_v50 }
 0x1af   : > { %4657 = vmatprep.mubr.msk.bf16.mxu0 %vm5430_vm3, %v5429_v38 }
 0x271   : > { %v960_v52 = vpop.f32.mrb[4].mxu0 }
 0x272   : > { %v4641_v53 = vpop.f32.mrb[5].mxu0  ;;  %v961_v55 = vadd.f32 %v4323_v51, %v960_v52 }
 0x273   : > { %v963_v54 = vpop.f32.mrb[6].mxu0 }
 0x274   : > { %v964_v56 = vadd.f32 %v4323_v51, %v963_v54  ;;  %v4642_v57 = vpop.f32.mrb[7].mxu0 }
 0x276   : > { %v5669_v58 = vpack.c.bf16 %v964_v56, %v961_v55 }
 0x278   : > { %988 = vrot.lane.b32.xlu0 %v5669_v58, %s7076_s2 }
 0x279   : > { %v968_v59 = vpop.f32.mrb[8].mxu0 }
 0x27a   : > { %v4645_v60 = vpop.f32.mrb[9].mxu0  ;;  %v969_v62 = vadd.f32 %v4323_v51, %v968_v59 }
 0x27b   : > { %v971_v61 = vpop.f32.mrb[10].mxu0 }
 0x27c   : > { %v972_v63 = vadd.f32 %v4323_v51, %v971_v61  ;;  %v4646_v0 = vpop.f32.mrb[11].mxu0 }
 0x27e   : > { %v5673_v2 = vpack.c.bf16 %v972_v63, %v969_v62 }
 0x280   : > { %1223 = vrot.lane.b32.xlu0 %v5673_v2, %s7074_s27  ;;  %990 = vrot.lane.b32.xlu1 %v5673_v2, %s7076_s2 }
 0x281   : > { %v976_v3 = vpop.f32.mrb[12].mxu0 }
 0x282   : > { %v977_v4 = vadd.f32 %v4323_v51, %v976_v3  ;;  %v4649_v5 = vpop.f32.mrb[13].mxu0 }
 0x283   : > { %v979_v6 = vpop.f32.mrb[14].mxu0 }
 0x284   : > { %v5679_v7 = vpack.c.bf16 %v977_v4, %v977_v4  ;;  %1215 = vrot.lane.b32.xlu0 %v5669_v58, %s7064_s29  ;;  %v4650_v8 = vpop.f32.mrb[15].mxu0 }
 0x286   : > { %992 = vrot.lane.b32.xlu1 %v5679_v7, %s7076_s2 }
 0x288   : > { %1217 = vrot.lane.b32.xlu0 %v5673_v2, %s7064_s29 }
 0x28a   : > { %1221 = vrot.lane.b32.xlu1 %v5669_v58, %s7074_s27 }
 0x28c   : > { %1219 = vrot.lane.b32.xlu0 %v5679_v7, %s7064_s29  ;;  %s7068_s29 = smov 16  }
 0x28e   : > { %1225 = vrot.lane.b32.xlu1 %v5679_v7, %s7074_s27  ;;  %s7094_s27 = smov 120  }
 0x290   : > { %1445 = vrot.lane.b32.xlu0 %v5669_v58, %s7054_s30 }
 0x292   : > { %1451 = vrot.lane.b32.xlu1 %v5669_v58, %s7072_s4 }
 0x294   : > { %1447 = vrot.lane.b32.xlu0 %v5673_v2, %s7054_s30 }
 0x296   : > { %1453 = vrot.lane.b32.xlu1 %v5673_v2, %s7072_s4 }
 0x298   : > { %1449 = vrot.lane.b32.xlu0 %v5679_v7, %s7054_s30  ;;  %s7070_s30 = smov 8  }
 0x29a   : > { %1455 = vrot.lane.b32.xlu1 %v5679_v7, %s7072_s4  ;;  %s7098_s4 = smov 64  }
 0x29c   : > { %1675 = vrot.lane.b32.xlu0 %v5669_v58, %s7052_s23 }
 0x29e   : > { %1681 = vrot.lane.b32.xlu1 %v5669_v58, %s7056_s5 }
 0x2a0   : > { %1679 = vrot.lane.b32.xlu0 %v5679_v7, %s7052_s23 }
 0x2a2   : > { %1683 = vrot.lane.b32.xlu1 %v5673_v2, %s7056_s5 }
 0x2a4   : > { %1138 = vrot.lane.b32.xlu0 %v5669_v58, %s7050_s6 }
 0x2a6   : > { %1685 = vrot.lane.b32.xlu1 %v5679_v7, %s7056_s5  ;;  %s7095_s5 = smov 72  }
 0x2a8   : > { %1142 = vrot.lane.b32.xlu0 %v5679_v7, %s7050_s6 }
 0x2aa   : > { %1677 = vrot.lane.b32.xlu1 %v5673_v2, %s7052_s23  ;;  %s7091_s23 = sld [smem:[#allocation7_spill]] }
 0x2ac   : > { %1371 = vrot.lane.b32.xlu0 %v5673_v2, %s7062_s25 }
 0x2ae   : > { %1140 = vrot.lane.b32.xlu1 %v5673_v2, %s7050_s6  ;;  %s7060_s6 = smov 48  }
 0x2b0   : > { %1373 = vrot.lane.b32.xlu0 %v5679_v7, %s7062_s25  ;;  %v5797_v51 = vld [vmem:[%s7091_s23] sm:$0xff]  ;;  %v5802_v55 = vld [vmem:[%s7091_s23 + $0x8] sm:$0xff]  ;;  %v5817_v0 = vld [vmem:[%s7091_s23 + $0x10] sm:$0xff] }
 0x2b1   : > { %v5822_v6 = vld [vmem:[%s7091_s23 + $0x18] sm:$0xff] }
 0x2ea   : > { %v989_v9 = vpop.permute.xlu0 %988 }
 0x2eb   : > { %v1005_v10 = vsel %vm994_vm4, %v989_v9, 0 }
 0x2ec   : > { %4652 = vmatpush3.bf16.xpose.msra.mxu0 %v1005_v10 }
 0x2ed   : > { %4653 = vmatprep.subr.bf16.mxu0 %v5429_v38 }
 0x2f2   : > { %v991_v11 = vpop.permute.xlu1 %990  ;;  %v1224_v12 = vpop.permute.xlu0 %1223 }
 0x2f3   : > { %v1008_v13 = vsel %vm994_vm4, %v991_v11, 0  ;;  %v1240_v30 = vsel %vm994_vm4, %v1224_v12, 0 }
 0x2f4   : > { %4654 = vmatpush3.bf16.xpose.msra.mxu0 %v1008_v13 }
 0x2f5   : > { %4655 = vmatprep.subr.bf16.mxu0 %v5429_v38 }
 0x2f6   : > { %v1216_v14 = vpop.permute.xlu0 %1215 }
 0x2f8   : > { %v993_v15 = vpop.permute.xlu1 %992 }
 0x2f9   : > { %v1011_v18 = vsel %vm994_vm4, %v993_v15, 0 }
 0x2fa   : > { %v1218_v16 = vpop.permute.xlu0 %1217 }
 0x2fc   : > { %v1222_v19 = vpop.permute.xlu1 %1221  ;;  %4656 = vmatpush3.bf16.xpose.msra.mxu0 %v1011_v18 }
 0x2fd   : > { %4687 = vmatprep.subr.bf16.mxu0 %v5429_v38  ;;  %v1237_v1 = vsel %vm994_vm4, %v1222_v19, 0 }
 0x2fe   : > { %v1220_v21 = vpop.permute.xlu0 %1219 }
 0x300   : > { %v1226_v22 = vpop.permute.xlu1 %1225 }
 0x301   : > { %v1243_v35 = vsel %vm994_vm4, %v1226_v22, 0 }
 0x302   : > { %v1446_v24 = vpop.permute.xlu0 %1445 }
 0x303   : > { %4658 = vmatmul.mubr.msk.bf16.vlgmr.msra.gmra.mrb[16].mxu0 %vm994_vm4, %v5669_v58 }
 0x304   : > { %v1452_v25 = vpop.permute.xlu1 %1451  ;;  %4688 = vmatpush3.bf16.xpose.msra.mxu0 %v1237_v1  ;;  %4661 = vmatprep.mubr.msk.bf16.mxu0 %vm5430_vm3, %v5429_v38 }
 0x305   : > { %4689 = vmatprep.subr.bf16.mxu0 %v5429_v38  ;;  %v1467_v40 = vsel %vm994_vm4, %v1452_v25, 0 }
 0x306   : > { %v1448_v26 = vpop.permute.xlu0 %1447 }
 0x308   : > { %v1454_v27 = vpop.permute.xlu1 %1453 }
 0x309   : > { %v1470_v44 = vsel %vm994_vm4, %v1454_v27, 0 }
 0x30a   : > { %v1450_v28 = vpop.permute.xlu0 %1449 }
 0x30b   : > { %4662 = vmatmul.mubr.msk.bf16.gmra.mrb[20].mxu0 %vm994_vm4, %v5673_v2 }
 0x30c   : > { %v1456_v31 = vpop.permute.xlu1 %1455  ;;  %4690 = vmatpush3.bf16.xpose.msra.mxu0 %v1240_v30  ;;  %4665 = vmatprep.mubr.msk.bf16.mxu0 %vm5430_vm3, %v5429_v38 }
 0x30d   : > { %4691 = vmatprep.subr.bf16.mxu0 %v5429_v38  ;;  %v1473_v46 = vsel %vm994_vm4, %v1456_v31, 0 }
 0x30e   : > { %v1676_v32 = vpop.permute.xlu0 %1675 }
 0x310   : > { %v1682_v33 = vpop.permute.xlu1 %1681 }
 0x311   : > { %v1697_v47 = vsel %vm994_vm4, %v1682_v33, 0 }
 0x312   : > { %v1680_v34 = vpop.permute.xlu0 %1679 }
 0x313   : > { %4666 = vmatmul.mubr.msk.bf16.gmra.mrb[24].mxu0 %vm994_vm4, %v5679_v7 }
 0x314   : > { %v1684_v36 = vpop.permute.xlu1 %1683  ;;  %4692 = vmatpush3.bf16.xpose.msra.mxu0 %v1243_v35  ;;  %4693 = vmatprep.mubr.msk.bf16.mxu0 %vm5430_vm3, %v5429_v38 }
 0x315   : > { %4723 = vmatprep.subr.bf16.mxu0 %v5429_v38  ;;  %v1700_v48 = vsel %vm994_vm4, %v1684_v36, 0 }
 0x316   : > { %v1139_v37 = vpop.permute.xlu0 %1138 }
 0x317   : > { %4670 = vmatpush3.bf16.msra.mxu1 %v1139_v37 }
 0x318   : > { %v1686_v39 = vpop.permute.xlu1 %1685  ;;  %4671 = vmatprep.subr.bf16.mxu1 %v5429_v38 }
 0x319   : > { %v1703_v49 = vsel %vm994_vm4, %v1686_v39, 0 }
 0x31a   : > { %v1143_v43 = vpop.permute.xlu0 %1142 }
 0x31b   : > { %4694 = vmatmul.mubr.msk.bf16.vlgmr.msra.gmra.mrb[28].mxu0 %vm994_vm4, %v1216_v14  ;;  %v1157_v45 = vsel %vm1155_vm5, %v1143_v43, 0 }
 0x31c   : > { %v1678_v41 = vpop.permute.xlu1 %1677  ;;  %4724 = vmatpush3.bf16.xpose.msra.mxu0 %v1467_v40  ;;  %4697 = vmatprep.mubr.msk.bf16.mxu0 %vm5430_vm3, %v5429_v38  ;;  %v5849_v40 = vld [vmem:[%s7091_s23 + $0x20] sm:$0xff] }
 0x31d   : > { %4725 = vmatprep.subr.bf16.mxu0 %v5429_v38 }
 0x320   : > { %v1141_v42 = vpop.permute.xlu1 %1140 }
 0x321   : > { %4672 = vmatpush3.bf16.msra.mxu1 %v1141_v42 }
 0x322   : > { %4673 = vmatprep.subr.bf16.mxu1 %v5429_v38 }
 0x323   : > { %4698 = vmatmul.mubr.msk.bf16.gmra.mrb[32].mxu0 %vm994_vm4, %v1218_v16 }
 0x324   : > { %4726 = vmatpush3.bf16.xpose.msra.mxu0 %v1470_v44  ;;  %4701 = vmatprep.mubr.msk.bf16.mxu0 %vm5430_vm3, %v5429_v38 }
 0x325   : > { %4674 = vmatpush3.bf16.msra.mxu1 %v1157_v45  ;;  %4727 = vmatprep.subr.bf16.mxu0 %v5429_v38 }
 0x326   : > { %4705 = vmatprep.subr.bf16.mxu1 %v5429_v38 }
 0x32b   : > { %4702 = vmatmul.mubr.msk.bf16.gmra.mrb[36].mxu0 %vm994_vm4, %v1220_v21 }
 0x32c   : > { %4728 = vmatpush3.bf16.xpose.msra.mxu0 %v1473_v46  ;;  %4729 = vmatprep.mubr.msk.bf16.mxu0 %vm5430_vm3, %v5429_v38 }
 0x32d   : > { %4759 = vmatprep.subr.bf16.mxu0 %v5429_v38 }
 0x333   : > { %4730 = vmatmul.mubr.msk.bf16.vlgmr.msra.gmra.mrb[40].mxu0 %vm994_vm4, %v1446_v24 }
 0x334   : > { %4760 = vmatpush3.bf16.xpose.msra.mxu0 %v1697_v47  ;;  %4733 = vmatprep.mubr.msk.bf16.mxu0 %vm5430_vm3, %v5429_v38 }
 0x335   : > { %4761 = vmatprep.subr.bf16.mxu0 %v5429_v38 }
 0x33b   : > { %4734 = vmatmul.mubr.msk.bf16.gmra.mrb[44].mxu0 %vm994_vm4, %v1448_v26 }
 0x33c   : > { %4762 = vmatpush3.bf16.xpose.msra.mxu0 %v1700_v48  ;;  %4737 = vmatprep.mubr.msk.bf16.mxu0 %vm5430_vm3, %v5429_v38 }
 0x33d   : > { %4763 = vmatprep.subr.bf16.mxu0 %v5429_v38 }
 0x343   : > { %4738 = vmatmul.mubr.msk.bf16.gmra.mrb[48].mxu0 %vm994_vm4, %v1450_v28 }
 0x344   : > { %4764 = vmatpush3.bf16.xpose.msra.mxu0 %v1703_v49  ;;  %4765 = vmatprep.mubr.msk.bf16.mxu0 %vm5430_vm3, %v5429_v38 }
 0x345   : > { %4795 = vmatprep.subr.bf16.mxu0 %v5429_v38 }
 0x34b   : > { %4766 = vmatmul.mubr.msk.bf16.vlgmr.msra.gmra.mrb[52].mxu0 %vm994_vm4, %v1676_v32 }
 0x34c   : > { %4769 = vmatprep.mubr.msk.bf16.mxu0 %vm5430_vm3, %v5429_v38 }
 0x353   : > { %4770 = vmatmul.mubr.msk.bf16.gmra.mrb[56].mxu0 %vm994_vm4, %v1678_v41 }
 0x354   : > { %4773 = vmatprep.mubr.msk.bf16.mxu0 %vm5430_vm3, %v5429_v38 }
 0x35b   : > { %4774 = vmatmul.mubr.msk.bf16.gmra.mrb[60].mxu0 %vm994_vm4, %v1680_v34 }
 0x35c   : > { %4799 = vmatprep.mubr.msk.bf16.mxu0 %vm5430_vm3, %v5429_v38 }
 0x3d6   : > { %v1047_v50 = vpop.f32.mrb[16].mxu0 }
 0x3d7   : > { %v1069_v52 = vmul.f32 0.35355338, %v1047_v50  ;;  %v4659_v53 = vpop.f32.mrb[17].mxu0 }
 0x3d8   : > { %v1050_v54 = vpop.f32.mrb[18].mxu0 }
 0x3d9   : > { %v1070_v56 = vmul.f32 0.35355338, %v1050_v54  ;;  %v4660_v57 = vpop.f32.mrb[19].mxu0  ;;  %v5805_v59 = vadd.f32 %v1069_v52, %v5797_v51 }
 0x3db   : > { %v1080_v60 = vsel %vm1079_vm6, %v5805_v59, -inf  ;;  %v5810_v61 = vadd.f32 %v1070_v56, %v5802_v55 }
 0x3dc   : > { %1081 = vmax.xlane.f32.xlu1 %v1080_v60 }
 0x3dd   : > { %v1083_v62 = vsel %vm1079_vm6, %v5810_v61, -inf }
 0x3de   : > { %1084 = vmax.xlane.f32.xlu0 %v1083_v62  ;;  %v1055_v63 = vpop.f32.mrb[20].mxu0 }
 0x3df   : > { %v1071_v3 = vmul.f32 0.35355338, %v1055_v63  ;;  %v4663_v4 = vpop.f32.mrb[21].mxu0 }
 0x3e0   : > { %v1058_v5 = vpop.f32.mrb[22].mxu0 }
 0x3e1   : > { %v1072_v8 = vmul.f32 0.35355338, %v1058_v5  ;;  %v4664_v9 = vpop.f32.mrb[23].mxu0  ;;  %v5825_v10 = vadd.f32 %v1071_v3, %v5817_v0 }
 0x3e3   : > { %v1086_v11 = vsel %vm1079_vm6, %v5825_v10, -inf  ;;  %v5830_v12 = vadd.f32 %v1072_v8, %v5822_v6 }
 0x3e4   : > { %1087 = vmax.xlane.f32.xlu0 %v1086_v11 }
 0x3e5   : > { %v1089_v15 = vsel %vm1079_vm6, %v5830_v12, -inf }
 0x3e6   : > { %v1063_v13 = vpop.f32.mrb[24].mxu0 }
 0x3e7   : > { %v4667_v14 = vpop.f32.mrb[25].mxu0  ;;  %v1073_v46 = vmul.f32 0.35355338, %v1063_v13 }
 0x3e8   : > { %1090 = vmax.xlane.f32.xlu0 %v1089_v15  ;;  %v1066_v16 = vpop.f32.mrb[26].mxu0 }
 0x3e9   : > { %v4668_v18 = vpop.f32.mrb[27].mxu0  ;;  %v5860_v53 = vadd.f32 %v1073_v46, %v5849_v40 }
 0x3eb   : > { %v1092_v63 = vsel %vm1079_vm6, %v5860_v53, -inf }
 0x3ed   : > { %1369 = vrot.lane.b32.xlu1 %v5669_v58, %s7062_s25  ;;  %s7066_s25 = smov 24  }
 0x3ee   : > { %v1279_v19 = vpop.f32.mrb[28].mxu0 }
 0x3ef   : > { %v1301_v21 = vmul.f32 0.35355338, %v1279_v19  ;;  %v4695_v22 = vpop.f32.mrb[29].mxu0 }
 0x3f0   : > { %v1282_v24 = vpop.f32.mrb[30].mxu0 }
 0x3f1   : > { %v4696_v1 = vpop.f32.mrb[31].mxu0  ;;  %v5837_v25 = vadd.f32 %v1301_v21, %v5797_v51  ;;  %v1302_v52 = vmul.f32 0.35355338, %v1282_v24 }
 0x3f3   : > { %v1311_v26 = vsel %vm1079_vm6, %v5837_v25, -inf  ;;  %v5867_v3 = vadd.f32 %v1302_v52, %v5802_v55 }
 0x3f4   : > { %1312 = vmax.xlane.f32.xlu0 %v1311_v26 }
 0x3f5   : > { %v1314_v11 = vsel %vm1079_vm6, %v5867_v3, -inf }
 0x3f6   : > { %v1287_v27 = vpop.f32.mrb[32].mxu0 }
 0x3f7   : > { %v1303_v28 = vmul.f32 0.35355338, %v1287_v27  ;;  %v4699_v30 = vpop.f32.mrb[33].mxu0 }
 0x3f8   : > { %v1290_v31 = vpop.f32.mrb[34].mxu0 }
 0x3f9   : > { %v4700_v32 = vpop.f32.mrb[35].mxu0  ;;  %v5842_v33 = vadd.f32 %v1303_v28, %v5817_v0  ;;  %v1304_v60 = vmul.f32 0.35355338, %v1290_v31 }
 0x3fb   : > { %v1317_v34 = vsel %vm1079_vm6, %v5842_v33, -inf  ;;  %v5875_v13 = vadd.f32 %v1304_v60, %v5822_v6 }
 0x3fc   : > { %1318 = vmax.xlane.f32.xlu0 %v1317_v34 }
 0x3fd   : > { %v1320_v21 = vsel %vm1079_vm6, %v5875_v13, -inf }
 0x3fe   : > { %v1295_v35 = vpop.f32.mrb[36].mxu0 }
 0x3ff   : > { %v1305_v36 = vmul.f32 0.35355338, %v1295_v35  ;;  %v4703_v37 = vpop.f32.mrb[37].mxu0 }
 0x400   : > { %v1298_v39 = vpop.f32.mrb[38].mxu0 }
 0x401   : > { %v4704_v41 = vpop.f32.mrb[39].mxu0  ;;  %v5852_v42 = vadd.f32 %v1305_v36, %v5849_v40 }
 0x403   : > { %v1323_v43 = vsel %vm1079_vm6, %v5852_v42, -inf }
 0x404   : > { %1324 = vmax.xlane.f32.xlu0 %v1323_v43 }
 0x406   : > { %v1509_v44 = vpop.f32.mrb[40].mxu0 }
 0x407   : > { %v4731_v45 = vpop.f32.mrb[41].mxu0  ;;  %v1531_v9 = vmul.f32 0.35355338, %v1509_v44 }
 0x408   : > { %v1512_v47 = vpop.f32.mrb[42].mxu0 }
 0x409   : > { %v1532_v48 = vmul.f32 0.35355338, %v1512_v47  ;;  %v4732_v49 = vpop.f32.mrb[43].mxu0  ;;  %v5882_v22 = vadd.f32 %v1531_v9, %v5797_v51 }
 0x40b   : > { %v5857_v50 = vadd.f32 %v1532_v48, %v5802_v55  ;;  %v1541_v26 = vsel %vm1079_vm6, %v5882_v22, -inf }
 0x40d   : > { %v1544_v54 = vsel %vm1079_vm6, %v5857_v50, -inf }
 0x40e   : > { %1545 = vmax.xlane.f32.xlu0 %v1544_v54  ;;  %v1517_v56 = vpop.f32.mrb[44].mxu0 }
 0x40f   : > { %v4735_v57 = vpop.f32.mrb[45].mxu0  ;;  %v1533_v18 = vmul.f32 0.35355338, %v1517_v56 }
 0x410   : > { %v1520_v62 = vpop.f32.mrb[46].mxu0 }
 0x411   : > { %v1534_v4 = vmul.f32 0.35355338, %v1520_v62  ;;  %1093 = vmax.xlane.f32.xlu1 %v1092_v63  ;;  %v4736_v5 = vpop.f32.mrb[47].mxu0  ;;  %v5887_v27 = vadd.f32 %v1533_v18, %v5817_v0 }
 0x413   : > { %v5870_v8 = vadd.f32 %v1534_v4, %v5822_v6  ;;  %v1547_v34 = vsel %vm1079_vm6, %v5887_v27, -inf }
 0x415   : > { %1315 = vmax.xlane.f32.xlu1 %v1314_v11  ;;  %v1550_v14 = vsel %vm1079_vm6, %v5870_v8, -inf  ;;  %v5921_v11 = vpop.permute.xlu0 %1371 }
 0x416   : > { %1551 = vmax.xlane.f32.xlu0 %v1550_v14  ;;  %v1525_v15 = vpop.f32.mrb[48].mxu0 }
 0x417   : > { %v4739_v16 = vpop.f32.mrb[49].mxu0  ;;  %v1535_v1 = vmul.f32 0.35355338, %v1525_v15 }
 0x418   : > { %v1528_v19 = vpop.f32.mrb[50].mxu0 }
 0x419   : > { %1321 = vmax.xlane.f32.xlu1 %v1320_v21  ;;  %v4740_v24 = vpop.f32.mrb[51].mxu0  ;;  %v5892_v35 = vadd.f32 %v1535_v1, %v5849_v40 }
 0x41b   : > { %v1553_v43 = vsel %vm1079_vm6, %v5892_v35, -inf }
 0x41d   : > { %1542 = vmax.xlane.f32.xlu1 %v1541_v26 }
 0x41e   : > { %v1739_v28 = vpop.f32.mrb[52].mxu0 }
 0x41f   : > { %v1761_v30 = vmul.f32 0.35355338, %v1739_v28  ;;  %v4767_v31 = vpop.f32.mrb[53].mxu0 }
 0x420   : > { %v1742_v32 = vpop.f32.mrb[54].mxu0 }
 0x421   : > { %v1762_v36 = vmul.f32 0.35355338, %v1742_v32  ;;  %1548 = vmax.xlane.f32.xlu1 %v1547_v34  ;;  %v4768_v37 = vpop.f32.mrb[55].mxu0  ;;  %v5895_v39 = vadd.f32 %v1761_v30, %v5797_v51 }
 0x423   : > { %v1771_v41 = vsel %vm1079_vm6, %v5895_v39, -inf  ;;  %v5902_v44 = vadd.f32 %v1762_v36, %v5802_v55 }
 0x424   : > { %1772 = vmax.xlane.f32.xlu0 %v1771_v41 }
 0x425   : > { %1554 = vmax.xlane.f32.xlu1 %v1553_v43  ;;  %v1774_v49 = vsel %vm1079_vm6, %v5902_v44, -inf }
 0x426   : > { %v1747_v45 = vpop.f32.mrb[56].mxu0 }
 0x427   : > { %v1763_v46 = vmul.f32 0.35355338, %v1747_v45  ;;  %v4771_v47 = vpop.f32.mrb[57].mxu0 }
 0x428   : > { %v1750_v48 = vpop.f32.mrb[58].mxu0 }
 0x429   : > { %v1764_v51 = vmul.f32 0.35355338, %v1750_v48  ;;  %1775 = vmax.xlane.f32.xlu1 %v1774_v49  ;;  %v4772_v52 = vpop.f32.mrb[59].mxu0  ;;  %v5907_v54 = vadd.f32 %v1763_v46, %v5817_v0 }
 0x42b   : > { %v1777_v56 = vsel %vm1079_vm6, %v5907_v54, -inf  ;;  %v5912_v55 = vadd.f32 %v1764_v51, %v5822_v6  ;;  %v5923_v6 = vpop.permute.xlu0 %1373 }
 0x42c   : > { %1778 = vmax.xlane.f32.xlu0 %v1777_v56 }
 0x42d   : > { %v1780_v57 = vsel %vm1079_vm6, %v5912_v55, -inf }
 0x42e   : > { %1781 = vmax.xlane.f32.xlu1 %v1780_v57  ;;  %v1755_v60 = vpop.f32.mrb[60].mxu0 }
 0x42f   : > { %v1765_v62 = vmul.f32 0.35355338, %v1755_v60  ;;  %v4775_v63 = vpop.f32.mrb[61].mxu0 }
 0x430   : > { %v1758_v4 = vpop.f32.mrb[62].mxu0 }
 0x431   : > { %v4776_v5 = vpop.f32.mrb[63].mxu0  ;;  %v5917_v9 = vadd.f32 %v1765_v62, %v5849_v40 }
 0x433   : > { %v1783_v0 = vsel %vm1079_vm6, %v5917_v9, -inf }
 0x434   : > { %1784 = vmax.xlane.f32.xlu0 %v1783_v0 }
 0x469   : > { %v1082_v14 = vpop.xlane.xlu1 %1081 }
 0x46a   : > { %v1095_v15 = vsub.f32 %v5805_v59, %v1082_v14 }
 0x46b   : > { %v1085_v16 = vpop.xlane.xlu0 %1084 }
 0x46c   : > { %v1100_v18 = vmul.f32 1.442695, %v1095_v15  ;;  %v1096_v19 = vsub.f32 %v5810_v61, %v1085_v16 }
 0x46d   : > { %v5949_v37 = vpop.permute.xlu1 %1369 }
 0x46e   : > { %5203 = vpow2.f32 %v1100_v18  ;;  %v1102_v21 = vmul.f32 1.442695, %v1096_v19 }
 0x470   : > { %5205 = vpow2.f32 %v1102_v21 }
 0x471   : > { %v1088_v40 = vpop.xlane.xlu0 %1087 }
 0x472   : > { %v1097_v24 = vsub.f32 %v5825_v10, %v1088_v40 }
 0x474   : > { %v1104_v1 = vmul.f32 1.442695, %v1097_v24 }
 0x475   : > { %v1091_v26 = vpop.xlane.xlu0 %1090 }
 0x476   : > { %5207 = vpow2.f32 %v1104_v1  ;;  %v1098_v28 = vsub.f32 %v5830_v12, %v1091_v26 }
 0x478   : > { %v5929_v30 = vpop.eup %5203  ;;  %v1106_v31 = vmul.f32 1.442695, %v1098_v28 }
 0x479   : > { %v1110_v59 = vsel %vm1079_vm6, %v5929_v30, 0.0 }
 0x47a   : > { %v5933_v32 = vpop.eup %5205  ;;  %5209 = vpow2.f32 %v1106_v31  ;;  %1111 = vadd.xlane.f32.xlu0 %v1110_v59 }
 0x47b   : > { %v1113_v61 = vsel %vm1079_vm6, %v5933_v32, 0.0 }
 0x47c   : > { %1114 = vadd.xlane.f32.xlu1 %v1113_v61 }
 0x480   : > { %v5937_v10 = vpop.eup %5207 }
 0x481   : > { %v1116_v34 = vsel %vm1079_vm6, %v5937_v10, 0.0  ;;  %v1313_v47 = vpop.xlane.xlu0 %1312 }
 0x482   : > { %1117 = vadd.xlane.f32.xlu0 %v1116_v34  ;;  %v1326_v49 = vsub.f32 %v5837_v25, %v1313_v47 }
 0x484   : > { %v5941_v12 = vpop.eup %5209  ;;  %v1331_v56 = vmul.f32 1.442695, %v1326_v49 }
 0x485   : > { %v1119_v36 = vsel %vm1079_vm6, %v5941_v12, 0.0 }
 0x486   : > { %1120 = vadd.xlane.f32.xlu1 %v1119_v36 }
 0x489   : > { %v1319_v52 = vpop.xlane.xlu0 %1318 }
 0x48a   : > { %v1328_v57 = vsub.f32 %v5842_v33, %v1319_v52 }
 0x48c   : > { %v1335_v62 = vmul.f32 1.442695, %v1328_v57 }
 0x491   : > { %v1325_v4 = vpop.xlane.xlu0 %1324 }
 0x497   : > { %1599 = vrot.lane.b32.xlu1 %v5669_v58, %s7060_s6 }
 0x498   : > { %1601 = vrot.lane.b32.xlu0 %v5673_v2, %s7060_s6 }
 0x49b   : > { %v1546_v0 = vpop.xlane.xlu0 %1545 }
 0x49c   : > { %1603 = vrot.lane.b32.xlu0 %v5679_v7, %s7060_s6  ;;  %v1557_v33 = vsub.f32 %v5857_v50, %v1546_v0  ;;  %s7092_s6 = smov 88  }
 0x49e   : > { %v1094_v41 = vpop.xlane.xlu1 %1093 }
 0x49f   : > { %v1099_v45 = vsub.f32 %v5860_v53, %v1094_v41 }
 0x4a1   : > { %v1108_v48 = vmul.f32 1.442695, %v1099_v45 }
 0x4a2   : > { %v1316_v43 = vpop.xlane.xlu1 %1315 }
 0x4a3   : > { %v1327_v46 = vsub.f32 %v5867_v3, %v1316_v43  ;;  %5211 = vpow2.f32 %v1108_v48  ;;  %v1330_v3 = vsub.f32 %v5852_v42, %v1325_v4  ;;  %v1563_v42 = vmul.f32 1.442695, %v1557_v33  ;;  %v1552_v40 = vpop.xlane.xlu0 %1551 }
 0x4a4   : > { %v1559_v26 = vsub.f32 %v5870_v8, %v1552_v40 }
 0x4a5   : > { %v1333_v51 = vmul.f32 1.442695, %v1327_v46  ;;  %v1339_v15 = vmul.f32 1.442695, %v1330_v3 }
 0x4a6   : > { %v1322_v60 = vpop.xlane.xlu1 %1321  ;;  %v1567_v61 = vmul.f32 1.442695, %v1559_v26 }
 0x4a7   : > { %5213 = vpow2.f32 %v1333_v51  ;;  %v1329_v63 = vsub.f32 %v5875_v13, %v1322_v60 }
 0x4a8   : > { %5215 = vpow2.f32 %v1331_v56 }
 0x4a9   : > { %5217 = vpow2.f32 %v1335_v62  ;;  %v1337_v5 = vmul.f32 1.442695, %v1329_v63 }
 0x4aa   : > { %v5958_v53 = vpop.xlane.xlu1 %1542 }
 0x4ab   : > { %5219 = vpow2.f32 %v1337_v5 }
 0x4ac   : > { %5221 = vpow2.f32 %v1339_v15 }
 0x4ad   : > { %v5961_v25 = vpop.eup %5211  ;;  %5223 = vpow2.f32 %v1563_v42 }
 0x4ae   : > { %v1549_v16 = vpop.xlane.xlu1 %1548  ;;  %v1122_v18 = vsel %vm1079_vm6, %v5961_v25, 0.0 }
 0x4af   : > { %v1558_v21 = vsub.f32 %v5887_v27, %v1549_v16 }
 0x4b1   : > { %v5963_v14 = vpop.eup %5213  ;;  %v1565_v28 = vmul.f32 1.442695, %v1558_v21  ;;  %v1773_v34 = vpop.xlane.xlu0 %1772 }
 0x4b2   : > { %v1344_v13 = vsel %vm1079_vm6, %v5963_v14, 0.0  ;;  %v5970_v19 = vpop.eup %5215  ;;  %v1555_v1 = vpop.xlane.xlu1 %1554  ;;  %v1786_v0 = vsub.f32 %v5895_v39, %v1773_v34 }
 0x4b3   : > { %v1341_v50 = vsel %vm1079_vm6, %v5970_v19, 0.0  ;;  %v5975_v24 = vpop.eup %5217  ;;  %5225 = vpow2.f32 %v1565_v28  ;;  %v1560_v27 = vsub.f32 %v5892_v35, %v1555_v1 }
 0x4b4   : > { %v1347_v31 = vsel %vm1079_vm6, %v5975_v24, 0.0  ;;  %5227 = vpow2.f32 %v1567_v61  ;;  %v1791_v16 = vmul.f32 1.442695, %v1786_v0 }
 0x4b5   : > { %v5980_v59 = vpop.eup %5219  ;;  %v1569_v8 = vmul.f32 1.442695, %v1560_v27 }
 0x4b6   : > { %v1776_v36 = vpop.xlane.xlu1 %1775  ;;  %v1350_v41 = vsel %vm1079_vm6, %v5980_v59, 0.0  ;;  %v5985_v43 = vpop.eup %5221 }
 0x4b7   : > { %v1787_v45 = vsub.f32 %v5902_v44, %v1776_v36  ;;  %v1353_v47 = vsel %vm1079_vm6, %v5985_v43, 0.0  ;;  %v5990_v48 = vpop.eup %5223  ;;  %5229 = vpow2.f32 %v1569_v8  ;;  %v1387_v8 = vsel %vm1155_vm5, %v5923_v6, 0 }
 0x4b8   : > { %v1574_v52 = vsel %vm1079_vm6, %v5990_v48, 0.0 }
 0x4b9   : > { %v1779_v46 = vpop.xlane.xlu0 %1778  ;;  %v1793_v35 = vmul.f32 1.442695, %v1787_v45 }
 0x4ba   : > { %v1788_v49 = vsub.f32 %v5907_v54, %v1779_v46 }
 0x4bb   : > { %1345 = vadd.xlane.f32.xlu0 %v1344_v13  ;;  %1123 = vadd.xlane.f32.xlu1 %v1122_v18  ;;  %v1782_v51 = vpop.xlane.xlu1 %1781  ;;  %5231 = vpow2.f32 %v1793_v35 }
 0x4bc   : > { %v1795_v44 = vmul.f32 1.442695, %v1788_v49  ;;  %v1789_v57 = vsub.f32 %v5912_v55, %v1782_v51  ;;  %v1556_v55 = vsub.f32 %v5882_v22, %v5958_v53 }
 0x4bd   : > { %v5995_v56 = vpop.eup %5225 }
 0x4be   : > { %v1577_v60 = vsel %vm1079_vm6, %v5995_v56, 0.0  ;;  %v6002_v62 = vpop.eup %5227  ;;  %5233 = vpow2.f32 %v1795_v44  ;;  %v1797_v54 = vmul.f32 1.442695, %v1789_v57  ;;  %v1561_v5 = vmul.f32 1.442695, %v1556_v55 }
 0x4bf   : > { %1342 = vadd.xlane.f32.xlu1 %v1341_v50  ;;  %v1580_v63 = vsel %vm1079_vm6, %v6002_v62, 0.0 }
 0x4c0   : > { %5235 = vpow2.f32 %v1797_v54 }
 0x4c1   : > { %v6006_v4 = vpop.eup %5229  ;;  %5237 = vpow2.f32 %v1561_v5  ;;  %v1785_v40 = vpop.xlane.xlu0 %1784 }
 0x4c2   : > { %5239 = vpow2.f32 %v1791_v16 }
 0x4c3   : > { %1348 = vadd.xlane.f32.xlu1 %v1347_v31  ;;  %v1790_v31 = vsub.f32 %v5917_v9, %v1785_v40 }
 0x4c5   : > { %v6012_v3 = vpop.eup %5231  ;;  %v1799_v36 = vmul.f32 1.442695, %v1790_v31 }
 0x4c6   : > { %v1804_v15 = vsel %vm1079_vm6, %v6012_v3, 0.0 }
 0x4c7   : > { %1351 = vadd.xlane.f32.xlu1 %v1350_v41 }
 0x4c8   : > { %v6017_v33 = vpop.eup %5233 }
 0x4c9   : > { %v1807_v22 = vsel %vm1079_vm6, %v6017_v33, 0.0 }
 0x4ca   : > { %v6021_v53 = vpop.eup %5235 }
 0x4cb   : > { %1354 = vadd.xlane.f32.xlu1 %v1353_v47  ;;  %v1810_v13 = vsel %vm1079_vm6, %v6021_v53, 0.0  ;;  %v6025_v39 = vpop.eup %5237 }
 0x4cc   : > { %v1571_v18 = vsel %vm1079_vm6, %v6025_v39, 0.0  ;;  %v6029_v42 = vpop.eup %5239 }
 0x4cd   : > { %v1801_v21 = vsel %vm1079_vm6, %v6029_v42, 0.0 }
 0x4cf   : > { %1575 = vadd.xlane.f32.xlu1 %v1574_v52 }
 0x4d1   : > { %1829 = vrot.lane.b32.xlu0 %v5669_v58, %s7058_s26  ;;  %v1583_v58 = vsel %vm1079_vm6, %v6006_v4, 0.0 }
 0x4d3   : > { %1578 = vadd.xlane.f32.xlu1 %v1577_v60 }
 0x4d7   : > { %1581 = vadd.xlane.f32.xlu1 %v1580_v63 }
 0x4db   : > { %1584 = vadd.xlane.f32.xlu1 %v1583_v58 }
 0x4df   : > { %1805 = vadd.xlane.f32.xlu1 %v1804_v15 }
 0x4e3   : > { %1808 = vadd.xlane.f32.xlu1 %v1807_v22 }
 0x4e7   : > { %1811 = vadd.xlane.f32.xlu1 %v1810_v13 }
 0x4f0   : > { %1572 = vadd.xlane.f32.xlu0 %v1571_v18 }
 0x4f4   : > { %1802 = vadd.xlane.f32.xlu0 %v1801_v21 }
 0x4f8   : > { %1831 = vrot.lane.b32.xlu1 %v5673_v2, %s7058_s26 }
 0x507   : > { %v1112_v50 = vpop.xlane.xlu0 %1111 }
 0x508   : > { %5241 = vrcp.f32 %v1112_v50 }
 0x509   : > { %v1115_v1 = vpop.xlane.xlu1 %1114 }
 0x50a   : > { %5243 = vrcp.f32 %v1115_v1  ;;  %1833 = vrot.lane.b32.xlu0 %v5679_v7, %s7058_s26  ;;  %s7093_s26 = smov 80  }
 0x50f   : > { %v1118_v26 = vpop.xlane.xlu0 %1117 }
 0x510   : > { %5245 = vrcp.f32 %v1118_v26 }
 0x512   : > { %v5242_v28 = vpop.eup %5241 }
 0x513   : > { %v1121_v61 = vpop.xlane.xlu1 %1120  ;;  %v1130_v34 = vmul.f32 %v5242_v28, %v5929_v30 }
 0x514   : > { %v5244_v27 = vpop.eup %5243  ;;  %5247 = vrcp.f32 %v1121_v61 }
 0x515   : > { %v1131_v2 = vmul.f32 %v5244_v27, %v5933_v32  ;;  %5249 = vpow2.f32 %v1799_v36 }
 0x517   : > { %v1135_v41 = vpack.c.bf16 %v1131_v2, %v1130_v34 }
 0x519   : > { %4676 = vmatmul.mubr.msk.bf16.vlgmr.msra.gmra.mrb[0].mxu1 %vm1079_vm6, %v1135_v41 }
 0x51a   : > { %4706 = vmatpush3.bf16.msra.mxu1 %v5949_v37  ;;  %4679 = vmatprep.mubr.msk.bf16.mxu1 %vm5430_vm3, %v5429_v38  ;;  %v5246_v7 = vpop.eup %5245 }
 0x51b   : > { %4707 = vmatprep.subr.bf16.mxu1 %v5429_v38  ;;  %v1132_v30 = vmul.f32 %v5246_v7, %v5937_v10  ;;  %v1602_v10 = vpop.permute.xlu0 %1601 }
 0x51e   : > { %v5248_v9 = vpop.eup %5247  ;;  %4708 = vmatpush3.bf16.msra.mxu1 %v5921_v11 }
 0x51f   : > { %4709 = vmatprep.subr.bf16.mxu1 %v5429_v38  ;;  %v1133_v32 = vmul.f32 %v5248_v9, %v5941_v12  ;;  %v6055_v45 = vpop.eup %5249  ;;  %v1600_v12 = vpop.permute.xlu1 %1599 }
 0x520   : > { %v1813_v11 = vsel %vm1079_vm6, %v6055_v45, 0.0  ;;  %v1604_v46 = vpop.permute.xlu0 %1603 }
 0x521   : > { %v1136_v37 = vpack.c.bf16 %v1133_v32, %v1132_v30  ;;  %v1617_v13 = vsel %vm1155_vm5, %v1604_v46, 0 }
 0x522   : > { %4710 = vmatpush3.bf16.msra.mxu1 %v1387_v8 }
 0x523   : > { %4680 = vmatmul.mubr.msk.bf16.gmra.mrb[4].mxu1 %vm1079_vm6, %v1136_v37  ;;  %4741 = vmatprep.subr.bf16.mxu1 %v5429_v38 }
 0x524   : > { %4683 = vmatprep.mubr.msk.bf16.mxu1 %vm5430_vm3, %v5429_v38 }
 0x529   : > { %1814 = vadd.xlane.f32.xlu0 %v1813_v11 }
 0x548   : > { %v1124_v47 = vpop.xlane.xlu1 %1123  ;;  %v1346_v6 = vpop.xlane.xlu0 %1345 }
 0x549   : > { %5251 = vrcp.f32 %v1124_v47 }
 0x54c   : > { %v1343_v35 = vpop.xlane.xlu1 %1342  ;;  %v1830_v40 = vpop.permute.xlu0 %1829 }
 0x54d   : > { %5253 = vrcp.f32 %v1343_v35 }
 0x54e   : > { %5255 = vrcp.f32 %v1346_v6 }
 0x550   : > { %v1349_v49 = vpop.xlane.xlu1 %1348 }
 0x553   : > { %v5252_v51 = vpop.eup %5251 }
 0x554   : > { %v1352_v52 = vpop.xlane.xlu1 %1351  ;;  %v1134_v44 = vmul.f32 %v5252_v51, %v5961_v25 }
 0x555   : > { %5257 = vrcp.f32 %v1352_v52 }
 0x556   : > { %v1137_v57 = vpack.c.bf16 %v1134_v44, %v1134_v44  ;;  %5259 = vrcp.f32 %v1349_v49 }
 0x557   : > { %v5254_v60 = vpop.eup %5253 }
 0x558   : > { %4684 = vmatmul.mubr.msk.bf16.gmra.mrb[8].mxu1 %vm1079_vm6, %v1137_v57  ;;  %v5256_v54 = vpop.eup %5255  ;;  %v1361_v63 = vmul.f32 %v5254_v60, %v5970_v19  ;;  %v1355_v55 = vpop.xlane.xlu1 %1354 }
 0x559   : > { %4711 = vmatprep.mubr.msk.bf16.mxu1 %vm5430_vm3, %v5429_v38  ;;  %v1362_v58 = vmul.f32 %v5256_v54, %v5963_v14  ;;  %5261 = vrcp.f32 %v1355_v55 }
 0x55b   : > { %v1366_v5 = vpack.c.bf16 %v1362_v58, %v1361_v63 }
 0x55c   : > { %v1576_v22 = vpop.xlane.xlu1 %1575 }
 0x55d   : > { %5263 = vrcp.f32 %v1576_v22 }
 0x55f   : > { %v5258_v0 = vpop.eup %5257 }
 0x560   : > { %4712 = vmatmul.mubr.msk.bf16.vlgmr.msra.gmra.mrb[12].mxu1 %vm1079_vm6, %v1366_v5  ;;  %v5260_v25 = vpop.eup %5259  ;;  %v1364_v15 = vmul.f32 %v5258_v0, %v5980_v59  ;;  %v1579_v59 = vpop.xlane.xlu1 %1578 }
 0x561   : > { %4742 = vmatpush3.bf16.msra.mxu1 %v1600_v12  ;;  %4715 = vmatprep.mubr.msk.bf16.mxu1 %vm5430_vm3, %v5429_v38  ;;  %v1363_v16 = vmul.f32 %v5260_v25, %v5975_v24 }
 0x562   : > { %4743 = vmatprep.subr.bf16.mxu1 %v5429_v38 }
 0x563   : > { %v1367_v14 = vpack.c.bf16 %v1364_v15, %v1363_v16  ;;  %v5262_v19 = vpop.eup %5261 }
 0x564   : > { %v1365_v18 = vmul.f32 %v5262_v19, %v5985_v43  ;;  %v1582_v21 = vpop.xlane.xlu1 %1581 }
 0x565   : > { %4744 = vmatpush3.bf16.msra.mxu1 %v1602_v10 }
 0x566   : > { %4745 = vmatprep.subr.bf16.mxu1 %v5429_v38  ;;  %v1368_v24 = vpack.c.bf16 %v1365_v18, %v1365_v18 }
 0x567   : > { %v5264_v43 = vpop.eup %5263 }
 0x568   : > { %4716 = vmatmul.mubr.msk.bf16.gmra.mrb[16].mxu1 %vm1079_vm6, %v1367_v14  ;;  %v1585_v50 = vpop.xlane.xlu1 %1584  ;;  %v1592_v61 = vmul.f32 %v5264_v43, %v5990_v48  ;;  %v5168_v43 = vld [vmem:[%s7033_s10 + $0x8] sm:$0xff]  }
 0x569   : > { %4746 = vmatpush3.bf16.msra.mxu1 %v1617_v13  ;;  %4719 = vmatprep.mubr.msk.bf16.mxu1 %vm5430_vm3, %v5429_v38 }
 0x56a   : > { %4777 = vmatprep.subr.bf16.mxu1 %v5429_v38 }
 0x56c   : > { %v1806_v26 = vpop.xlane.xlu1 %1805 }
 0x570   : > { %4720 = vmatmul.mubr.msk.bf16.gmra.mrb[20].mxu1 %vm1079_vm6, %v1368_v24  ;;  %v1809_v28 = vpop.xlane.xlu1 %1808 }
 0x571   : > { %4747 = vmatprep.mubr.msk.bf16.mxu1 %vm5430_vm3, %v5429_v38 }
 0x574   : > { %v1812_v34 = vpop.xlane.xlu1 %1811 }
 0x578   : > { %v1832_v30 = vpop.permute.xlu1 %1831 }
 0x57d   : > { %v1573_v1 = vpop.xlane.xlu0 %1572 }
 0x57e   : > { %5265 = vrcp.f32 %v1573_v1 }
 0x57f   : > { %5267 = vrcp.f32 %v1582_v21 }
 0x580   : > { %5269 = vrcp.f32 %v1579_v59 }
 0x581   : > { %5271 = vrcp.f32 %v1585_v50  ;;  %v1803_v41 = vpop.xlane.xlu0 %1802 }
 0x582   : > { %5273 = vrcp.f32 %v1803_v41 }
 0x583   : > { %5275 = vrcp.f32 %v1806_v26 }
 0x584   : > { %5277 = vrcp.f32 %v1812_v34 }
 0x585   : > { %5279 = vrcp.f32 %v1809_v28  ;;  %v5167_v28 = vld [vmem:[%s7033_s10] sm:$0xff]  }
 0x586   : > { %4796 = vmatpush3.bf16.msra.mxu0 %v5167_v28 }
 0x587   : > { %4797 = vmatprep.subr.bf16.mxu0 %v5429_v38 }
 0x588   : > { %v5266_v31 = vpop.eup %5265 }
 0x589   : > { %v1591_v27 = vmul.f32 %v5266_v31, %v6025_v39  ;;  %v5268_v36 = vpop.eup %5267  ;;  %v1834_v39 = vpop.permute.xlu0 %1833 }
 0x58a   : > { %v5270_v7 = vpop.eup %5269  ;;  %v1594_v9 = vmul.f32 %v5268_v36, %v6002_v62  ;;  %v1847_v37 = vsel %vm1155_vm5, %v1834_v39, 0  ;;  %4798 = vmatpush3.bf16.msra.mxu0 %v5168_v43 }
 0x58b   : > { %v1596_v2 = vpack.c.bf16 %v1592_v61, %v1591_v27  ;;  %v1593_v48 = vmul.f32 %v5270_v7, %v5995_v56  ;;  %v5272_v8 = vpop.eup %5271  ;;  %4827 = vmatprep.subr.bf16.mxu0 %v5429_v38 }
 0x58c   : > { %v1595_v62 = vmul.f32 %v5272_v8, %v6006_v4  ;;  %v5274_v11 = vpop.eup %5273 }
 0x58d   : > { %4748 = vmatmul.mubr.msk.bf16.vlgmr.msra.gmra.mrb[24].mxu1 %vm1079_vm6, %v1596_v2  ;;  %v1597_v32 = vpack.c.bf16 %v1594_v9, %v1593_v48  ;;  %v5276_v10 = vpop.eup %5275  ;;  %v1821_v12 = vmul.f32 %v5274_v11, %v6029_v42 }
 0x58e   : > { %4778 = vmatpush3.bf16.msra.mxu1 %v1830_v40  ;;  %4751 = vmatprep.mubr.msk.bf16.mxu1 %vm5430_vm3, %v5429_v38  ;;  %v1598_v56 = vpack.c.bf16 %v1595_v62, %v1595_v62  ;;  %v1822_v46 = vmul.f32 %v5276_v10, %v6012_v3  ;;  %v5278_v6 = vpop.eup %5277 }
 0x58f   : > { %4779 = vmatprep.subr.bf16.mxu1 %v5429_v38  ;;  %v5280_v4 = vpop.eup %5279  ;;  %v1824_v35 = vmul.f32 %v5278_v6, %v6021_v53 }
 0x590   : > { %v1826_v47 = vpack.c.bf16 %v1822_v46, %v1821_v12  ;;  %v1823_v49 = vmul.f32 %v5280_v4, %v6017_v33 }
 0x592   : > { %4780 = vmatpush3.bf16.msra.mxu1 %v1832_v30  ;;  %v1827_v51 = vpack.c.bf16 %v1824_v35, %v1823_v49 }
 0x593   : > { %4781 = vmatprep.subr.bf16.mxu1 %v5429_v38 }
 0x595   : > { %4752 = vmatmul.mubr.msk.bf16.gmra.mrb[28].mxu1 %vm1079_vm6, %v1597_v32 }
 0x596   : > { %4782 = vmatpush3.bf16.msra.mxu1 %v1847_v37  ;;  %4755 = vmatprep.mubr.msk.bf16.mxu1 %vm5430_vm3, %v5429_v38 }
 0x597   : > { %4811 = vmatprep.subr.bf16.mxu1 %v5429_v38 }
 0x59d   : > { %4756 = vmatmul.mubr.msk.bf16.gmra.mrb[32].mxu1 %vm1079_vm6, %v1598_v56 }
 0x59e   : > { %4783 = vmatprep.mubr.msk.bf16.mxu1 %vm5430_vm3, %v5429_v38 }
 0x5a5   : > { %4784 = vmatmul.mubr.msk.bf16.vlgmr.msra.gmra.mrb[36].mxu1 %vm1079_vm6, %v1826_v47 }
 0x5a6   : > { %4787 = vmatprep.mubr.msk.bf16.mxu1 %vm5430_vm3, %v5429_v38 }
 0x5ad   : > { %4788 = vmatmul.mubr.msk.bf16.gmra.mrb[40].mxu1 %vm1079_vm6, %v1827_v51 }
 0x5ae   : > { %4791 = vmatprep.mubr.msk.bf16.mxu1 %vm5430_vm3, %v5429_v38 }
 0x5b6   : > { %v1815_v42 = vpop.xlane.xlu0 %1814 }
 0x5b7   : > { %5281 = vrcp.f32 %v1815_v42 }
 0x5c1   : > { %v5282_v3 = vpop.eup %5281 }
 0x5c2   : > { %v1825_v52 = vmul.f32 %v5282_v3, %v6055_v45 }
 0x5c4   : > { %v1828_v44 = vpack.c.bf16 %v1825_v52, %v1825_v52 }
 0x5c6   : > { %4792 = vmatmul.mubr.msk.bf16.gmra.mrb[44].mxu1 %vm1079_vm6, %v1828_v44 }
 0x5c7   : > { %4815 = vmatprep.mubr.msk.bf16.mxu1 %vm5430_vm3, %v5429_v38 }
 0x5ec   : > { %v6113_v53 = vpop.f32.mrb[0].mxu1 }
 0x5ed   : > { %v4677_v33 = vpop.f32.mrb[1].mxu1 }
 0x5ee   : > { %v6115_v57 = vpop.f32.mrb[2].mxu1 }
 0x5ef   : > { %v4678_v60 = vpop.f32.mrb[3].mxu1 }
 0x5f6   : > { %v6117_v54 = vpop.f32.mrb[4].mxu1 }
 0x5f7   : > { %v4681_v63 = vpop.f32.mrb[5].mxu1 }
 0x5f8   : > { %v6119_v55 = vpop.f32.mrb[6].mxu1 }
 0x5f9   : > { %v4682_v58 = vpop.f32.mrb[7].mxu1 }
 0x62b   : > { %v6121_v5 = vpop.f32.mrb[8].mxu1 }
 0x62c   : > { %v4685_v45 = vpop.f32.mrb[9].mxu1 }
 0x62d   : > { %v1212_v0 = vpop.f32.mrb[10].mxu1 }
 0x62e   : > { %v4686_v25 = vpop.f32.mrb[11].mxu1 }
 0x633   : > { %v1423_v15 = vpop.f32.mrb[12].mxu1 }
 0x634   : > { %v4713_v16 = vpop.f32.mrb[13].mxu1 }
 0x635   : > { %v1426_v14 = vpop.f32.mrb[14].mxu1 }
 0x636   : > { %v5102_v19 = vpack.i.bf16 %v1426_v14, %v1423_v15  ;;  %v4714_v22 = vpop.f32.mrb[15].mxu1 }
 0x638   : > { %5103 = vrot.lane.b32.xlu1 %v5102_v19, %s7070_s30 }
 0x63b   : > { %v1431_v13 = vpop.f32.mrb[16].mxu1 }
 0x63c   : > { %v4717_v18 = vpop.f32.mrb[17].mxu1 }
 0x63d   : > { %v1434_v59 = vpop.f32.mrb[18].mxu1 }
 0x63e   : > { %v5117_v24 = vpack.i.bf16 %v1434_v59, %v1431_v13  ;;  %v4718_v21 = vpop.f32.mrb[19].mxu1 }
 0x643   : > { %v1439_v40 = vpop.f32.mrb[20].mxu1 }
 0x644   : > { %v4721_v50 = vpop.f32.mrb[21].mxu1 }
 0x645   : > { %v1442_v1 = vpop.f32.mrb[22].mxu1 }
 0x646   : > { %v4722_v26 = vpop.f32.mrb[23].mxu1 }
 0x660   : > { %v1653_v31 = vpop.f32.mrb[24].mxu1 }
 0x661   : > { %v4749_v61 = vpop.f32.mrb[25].mxu1 }
 0x662   : > { %v1656_v27 = vpop.f32.mrb[26].mxu1 }
 0x663   : > { %v5107_v34 = vpack.i.bf16 %v1656_v27, %v1653_v31  ;;  %v4750_v2 = vpop.f32.mrb[27].mxu1 }
 0x665   : > { %5108 = vrot.lane.b32.xlu1 %v5107_v34, %s7068_s29 }
 0x668   : > { %v1661_v36 = vpop.f32.mrb[28].mxu1 }
 0x669   : > { %v4753_v41 = vpop.f32.mrb[29].mxu1 }
 0x66a   : > { %v1664_v7 = vpop.f32.mrb[30].mxu1 }
 0x66b   : > { %v5122_v9 = vpack.i.bf16 %v1664_v7, %v1661_v36  ;;  %v4754_v30 = vpop.f32.mrb[31].mxu1 }
 0x66c   : > { %v4353_v30 = vld [vmem:[%s7034_s11] ss:$0 sm:$0xff] }
 0x670   : > { %v1669_v48 = vpop.f32.mrb[32].mxu1 }
 0x671   : > { %v4757_v39 = vpop.f32.mrb[33].mxu1 }
 0x672   : > { %v1672_v32 = vpop.f32.mrb[34].mxu1 }
 0x673   : > { %v4758_v8 = vpop.f32.mrb[35].mxu1 }
 0x678   : > { %v1883_v37 = vpop.f32.mrb[36].mxu1 }
 0x679   : > { %v4785_v62 = vpop.f32.mrb[37].mxu1 }
 0x67a   : > { %v1886_v56 = vpop.f32.mrb[38].mxu1 }
 0x67b   : > { %v5112_v11 = vpack.i.bf16 %v1886_v56, %v1883_v37  ;;  %v4786_v10 = vpop.f32.mrb[39].mxu1 }
 0x67d   : > { %5113 = vrot.lane.b32.xlu1 %v5112_v11, %s7066_s25  ;;  %v5415_v11 = vld [vmem:[%s7086_s1] sm:$0xff] }
 0x680   : > { %v1891_v12 = vpop.f32.mrb[40].mxu1 }
 0x681   : > { %5118 = vrot.lane.b32.xlu1 %v5117_v24, %s7070_s30  ;;  %v4789_v46 = vpop.f32.mrb[41].mxu1 }
 0x682   : > { %v1894_v47 = vpop.f32.mrb[42].mxu1 }
 0x683   : > { %v5127_v6 = vpack.i.bf16 %v1894_v47, %v1891_v12  ;;  %v4790_v4 = vpop.f32.mrb[43].mxu1 }
 0x685   : > { %5123 = vrot.lane.b32.xlu1 %v5122_v9, %s7068_s29  ;;  %5128 = vrot.lane.b32.xlu0 %v5127_v6, %s7066_s25 }
 0x689   : > { %1918 = vrot.lane.b32.xlu1 %v1439_v40, %s7070_s30  ;;  %s7097_s30 = smov 104  }
 0x68d   : > { %1938 = vrot.lane.b32.xlu1 %v1669_v48, %s7068_s29  ;;  %s7096_s29 = smov 112  }
 0x699   : > { %v1899_v35 = vpop.f32.mrb[44].mxu1 }
 0x69a   : > { %1958 = vrot.lane.b32.xlu1 %v1899_v35, %s7066_s25  ;;  %v4793_v49 = vpop.f32.mrb[45].mxu1  ;;  %s7105_s25 = smov 96  }
 0x69b   : > { %v1902_v51 = vpop.f32.mrb[46].mxu1 }
 0x69c   : > { %v4794_v42 = vpop.f32.mrb[47].mxu1 }
 0x6aa   : > { %v5104_v3 = vpop.permute.xlu1 %5103 }
 0x6ab   : > { %v5106_v44 = vunpack.i.h.bf16 %v5104_v3  ;;  %v5105_v33 = vunpack.i.l.bf16 %v5104_v3 }
 0x6ad   : > { %v1966_v45 = vsel %vm994_vm4, %v6115_v57, %v5106_v44  ;;  %v1965_v0 = vsel %vm994_vm4, %v6113_v53, %v5105_v33 }
 0x6d7   : > { %v5109_v52 = vpop.permute.xlu1 %5108 }
 0x6d8   : > { %v5111_v60 = vunpack.i.h.bf16 %v5109_v52  ;;  %v5110_v63 = vunpack.i.l.bf16 %v5109_v52 }
 0x6da   : > { %v1972_v16 = vsel %vm1970_vm7, %v1966_v45, %v5111_v60  ;;  %v1971_v14 = vsel %vm1970_vm7, %v1965_v0, %v5110_v63 }
 0x6ef   : > { %v5114_v58 = vpop.permute.xlu1 %5113 }
 0x6f0   : > { %v5116_v25 = vunpack.i.h.bf16 %v5114_v58  ;;  %v5115_v15 = vunpack.i.l.bf16 %v5114_v58 }
 0x6f2   : > { %v1978_v19 = vsel %vm1976_vm8, %v1972_v16, %v5116_v25  ;;  %v1977_v22 = vsel %vm1976_vm8, %v1971_v14, %v5115_v15 }
 0x6f3   : > { %v1982_v13 = vpack.c.bf16 %v1978_v19, %v1977_v22  ;;  %v5119_v18 = vpop.permute.xlu1 %5118 }
 0x6f4   : > { %v5121_v59 = vunpack.i.h.bf16 %v5119_v18  ;;  %v5120_v24 = vunpack.i.l.bf16 %v5119_v18 }
 0x6f5   : > { %4800 = vmatmul.mubr.msk.bf16.vlgmr.msra.gmra.mrb[64].mxu0 %vm787_vm1, %v1982_v13 }
 0x6f6   : > { %4803 = vmatprep.mubr.msk.bf16.mxu0 %vm5430_vm3, %v5429_v38  ;;  %v1968_v26 = vsel %vm994_vm4, %v6119_v55, %v5121_v59  ;;  %v1967_v28 = vsel %vm994_vm4, %v6117_v54, %v5120_v24 }
 0x6f7   : > { %v5124_v53 = vpop.permute.xlu1 %5123  ;;  %v5129_v57 = vpop.permute.xlu0 %5128 }
 0x6f8   : > { %v5126_v21 = vunpack.i.h.bf16 %v5124_v53  ;;  %v5125_v40 = vunpack.i.l.bf16 %v5124_v53  ;;  %v5131_v50 = vunpack.i.h.bf16 %v5129_v57  ;;  %v5130_v1 = vunpack.i.l.bf16 %v5129_v57 }
 0x6fa   : > { %v1973_v43 = vsel %vm1970_vm7, %v1967_v28, %v5125_v40  ;;  %v1974_v31 = vsel %vm1970_vm7, %v1968_v26, %v5126_v21  ;;  %v5169_v40 = vld [vmem:[%s7038_s15] sm:$0xff]  }
 0x6fb   : > { %v1980_v61 = vsel %vm1976_vm8, %v1974_v31, %v5131_v50  ;;  %v1979_v27 = vsel %vm1976_vm8, %v1973_v43, %v5130_v1  ;;  %v1919_v2 = vpop.permute.xlu1 %1918  ;;  %4812 = vmatpush3.bf16.msra.mxu1 %v5169_v40 }
 0x6fc   : > { %v1983_v34 = vpack.c.bf16 %v1980_v61, %v1979_v27  ;;  %v1969_v55 = vsel %vm994_vm4, %v6121_v5, %v1919_v2  ;;  %v4359_v5 = vld [vmem:[%s7035_s12] ss:$0 sm:$0xff]  ;;  %4813 = vmatprep.subr.bf16.mxu1 %v5429_v38 }
 0x6fe   : > { %4804 = vmatmul.mubr.msk.bf16.gmra.mrb[68].mxu0 %vm787_vm1, %v1983_v34 }
 0x6ff   : > { %4807 = vmatprep.mubr.msk.bf16.mxu0 %vm5430_vm3, %v5429_v38  ;;  %v1939_v36 = vpop.permute.xlu1 %1938 }
 0x700   : > { %v1975_v54 = vsel %vm1970_vm7, %v1969_v55, %v1939_v36 }
 0x70c   : > { %v1959_v41 = vpop.permute.xlu1 %1958 }
 0x70d   : > { %v1981_v7 = vsel %vm1976_vm8, %v1975_v54, %v1959_v41 }
 0x70e   : > { %v1984_v9 = vpack.c.bf16 %v1981_v7, %v1981_v7 }
 0x710   : > { %4808 = vmatmul.mubr.msk.bf16.gmra.mrb[72].mxu0 %vm787_vm1, %v1984_v9 }
 0x711   : > { %4843 = vmatprep.mubr.msk.bf16.mxu0 %vm5430_vm3, %v5429_v38 }
 0x7c8   : > { %v2051_v48 = vpop.f32.mrb[64].mxu0 }
 0x7c9   : > { %v2052_v39 = vadd.f32 %v4353_v30, %v2051_v48  ;;  %v4801_v32 = vpop.f32.mrb[65].mxu0 }
 0x7ca   : > { %v2054_v8 = vpop.f32.mrb[66].mxu0 }
 0x7cb   : > { %v2080_v37 = vmul.f32 %v4359_v5, %v2052_v39  ;;  %v2055_v62 = vadd.f32 %v4353_v30, %v2054_v8  ;;  %v4802_v56 = vpop.f32.mrb[67].mxu0 }
 0x7cd   : > { %v6178_v10 = vadd.f32 %v5415_v11, %v2080_v37  ;;  %v2081_v12 = vmul.f32 %v4359_v5, %v2055_v62 }
 0x7cf   : > { %v6181_v46 = vadd.f32 %v2081_v12, %v5598_v17  ;;  %v2092_v47 = vsel %vm787_vm1, %v6178_v10, 0.0  ;;  %v2112_v6 = vmul.f32 %v6178_v10, %v6178_v10 }
 0x7d0   : > { %2093 = vadd.xlane.f32.xlu1 %v2092_v47 }
 0x7d1   : > { %v2059_v4 = vpop.f32.mrb[68].mxu0  ;;  %v2095_v35 = vsel %vm787_vm1, %v6181_v46, 0.0  ;;  %v2117_v3 = vsel %vm787_vm1, %v2112_v6, 0.0  ;;  %v2113_v17 = vmul.f32 %v6181_v46, %v6181_v46 }
 0x7d2   : > { %v2060_v49 = vadd.f32 %v4353_v30, %v2059_v4  ;;  %2096 = vadd.xlane.f32.xlu0 %v2095_v35  ;;  %v4805_v51 = vpop.f32.mrb[69].mxu0 }
 0x7d3   : > { %v2062_v42 = vpop.f32.mrb[70].mxu0  ;;  %v2120_v58 = vsel %vm787_vm1, %v2113_v17, 0.0  ;;  %v4360_v17 = vld [vmem:[%s7036_s13] ss:$0 sm:$0xff] }
 0x7d4   : > { %v2082_v52 = vmul.f32 %v4359_v5, %v2060_v49  ;;  %v2063_v44 = vadd.f32 %v4353_v30, %v2062_v42  ;;  %2118 = vadd.xlane.f32.xlu1 %v2117_v3  ;;  %v4806_v33 = vpop.f32.mrb[71].mxu0 }
 0x7d6   : > { %v6193_v60 = vadd.f32 %v2082_v52, %v5603_v20  ;;  %v2083_v63 = vmul.f32 %v4359_v5, %v2063_v44 }
 0x7d8   : > { %v6197_v45 = vadd.f32 %v2083_v63, %v5609_v23  ;;  %2121 = vadd.xlane.f32.xlu1 %v2120_v58  ;;  %v2098_v0 = vsel %vm787_vm1, %v6193_v60, 0.0  ;;  %v2114_v25 = vmul.f32 %v6193_v60, %v6193_v60 }
 0x7d9   : > { %2099 = vadd.xlane.f32.xlu0 %v2098_v0 }
 0x7da   : > { %v2101_v15 = vsel %vm787_vm1, %v6197_v45, 0.0  ;;  %v2115_v20 = vmul.f32 %v6197_v45, %v6197_v45  ;;  %v2123_v16 = vsel %vm787_vm1, %v2114_v25, 0.0 }
 0x7dc   : > { %2102 = vadd.xlane.f32.xlu1 %v2101_v15  ;;  %v2126_v23 = vsel %vm787_vm1, %v2115_v20, 0.0  ;;  %v4361_v15 = vld [vmem:[%s7037_s14] ss:$0 sm:$0xff] }
 0x7dd   : > { %2124 = vadd.xlane.f32.xlu0 %v2123_v16 }
 0x7e0   : > { %2127 = vadd.xlane.f32.xlu1 %v2126_v23 }
 0x7e3   : > { %v2067_v14 = vpop.f32.mrb[72].mxu0 }
 0x7e4   : > { %v2068_v19 = vadd.f32 %v4353_v30, %v2067_v14  ;;  %v4809_v22 = vpop.f32.mrb[73].mxu0 }
 0x7e5   : > { %v2070_v13 = vpop.f32.mrb[74].mxu0 }
 0x7e6   : > { %v2084_v18 = vmul.f32 %v4359_v5, %v2068_v19  ;;  %v4810_v59 = vpop.f32.mrb[75].mxu0 }
 0x7e8   : > { %v6210_v24 = vadd.f32 %v2084_v18, %v5619_v29  ;;  %v5170_v29 = vld [vmem:[%s7038_s15 + $0x8] sm:$0xff]  }
 0x7e9   : > { %4814 = vmatpush3.bf16.msra.mxu1 %v5170_v29 }
 0x7ea   : > { %v2104_v53 = vsel %vm787_vm1, %v6210_v24, 0.0  ;;  %v2116_v57 = vmul.f32 %v6210_v24, %v6210_v24  ;;  %4855 = vmatprep.subr.bf16.mxu1 %v5429_v38 }
 0x7eb   : > { %2105 = vadd.xlane.f32.xlu0 %v2104_v53 }
 0x7ec   : > { %v2129_v21 = vsel %vm787_vm1, %v2116_v57, 0.0 }
 0x7ed   : > { %2130 = vadd.xlane.f32.xlu1 %v2129_v21 }
 0x85d   : > { %v2094_v50 = vpop.xlane.xlu1 %2093 }
 0x85e   : > { %v2107_v1 = vmul.f32 0.03125, %v2094_v50 }
 0x85f   : > { %v2097_v26 = vpop.xlane.xlu0 %2096 }
 0x860   : > { %v2137_v43 = vmul.f32 %v2107_v1, %v2107_v1  ;;  %v2108_v31 = vmul.f32 0.03125, %v2097_v26  ;;  %v2152_v49 = vsub.f32 %v6178_v10, %v2107_v1 }
 0x861   : > { %v2119_v28 = vpop.xlane.xlu1 %2118 }
 0x862   : > { %v2132_v61 = vmul.f32 0.03125, %v2119_v28  ;;  %v2138_v2 = vmul.f32 %v2108_v31, %v2108_v31  ;;  %v2153_v52 = vsub.f32 %v6181_v46, %v2108_v31 }
 0x864   : > { %v2142_v27 = vsub.f32 %v2132_v61, %v2137_v43 }
 0x865   : > { %v2122_v34 = vpop.xlane.xlu1 %2121 }
 0x866   : > { %v2147_v36 = vmax.f32 %v2142_v27, 0.0  ;;  %v2133_v55 = vmul.f32 0.03125, %v2122_v34  ;;  %v2100_v54 = vpop.xlane.xlu0 %2099 }
 0x867   : > { %v2109_v41 = vmul.f32 0.03125, %v2100_v54  ;;  %v5171_v54 = vld [vmem:[%s7040_s17] sm:$0xff]  }
 0x868   : > { %v2157_v7 = vadd.f32 1e-06, %v2147_v36  ;;  %v2143_v9 = vsub.f32 %v2133_v55, %v2138_v2  ;;  %4828 = vmatpush3.bf16.msra.mxu0 %v5171_v54 }
 0x869   : > { %v2103_v30 = vpop.xlane.xlu1 %2102  ;;  %v2139_v32 = vmul.f32 %v2109_v41, %v2109_v41  ;;  %v2154_v14 = vsub.f32 %v6193_v60, %v2109_v41  ;;  %4829 = vmatprep.subr.bf16.mxu0 %v5429_v38  ;;  %v5172_v41 = vld [vmem:[%s7040_s17 + $0x8] sm:$0xff]  }
 0x86a   : > { %5283 = vrsqrt.f32 %v2157_v7  ;;  %v2148_v48 = vmax.f32 %v2143_v9, 0.0  ;;  %v2110_v5 = vmul.f32 0.03125, %v2103_v30  ;;  %v2125_v39 = vpop.xlane.xlu0 %2124  ;;  %v5173_v7 = vld [vmem:[%s7040_s17 + $0x10] sm:$0xff]   ;;  %v5174_v9 = vld [vmem:[%s7040_s17 + $0x18] sm:$0xff]   ;;  %v5175_v30 = vld [vmem:[%s7040_s17 + $0x20] sm:$0xff]  }
 0x86b   : > { %v2134_v8 = vmul.f32 0.03125, %v2125_v39  ;;  %v5178_v39 = vld [vmem:[%s7040_s17 + $0x38] sm:$0xff]  }
 0x86c   : > { %v2158_v37 = vadd.f32 1e-06, %v2148_v48  ;;  %v2140_v11 = vmul.f32 %v2110_v5, %v2110_v5  ;;  %v2155_v53 = vsub.f32 %v6197_v45, %v2110_v5  ;;  %4830 = vmatpush3.bf16.msra.mxu0 %v5172_v41  ;;  %v5176_v48 = vld [vmem:[%s7040_s17 + $0x28] sm:$0xff]   ;;  %v5177_v5 = vld [vmem:[%s7040_s17 + $0x30] sm:$0xff]  }
 0x86d   : > { %v2144_v62 = vsub.f32 %v2134_v8, %v2139_v32  ;;  %v2128_v56 = vpop.xlane.xlu1 %2127  ;;  %4831 = vmatprep.subr.bf16.mxu0 %v5429_v38  ;;  %v4362_v32 = vld [vmem:[%s7039_s16] ss:$0 sm:$0xff] }
 0x86e   : > { %5285 = vrsqrt.f32 %v2158_v37  ;;  %v2135_v12 = vmul.f32 0.03125, %v2128_v56 }
 0x86f   : > { %v2149_v47 = vmax.f32 %v2144_v62, 0.0 }
 0x870   : > { %v2145_v6 = vsub.f32 %v2135_v12, %v2140_v11  ;;  %4832 = vmatpush3.bf16.msra.mxu0 %v5173_v7 }
 0x871   : > { %v2159_v4 = vadd.f32 1e-06, %v2149_v47  ;;  %4833 = vmatprep.subr.bf16.mxu0 %v5429_v38 }
 0x872   : > { %v2150_v35 = vmax.f32 %v2145_v6, 0.0 }
 0x873   : > { %5287 = vrsqrt.f32 %v2159_v4 }
 0x874   : > { %v5284_v51 = vpop.eup %5283  ;;  %v2160_v42 = vadd.f32 1e-06, %v2150_v35  ;;  %4834 = vmatpush3.bf16.msra.mxu0 %v5174_v9 }
 0x875   : > { %v2167_v3 = vmul.f32 %v5284_v51, %v2152_v49  ;;  %4835 = vmatprep.subr.bf16.mxu0 %v5429_v38 }
 0x876   : > { %5289 = vrsqrt.f32 %v2160_v42 }
 0x877   : > { %v2178_v63 = vmul.f32 %v4360_v17, %v2167_v3 }
 0x878   : > { %v5286_v44 = vpop.eup %5285  ;;  %v2106_v33 = vpop.xlane.xlu0 %2105  ;;  %4836 = vmatpush3.bf16.msra.mxu0 %v5175_v30 }
 0x879   : > { %v2168_v58 = vmul.f32 %v5286_v44, %v2153_v52  ;;  %v2111_v0 = vmul.f32 0.03125, %v2106_v33  ;;  %v2189_v13 = vadd.f32 %v4361_v15, %v2178_v63  ;;  %4837 = vmatprep.subr.bf16.mxu0 %v5429_v38 }
 0x87a   : > { %v2131_v25 = vpop.xlane.xlu1 %2130 }
 0x87b   : > { %v2179_v20 = vmul.f32 %v4360_v17, %v2168_v58  ;;  %v2141_v16 = vmul.f32 %v2111_v0, %v2111_v0  ;;  %v2136_v23 = vmul.f32 0.03125, %v2131_v25  ;;  %v2156_v61 = vsub.f32 %v6210_v24, %v2111_v0 }
 0x87c   : > { %4838 = vmatpush3.bf16.msra.mxu0 %v5176_v48 }
 0x87d   : > { %v5288_v19 = vpop.eup %5287  ;;  %v2146_v22 = vsub.f32 %v2136_v23, %v2141_v16  ;;  %v2190_v18 = vadd.f32 %v4361_v15, %v2179_v20  ;;  %4839 = vmatprep.subr.bf16.mxu0 %v5429_v38 }
 0x87e   : > { %v2169_v59 = vmul.f32 %v5288_v19, %v2154_v14 }
 0x87f   : > { %v2151_v57 = vmax.f32 %v2146_v22, 0.0  ;;  %v2194_v21 = vpack.c.bf16 %v2190_v18, %v2189_v13 }
 0x880   : > { %v5290_v40 = vpop.eup %5289  ;;  %v2180_v1 = vmul.f32 %v4360_v17, %v2169_v59  ;;  %4840 = vmatpush3.bf16.msra.mxu0 %v5177_v5 }
 0x881   : > { %v2161_v29 = vadd.f32 1e-06, %v2151_v57  ;;  %4816 = vmatmul.mubr.msk.bf16.vlgmr.msra.gmra.mrb[48].mxu1 %vm787_vm1, %v2194_v21  ;;  %v2170_v50 = vmul.f32 %v5290_v40, %v2155_v53  ;;  %4841 = vmatprep.subr.bf16.mxu0 %v5429_v38 }
 0x882   : > { %4819 = vmatprep.mubr.msk.bf16.mxu1 %vm5430_vm3, %v5429_v38  ;;  %v2191_v28 = vadd.f32 %v4361_v15, %v2180_v1 }
 0x883   : > { %5291 = vrsqrt.f32 %v2161_v29  ;;  %v2181_v26 = vmul.f32 %v4360_v17, %v2170_v50 }
 0x884   : > { %4842 = vmatpush3.bf16.msra.mxu0 %v5178_v39 }
 0x885   : > { %v2192_v43 = vadd.f32 %v4361_v15, %v2181_v26  ;;  %4889 = vmatprep.subr.bf16.mxu0 %v5429_v38 }
 0x887   : > { %v2195_v31 = vpack.c.bf16 %v2192_v43, %v2191_v28 }
 0x889   : > { %4820 = vmatmul.mubr.msk.bf16.gmra.mrb[52].mxu1 %vm787_vm1, %v2195_v31 }
 0x88a   : > { %4823 = vmatprep.mubr.msk.bf16.mxu1 %vm5430_vm3, %v5429_v38 }
 0x88d   : > { %v5292_v27 = vpop.eup %5291 }
 0x88e   : > { %v2171_v34 = vmul.f32 %v5292_v27, %v2156_v61 }
 0x890   : > { %v2182_v2 = vmul.f32 %v4360_v17, %v2171_v34 }
 0x892   : > { %v2193_v36 = vadd.f32 %v4361_v15, %v2182_v2 }
 0x894   : > { %v2196_v55 = vpack.c.bf16 %v2193_v36, %v2193_v36 }
 0x896   : > { %4824 = vmatmul.mubr.msk.bf16.gmra.mrb[56].mxu1 %vm787_vm1, %v2196_v55 }
 0x897   : > { %4859 = vmatprep.mubr.msk.bf16.mxu1 %vm5430_vm3, %v5429_v38 }
 0x954   : > { %v2263_v8 = vpop.f32.mrb[48].mxu1 }
 0x955   : > { %v2264_v37 = vadd.f32 %v4362_v32, %v2263_v8  ;;  %v4817_v62 = vpop.f32.mrb[49].mxu1 }
 0x956   : > { %v2266_v56 = vpop.f32.mrb[50].mxu1 }
 0x957   : > { %v2290_v11 = vmul.f32 0.044715, %v2264_v37  ;;  %v2267_v12 = vadd.f32 %v4362_v32, %v2266_v56  ;;  %v4818_v47 = vpop.f32.mrb[51].mxu1  ;;  %v2285_v43 = vmul.f32 0.5, %v2264_v37 }
 0x959   : > { %v2295_v6 = vmul.f32 %v2290_v11, %v2264_v37  ;;  %v2291_v4 = vmul.f32 0.044715, %v2267_v12  ;;  %v2286_v31 = vmul.f32 0.5, %v2267_v12 }
 0x95b   : > { %v2300_v35 = vmul.f32 %v2295_v6, %v2264_v37  ;;  %v2296_v49 = vmul.f32 %v2291_v4, %v2267_v12  ;;  %v4368_v6 = vld [vmem:[%s7041_s18] ss:$0 sm:$0xff] }
 0x95c   : > { %v2271_v51 = vpop.f32.mrb[52].mxu1 }
 0x95d   : > { %v2305_v42 = vadd.f32 %v2300_v35, %v2264_v37  ;;  %v2301_v3 = vmul.f32 %v2296_v49, %v2267_v12  ;;  %v2272_v17 = vadd.f32 %v4362_v32, %v2271_v51  ;;  %v4821_v52 = vpop.f32.mrb[53].mxu1  ;;  %v4377_v35 = vld [vmem:[%s7042_s19] ss:$0 sm:$0xff] }
 0x95e   : > { %v2274_v44 = vpop.f32.mrb[54].mxu1 }
 0x95f   : > { %v2310_v33 = vmul.f32 0.7978846, %v2305_v42  ;;  %v2306_v63 = vadd.f32 %v2301_v3, %v2267_v12  ;;  %v2292_v58 = vmul.f32 0.044715, %v2272_v17  ;;  %v2275_v0 = vadd.f32 %v4362_v32, %v2274_v44  ;;  %v4822_v25 = vpop.f32.mrb[55].mxu1 }
 0x960   : > { %v2287_v48 = vmul.f32 0.5, %v2272_v17 }
 0x961   : > { %5293 = vtanh.f32 %v2310_v33  ;;  %v2311_v15 = vmul.f32 0.7978846, %v2306_v63  ;;  %v2297_v20 = vmul.f32 %v2292_v58, %v2272_v17  ;;  %v2293_v16 = vmul.f32 0.044715, %v2275_v0 }
 0x962   : > { %v2288_v5 = vmul.f32 0.5, %v2275_v0 }
 0x963   : > { %5295 = vtanh.f32 %v2311_v15  ;;  %v2302_v23 = vmul.f32 %v2297_v20, %v2272_v17  ;;  %v2298_v14 = vmul.f32 %v2293_v16, %v2275_v0 }
 0x965   : > { %v2303_v19 = vmul.f32 %v2298_v14, %v2275_v0  ;;  %v2307_v22 = vadd.f32 %v2302_v23, %v2272_v17 }
 0x967   : > { %v2308_v13 = vadd.f32 %v2303_v19, %v2275_v0  ;;  %v2312_v18 = vmul.f32 0.7978846, %v2307_v22 }
 0x969   : > { %v2279_v59 = vpop.f32.mrb[56].mxu1  ;;  %v2313_v53 = vmul.f32 0.7978846, %v2308_v13  ;;  %5297 = vtanh.f32 %v2312_v18 }
 0x96a   : > { %v2280_v57 = vadd.f32 %v4362_v32, %v2279_v59  ;;  %v4825_v21 = vpop.f32.mrb[57].mxu1 }
 0x96b   : > { %v5294_v40 = vpop.eup %5293  ;;  %v2282_v29 = vpop.f32.mrb[58].mxu1  ;;  %5299 = vtanh.f32 %v2313_v53 }
 0x96c   : > { %v2294_v50 = vmul.f32 0.044715, %v2280_v57  ;;  %v4826_v1 = vpop.f32.mrb[59].mxu1  ;;  %v2320_v26 = vadd.f32 1.0, %v5294_v40  ;;  %v2289_v56 = vmul.f32 0.5, %v2280_v57 }
 0x96d   : > { %v5296_v28 = vpop.eup %5295 }
 0x96e   : > { %v2299_v61 = vmul.f32 %v2294_v50, %v2280_v57  ;;  %v2321_v27 = vadd.f32 1.0, %v5296_v28  ;;  %v2325_v34 = vmul.f32 %v2320_v26, %v2285_v43 }
 0x970   : > { %v2326_v2 = vmul.f32 %v2321_v27, %v2286_v31  ;;  %v2304_v36 = vmul.f32 %v2299_v61, %v2280_v57 }
 0x972   : > { %v2330_v55 = vpack.c.bf16 %v2326_v2, %v2325_v34  ;;  %v2309_v54 = vadd.f32 %v2304_v36, %v2280_v57  ;;  %v5179_v36 = vld [vmem:[%s7031_s8 + $0x10] sm:$0xff]  }
 0x973   : > { %v5298_v41 = vpop.eup %5297  ;;  %4856 = vmatpush3.bf16.msra.mxu1 %v5179_v36 }
 0x974   : > { %4844 = vmatmul.mubr.bf16.vlgmr.msra.gmra.mrb[76].mxu0 %v2330_v55  ;;  %v2322_v7 = vadd.f32 1.0, %v5298_v41  ;;  %v2314_v9 = vmul.f32 0.7978846, %v2309_v54  ;;  %4857 = vmatprep.subr.bf16.mxu1 %v5429_v38 }
 0x975   : > { %v5300_v30 = vpop.eup %5299  ;;  %4847 = vmatprep.mubr.msk.bf16.mxu0 %vm5430_vm3, %v5429_v38 }
 0x976   : > { %v2323_v39 = vadd.f32 1.0, %v5300_v30  ;;  %5301 = vtanh.f32 %v2314_v9  ;;  %v2327_v32 = vmul.f32 %v2322_v7, %v2287_v48 }
 0x978   : > { %v2328_v8 = vmul.f32 %v2323_v39, %v2288_v5 }
 0x97a   : > { %v2331_v37 = vpack.c.bf16 %v2328_v8, %v2327_v32 }
 0x97c   : > { %4848 = vmatmul.mubr.bf16.gmra.mrb[80].mxu0 %v2331_v37 }
 0x97d   : > { %4851 = vmatprep.mubr.msk.bf16.mxu0 %vm5430_vm3, %v5429_v38 }
 0x980   : > { %v5302_v62 = vpop.eup %5301 }
 0x981   : > { %v2324_v11 = vadd.f32 1.0, %v5302_v62 }
 0x983   : > { %v2329_v12 = vmul.f32 %v2324_v11, %v2289_v56 }
 0x985   : > { %v2332_v47 = vpack.c.bf16 %v2329_v12, %v2329_v12 }
 0x987   : > { %4852 = vmatmul.mubr.bf16.gmra.mrb[84].mxu0 %v2332_v47 }
 0x988   : > { %4895 = vmatprep.mubr.msk.bf16.mxu0 %vm5430_vm3, %v5429_v38 }
 0xa47   : > { %v2438_v4 = vpop.f32.mrb[76].mxu0 }
 0xa48   : > { %v2439_v49 = vadd.f32 %v4368_v6, %v2438_v4  ;;  %v4845_v51 = vpop.f32.mrb[77].mxu0 }
 0xa49   : > { %v2441_v42 = vpop.f32.mrb[78].mxu0 }
 0xa4a   : > { %v2467_v3 = vmul.f32 %v4377_v35, %v2439_v49  ;;  %v2442_v17 = vadd.f32 %v4368_v6, %v2441_v42  ;;  %v4846_v52 = vpop.f32.mrb[79].mxu0 }
 0xa4c   : > { %v6293_v44 = vadd.f32 %v2467_v3, %v6178_v10  ;;  %v2468_v33 = vmul.f32 %v4377_v35, %v2442_v17 }
 0xa4e   : > { %v6296_v63 = vadd.f32 %v2468_v33, %v6181_v46  ;;  %v2481_v58 = vsel %vm787_vm1, %v6293_v44, 0.0  ;;  %v2501_v0 = vmul.f32 %v6293_v44, %v6293_v44 }
 0xa4f   : > { %2482 = vadd.xlane.f32.xlu0 %v2481_v58  ;;  %v2446_v25 = vpop.f32.mrb[80].mxu0 }
 0xa50   : > { %v2447_v15 = vadd.f32 %v4368_v6, %v2446_v25  ;;  %v4849_v20 = vpop.f32.mrb[81].mxu0  ;;  %v2484_v16 = vsel %vm787_vm1, %v6296_v63, 0.0  ;;  %v2502_v10 = vmul.f32 %v6296_v63, %v6296_v63  ;;  %v2506_v22 = vsel %vm787_vm1, %v2501_v0, 0.0 }
 0xa51   : > { %2485 = vadd.xlane.f32.xlu1 %v2484_v16  ;;  %v2449_v23 = vpop.f32.mrb[82].mxu0 }
 0xa52   : > { %v2469_v46 = vmul.f32 %v4377_v35, %v2447_v15  ;;  %v2450_v14 = vadd.f32 %v4368_v6, %v2449_v23  ;;  %v4850_v19 = vpop.f32.mrb[83].mxu0  ;;  %v2509_v59 = vsel %vm787_vm1, %v2502_v10, 0.0 }
 0xa53   : > { %2507 = vadd.xlane.f32.xlu0 %v2506_v22 }
 0xa54   : > { %v6308_v13 = vadd.f32 %v2469_v46, %v6193_v60  ;;  %v2470_v18 = vmul.f32 %v4377_v35, %v2450_v14 }
 0xa55   : > { %2510 = vadd.xlane.f32.xlu1 %v2509_v59 }
 0xa56   : > { %v6312_v53 = vadd.f32 %v2470_v18, %v6197_v45  ;;  %v2487_v57 = vsel %vm787_vm1, %v6308_v13, 0.0  ;;  %v2503_v21 = vmul.f32 %v6308_v13, %v6308_v13  ;;  %v4380_v18 = vld [vmem:[%s7090_s24 + $0x1] ss:$0 sm:$0xff] }
 0xa57   : > { %2488 = vadd.xlane.f32.xlu0 %v2487_v57 }
 0xa58   : > { %v2490_v40 = vsel %vm787_vm1, %v6312_v53, 0.0  ;;  %v2504_v60 = vmul.f32 %v6312_v53, %v6312_v53  ;;  %v2512_v50 = vsel %vm787_vm1, %v2503_v21, 0.0 }
 0xa59   : > { %2491 = vadd.xlane.f32.xlu1 %v2490_v40 }
 0xa5a   : > { %v2454_v29 = vpop.f32.mrb[84].mxu0  ;;  %v2515_v28 = vsel %vm787_vm1, %v2504_v60, 0.0 }
 0xa5b   : > { %v2455_v1 = vadd.f32 %v4368_v6, %v2454_v29  ;;  %2513 = vadd.xlane.f32.xlu0 %v2512_v50  ;;  %v4853_v45 = vpop.f32.mrb[85].mxu0 }
 0xa5c   : > { %v2457_v26 = vpop.f32.mrb[86].mxu0 }
 0xa5d   : > { %v2471_v43 = vmul.f32 %v4377_v35, %v2455_v1  ;;  %2516 = vadd.xlane.f32.xlu1 %v2515_v28  ;;  %v4854_v31 = vpop.f32.mrb[87].mxu0  ;;  %v4381_v1 = vld [vmem:[%s7030_s7 + $0x1] ss:$0 sm:$0xff] }
 0xa5f   : > { %v6325_v61 = vadd.f32 %v2471_v43, %v6210_v24  ;;  %v5180_v24 = vld [vmem:[%s7031_s8 + $0x18] sm:$0xff]  }
 0xa60   : > { %4858 = vmatpush3.bf16.msra.mxu1 %v5180_v24 }
 0xa61   : > { %v2493_v27 = vsel %vm787_vm1, %v6325_v61, 0.0  ;;  %v2505_v34 = vmul.f32 %v6325_v61, %v6325_v61  ;;  %4871 = vmatprep.subr.bf16.mxu1 %v5429_v38 }
 0xa62   : > { %2494 = vadd.xlane.f32.xlu0 %v2493_v27 }
 0xa63   : > { %v2518_v2 = vsel %vm787_vm1, %v2505_v34, 0.0 }
 0xa64   : > { %2519 = vadd.xlane.f32.xlu1 %v2518_v2 }
 0xadc   : > { %v2483_v55 = vpop.xlane.xlu0 %2482 }
 0xadd   : > { %v2496_v54 = vmul.f32 0.03125, %v2483_v55 }
 0xade   : > { %v2486_v41 = vpop.xlane.xlu1 %2485 }
 0xadf   : > { %v2497_v7 = vmul.f32 0.03125, %v2486_v41  ;;  %v2526_v30 = vmul.f32 %v2496_v54, %v2496_v54  ;;  %v2541_v46 = vsub.f32 %v6293_v44, %v2496_v54 }
 0xae0   : > { %v2508_v9 = vpop.xlane.xlu0 %2507 }
 0xae1   : > { %v2521_v48 = vmul.f32 0.03125, %v2508_v9  ;;  %v2527_v39 = vmul.f32 %v2497_v7, %v2497_v7  ;;  %v2542_v59 = vsub.f32 %v6296_v63, %v2497_v7 }
 0xae2   : > { %v2511_v5 = vpop.xlane.xlu1 %2510 }
 0xae3   : > { %v2531_v32 = vsub.f32 %v2521_v48, %v2526_v30  ;;  %v2522_v8 = vmul.f32 0.03125, %v2511_v5 }
 0xae4   : > { %v2489_v37 = vpop.xlane.xlu0 %2488 }
 0xae5   : > { %v2536_v62 = vmax.f32 %v2531_v32, 0.0  ;;  %v2532_v56 = vsub.f32 %v2522_v8, %v2527_v39  ;;  %v2498_v11 = vmul.f32 0.03125, %v2489_v37 }
 0xae6   : > { %v2492_v12 = vpop.xlane.xlu1 %2491 }
 0xae7   : > { %v2546_v47 = vadd.f32 1e-06, %v2536_v62  ;;  %v2537_v6 = vmax.f32 %v2532_v56, 0.0  ;;  %v2499_v4 = vmul.f32 0.03125, %v2492_v12  ;;  %v2528_v51 = vmul.f32 %v2498_v11, %v2498_v11  ;;  %v4387_v62 = vld [vmem:[%s7032_s9 + $0x1] ss:$0 sm:$0xff] }
 0xae8   : > { %v2514_v35 = vpop.xlane.xlu0 %2513  ;;  %v2543_v28 = vsub.f32 %v6308_v13, %v2498_v11 }
 0xae9   : > { %5303 = vrsqrt.f32 %v2546_v47  ;;  %v2547_v49 = vadd.f32 1e-06, %v2537_v6  ;;  %v2523_v42 = vmul.f32 0.03125, %v2514_v35  ;;  %v2529_v17 = vmul.f32 %v2499_v4, %v2499_v4 }
 0xaea   : > { %v2517_v3 = vpop.xlane.xlu1 %2516  ;;  %v2544_v34 = vsub.f32 %v6312_v53, %v2499_v4 }
 0xaeb   : > { %5305 = vrsqrt.f32 %v2547_v49  ;;  %v2533_v52 = vsub.f32 %v2523_v42, %v2528_v51  ;;  %v2524_v33 = vmul.f32 0.03125, %v2517_v3 }
 0xaed   : > { %v2538_v58 = vmax.f32 %v2533_v52, 0.0  ;;  %v2534_v0 = vsub.f32 %v2524_v33, %v2529_v17 }
 0xaef   : > { %v2548_v25 = vadd.f32 1e-06, %v2538_v58  ;;  %v2539_v15 = vmax.f32 %v2534_v0, 0.0  ;;  %v2495_v20 = vpop.xlane.xlu0 %2494 }
 0xaf0   : > { %v2500_v16 = vmul.f32 0.03125, %v2495_v20 }
 0xaf1   : > { %5307 = vrsqrt.f32 %v2548_v25  ;;  %v2549_v10 = vadd.f32 1e-06, %v2539_v15  ;;  %v2520_v23 = vpop.xlane.xlu1 %2519 }
 0xaf2   : > { %v2530_v14 = vmul.f32 %v2500_v16, %v2500_v16  ;;  %v2525_v19 = vmul.f32 0.03125, %v2520_v23  ;;  %v2545_v30 = vsub.f32 %v6325_v61, %v2500_v16 }
 0xaf3   : > { %v5304_v22 = vpop.eup %5303  ;;  %5309 = vrsqrt.f32 %v2549_v10 }
 0xaf4   : > { %v2556_v57 = vmul.f32 %v5304_v22, %v2541_v46  ;;  %v2535_v21 = vsub.f32 %v2525_v19, %v2530_v14 }
 0xaf5   : > { %v5306_v40 = vpop.eup %5305 }
 0xaf6   : > { %v2567_v60 = vmul.f32 %v4380_v18, %v2556_v57  ;;  %v2557_v29 = vmul.f32 %v5306_v40, %v2542_v59  ;;  %v2540_v50 = vmax.f32 %v2535_v21, 0.0 }
 0xaf8   : > { %v2568_v45 = vmul.f32 %v4380_v18, %v2557_v29  ;;  %v2550_v26 = vadd.f32 1e-06, %v2540_v50  ;;  %v2578_v43 = vadd.f32 %v4381_v1, %v2567_v60 }
 0xafa   : > { %5311 = vrsqrt.f32 %v2550_v26  ;;  %v2579_v31 = vadd.f32 %v4381_v1, %v2568_v45 }
 0xafb   : > { %v5308_v27 = vpop.eup %5307 }
 0xafc   : > { %v2583_v2 = vpack.c.bf16 %v2579_v31, %v2578_v43  ;;  %v2558_v36 = vmul.f32 %v5308_v27, %v2543_v28 }
 0xafd   : > { %v5310_v24 = vpop.eup %5309 }
 0xafe   : > { %4860 = vmatmul.mubr.msk.bf16.vlgmr.msra.gmra.mrb[60].mxu1 %vm787_vm1, %v2583_v2  ;;  %v2559_v55 = vmul.f32 %v5310_v24, %v2544_v34  ;;  %v2569_v54 = vmul.f32 %v4380_v18, %v2558_v36 }
 0xaff   : > { %4863 = vmatprep.mubr.msk.bf16.mxu1 %vm5430_vm3, %v5429_v38 }
 0xb00   : > { %v2570_v41 = vmul.f32 %v4380_v18, %v2559_v55  ;;  %v2580_v7 = vadd.f32 %v4381_v1, %v2569_v54 }
 0xb02   : > { %v2581_v9 = vadd.f32 %v4381_v1, %v2570_v41 }
 0xb04   : > { %v5312_v48 = vpop.eup %5311  ;;  %v2584_v5 = vpack.c.bf16 %v2581_v9, %v2580_v7 }
 0xb05   : > { %v2560_v39 = vmul.f32 %v5312_v48, %v2545_v30 }
 0xb06   : > { %4864 = vmatmul.mubr.msk.bf16.gmra.mrb[64].mxu1 %vm787_vm1, %v2584_v5 }
 0xb07   : > { %4867 = vmatprep.mubr.msk.bf16.mxu1 %vm5430_vm3, %v5429_v38  ;;  %v2571_v32 = vmul.f32 %v4380_v18, %v2560_v39 }
 0xb09   : > { %v2582_v8 = vadd.f32 %v4381_v1, %v2571_v32 }
 0xb0b   : > { %v2585_v37 = vpack.c.bf16 %v2582_v8, %v2582_v8 }
 0xb0e   : > { %4868 = vmatmul.mubr.msk.bf16.gmra.mrb[68].mxu1 %vm787_vm1, %v2585_v37 }
 0xb0f   : > { %4877 = vmatprep.mubr.msk.bf16.mxu1 %vm5430_vm3, %v5429_v38 }
 0xbd1   : > { %v2654_v56 = vpop.f32.mrb[60].mxu1 }
 0xbd2   : > { %v4861_v11 = vpop.f32.mrb[61].mxu1  ;;  %v2655_v47 = vadd.f32 %v4387_v62, %v2654_v56 }
 0xbd3   : > { %v2657_v12 = vpop.f32.mrb[62].mxu1 }
 0xbd4   : > { %v2658_v6 = vadd.f32 %v4387_v62, %v2657_v12  ;;  %v4862_v4 = vpop.f32.mrb[63].mxu1 }
 0xbd6   : > { %v6363_v35 = vpack.c.bf16 %v2658_v6, %v2655_v47  ;;  %v6487_v47 = vld [vmem:[%s7091_s23] sm:$0xff] }
 0xbd8   : > { %2682 = vrot.lane.b32.xlu0 %v6363_v35, %s7076_s2 }
 0xbd9   : > { %v2662_v49 = vpop.f32.mrb[64].mxu1 }
 0xbda   : > { %v4865_v51 = vpop.f32.mrb[65].mxu1  ;;  %v2663_v3 = vadd.f32 %v4387_v62, %v2662_v49 }
 0xbdb   : > { %v2665_v42 = vpop.f32.mrb[66].mxu1  ;;  %v6495_v51 = vld [vmem:[%s7091_s23 + $0x8] sm:$0xff] }
 0xbdc   : > { %v2666_v17 = vadd.f32 %v4387_v62, %v2665_v42  ;;  %v4866_v52 = vpop.f32.mrb[67].mxu1  ;;  %2912 = vrot.lane.b32.xlu0 %v6363_v35, %s7092_s6 }
 0xbde   : > { %v6369_v33 = vpack.c.bf16 %v2666_v17, %v2663_v3 }
 0xbe0   : > { %2684 = vrot.lane.b32.xlu1 %v6369_v33, %s7076_s2 }
 0xbe1   : > { %v2670_v58 = vpop.f32.mrb[68].mxu1 }
 0xbe2   : > { %v2671_v0 = vadd.f32 %v4387_v62, %v2670_v58  ;;  %v4869_v25 = vpop.f32.mrb[69].mxu1 }
 0xbe3   : > { %v2673_v15 = vpop.f32.mrb[70].mxu1 }
 0xbe4   : > { %v6373_v20 = vpack.c.bf16 %v2671_v0, %v2671_v0  ;;  %v4870_v16 = vpop.f32.mrb[71].mxu1  ;;  %v6507_v15 = vld [vmem:[%s7091_s23 + $0x10] sm:$0xff] }
 0xbe6   : > { %2916 = vrot.lane.b32.xlu0 %v6373_v20, %s7092_s6  ;;  %2686 = vrot.lane.b32.xlu1 %v6373_v20, %s7076_s2 }
 0xbea   : > { %3142 = vrot.lane.b32.xlu0 %v6363_v35, %s7093_s26  ;;  %2914 = vrot.lane.b32.xlu1 %v6369_v33, %s7092_s6 }
 0xbee   : > { %3144 = vrot.lane.b32.xlu0 %v6369_v33, %s7093_s26  ;;  %2906 = vrot.lane.b32.xlu1 %v6363_v35, %s7094_s27 }
 0xbf2   : > { %3146 = vrot.lane.b32.xlu0 %v6373_v20, %s7093_s26  ;;  %2908 = vrot.lane.b32.xlu1 %v6369_v33, %s7094_s27 }
 0xbf6   : > { %3372 = vrot.lane.b32.xlu0 %v6363_v35, %s7095_s5  ;;  %2910 = vrot.lane.b32.xlu1 %v6373_v20, %s7094_s27  ;;  %s7099_s27 = smov 56  }
 0xbfa   : > { %3374 = vrot.lane.b32.xlu0 %v6369_v33, %s7095_s5  ;;  %3136 = vrot.lane.b32.xlu1 %v6363_v35, %s7096_s29 }
 0xbfe   : > { %3376 = vrot.lane.b32.xlu0 %v6373_v20, %s7095_s5  ;;  %3138 = vrot.lane.b32.xlu1 %v6369_v33, %s7096_s29  ;;  %s7100_s5 = smov 48  }
 0xc02   : > { %3368 = vrot.lane.b32.xlu0 %v6369_v33, %s7097_s30  ;;  %3140 = vrot.lane.b32.xlu1 %v6373_v20, %s7096_s29  ;;  %s7101_s29 = smov 40  }
 0xc06   : > { %2832 = vrot.lane.b32.xlu0 %v6369_v33, %s7098_s4  ;;  %3366 = vrot.lane.b32.xlu1 %v6363_v35, %s7097_s30 }
 0xc0a   : > { %2830 = vrot.lane.b32.xlu1 %v6363_v35, %s7098_s4 }
 0xc0e   : > { %3370 = vrot.lane.b32.xlu1 %v6373_v20, %s7097_s30  ;;  %s7102_s30 = smov 8  }
 0xc12   : > { %2834 = vrot.lane.b32.xlu1 %v6373_v20, %s7098_s4 }
 0xc4a   : > { %v2683_v10 = vpop.permute.xlu0 %2682 }
 0xc4b   : > { %v2698_v23 = vsel %vm994_vm4, %v2683_v10, 0 }
 0xc4c   : > { %4872 = vmatpush3.bf16.xpose.msra.mxu1 %v2698_v23 }
 0xc4d   : > { %4873 = vmatprep.subr.bf16.mxu1 %v5429_v38 }
 0xc4e   : > { %v2913_v19 = vpop.permute.xlu0 %2912 }
 0xc4f   : > { %v2928_v29 = vsel %vm994_vm4, %v2913_v19, 0 }
 0xc52   : > { %v2685_v46 = vpop.permute.xlu1 %2684 }
 0xc53   : > { %v2701_v14 = vsel %vm994_vm4, %v2685_v46, 0  ;;  %v6515_v46 = vld [vmem:[%s7091_s23 + $0x18] sm:$0xff] }
 0xc54   : > { %4874 = vmatpush3.bf16.xpose.msra.mxu1 %v2701_v14 }
 0xc55   : > { %4875 = vmatprep.subr.bf16.mxu1 %v5429_v38 }
 0xc58   : > { %v2687_v22 = vpop.permute.xlu1 %2686  ;;  %v2917_v18 = vpop.permute.xlu0 %2916 }
 0xc59   : > { %v2704_v59 = vsel %vm994_vm4, %v2687_v22, 0  ;;  %v2934_v34 = vsel %vm994_vm4, %v2917_v18, 0 }
 0xc5c   : > { %v2915_v57 = vpop.permute.xlu1 %2914  ;;  %4876 = vmatpush3.bf16.xpose.msra.mxu1 %v2704_v59  ;;  %v3143_v21 = vpop.permute.xlu0 %3142 }
 0xc5d   : > { %4907 = vmatprep.subr.bf16.mxu1 %v5429_v38  ;;  %v2931_v28 = vsel %vm994_vm4, %v2915_v57, 0  ;;  %v3158_v54 = vsel %vm994_vm4, %v3143_v21, 0 }
 0xc60   : > { %v2907_v40 = vpop.permute.xlu1 %2906  ;;  %v3145_v60 = vpop.permute.xlu0 %3144 }
 0xc61   : > { %v3161_v30 = vsel %vm994_vm4, %v3145_v60, 0 }
 0xc63   : > { %4878 = vmatmul.mubr.msk.bf16.vlgmr.msra.gmra.mrb[72].mxu1 %vm994_vm4, %v6363_v35 }
 0xc64   : > { %v2909_v50 = vpop.permute.xlu1 %2908  ;;  %4908 = vmatpush3.bf16.xpose.msra.mxu1 %v2928_v29  ;;  %v3147_v1 = vpop.permute.xlu0 %3146  ;;  %4881 = vmatprep.mubr.msk.bf16.mxu1 %vm5430_vm3, %v5429_v38 }
 0xc65   : > { %4909 = vmatprep.subr.bf16.mxu1 %v5429_v38  ;;  %v3164_v39 = vsel %vm994_vm4, %v3147_v1, 0 }
 0xc68   : > { %v2911_v45 = vpop.permute.xlu1 %2910  ;;  %v3373_v26 = vpop.permute.xlu0 %3372 }
 0xc69   : > { %v3388_v32 = vsel %vm994_vm4, %v3373_v26, 0 }
 0xc6b   : > { %4882 = vmatmul.mubr.msk.bf16.gmra.mrb[76].mxu1 %vm994_vm4, %v6369_v33 }
 0xc6c   : > { %v3137_v43 = vpop.permute.xlu1 %3136  ;;  %4910 = vmatpush3.bf16.xpose.msra.mxu1 %v2931_v28  ;;  %4885 = vmatprep.mubr.msk.bf16.mxu1 %vm5430_vm3, %v5429_v38  ;;  %v3375_v31 = vpop.permute.xlu0 %3374 }
 0xc6d   : > { %4911 = vmatprep.subr.bf16.mxu1 %v5429_v38  ;;  %v3391_v8 = vsel %vm994_vm4, %v3375_v31, 0 }
 0xc70   : > { %v3139_v27 = vpop.permute.xlu1 %3138  ;;  %v3377_v2 = vpop.permute.xlu0 %3376 }
 0xc71   : > { %v3394_v37 = vsel %vm994_vm4, %v3377_v2, 0 }
 0xc73   : > { %4886 = vmatmul.mubr.msk.bf16.gmra.mrb[80].mxu1 %vm994_vm4, %v6373_v20 }
 0xc74   : > { %v3141_v36 = vpop.permute.xlu1 %3140  ;;  %4912 = vmatpush3.bf16.xpose.msra.mxu1 %v2934_v34  ;;  %4913 = vmatprep.mubr.msk.bf16.mxu1 %vm5430_vm3, %v5429_v38  ;;  %v3369_v55 = vpop.permute.xlu0 %3368 }
 0xc75   : > { %4943 = vmatprep.subr.bf16.mxu1 %v5429_v38 }
 0xc78   : > { %v3367_v24 = vpop.permute.xlu1 %3366  ;;  %v2833_v7 = vpop.permute.xlu0 %2832 }
 0xc7b   : > { %4914 = vmatmul.mubr.msk.bf16.vlgmr.msra.gmra.mrb[84].mxu1 %vm994_vm4, %v2907_v40  ;;  %v6527_v40 = vld [vmem:[%s7091_s23 + $0x20] sm:$0xff] }
 0xc7c   : > { %v2831_v41 = vpop.permute.xlu1 %2830  ;;  %4944 = vmatpush3.bf16.xpose.msra.mxu1 %v3158_v54  ;;  %4917 = vmatprep.mubr.msk.bf16.mxu1 %vm5430_vm3, %v5429_v38 }
 0xc7d   : > { %4890 = vmatpush3.bf16.msra.mxu0 %v2831_v41  ;;  %4945 = vmatprep.subr.bf16.mxu1 %v5429_v38 }
 0xc7e   : > { %4891 = vmatprep.subr.bf16.mxu0 %v5429_v38 }
 0xc80   : > { %v3371_v9 = vpop.permute.xlu1 %3370 }
 0xc81   : > { %4892 = vmatpush3.bf16.msra.mxu0 %v2833_v7 }
 0xc82   : > { %4893 = vmatprep.subr.bf16.mxu0 %v5429_v38 }
 0xc83   : > { %4918 = vmatmul.mubr.msk.bf16.gmra.mrb[88].mxu1 %vm994_vm4, %v2909_v50 }
 0xc84   : > { %v2835_v48 = vpop.permute.xlu1 %2834  ;;  %4946 = vmatpush3.bf16.xpose.msra.mxu1 %v3161_v30  ;;  %4921 = vmatprep.mubr.msk.bf16.mxu1 %vm5430_vm3, %v5429_v38 }
 0xc85   : > { %v2848_v5 = vsel %vm1155_vm5, %v2835_v48, 0  ;;  %4947 = vmatprep.subr.bf16.mxu1 %v5429_v38 }
 0xc86   : > { %4894 = vmatpush3.bf16.msra.mxu0 %v2848_v5 }
 0xc87   : > { %4925 = vmatprep.subr.bf16.mxu0 %v5429_v38 }
 0xc8b   : > { %4922 = vmatmul.mubr.msk.bf16.gmra.mrb[92].mxu1 %vm994_vm4, %v2911_v45 }
 0xc8c   : > { %4948 = vmatpush3.bf16.xpose.msra.mxu1 %v3164_v39  ;;  %4949 = vmatprep.mubr.msk.bf16.mxu1 %vm5430_vm3, %v5429_v38 }
 0xc8d   : > { %4979 = vmatprep.subr.bf16.mxu1 %v5429_v38 }
 0xc93   : > { %4950 = vmatmul.mubr.msk.bf16.vlgmr.msra.gmra.mrb[96].mxu1 %vm994_vm4, %v3137_v43 }
 0xc94   : > { %4980 = vmatpush3.bf16.xpose.msra.mxu1 %v3388_v32  ;;  %4953 = vmatprep.mubr.msk.bf16.mxu1 %vm5430_vm3, %v5429_v38 }
 0xc95   : > { %4981 = vmatprep.subr.bf16.mxu1 %v5429_v38 }
 0xc9b   : > { %4954 = vmatmul.mubr.msk.bf16.gmra.mrb[100].mxu1 %vm994_vm4, %v3139_v27 }
 0xc9c   : > { %4982 = vmatpush3.bf16.xpose.msra.mxu1 %v3391_v8  ;;  %4957 = vmatprep.mubr.msk.bf16.mxu1 %vm5430_vm3, %v5429_v38 }
 0xc9d   : > { %4983 = vmatprep.subr.bf16.mxu1 %v5429_v38 }
 0xca3   : > { %4958 = vmatmul.mubr.msk.bf16.gmra.mrb[104].mxu1 %vm994_vm4, %v3141_v36 }
 0xca4   : > { %4984 = vmatpush3.bf16.xpose.msra.mxu1 %v3394_v37  ;;  %4985 = vmatprep.mubr.msk.bf16.mxu1 %vm5430_vm3, %v5429_v38 }
 0xca5   : > { %5015 = vmatprep.subr.bf16.mxu1 %v5429_v38 }
 0xcab   : > { %4986 = vmatmul.mubr.msk.bf16.vlgmr.msra.gmra.mrb[108].mxu1 %vm994_vm4, %v3367_v24 }
 0xcac   : > { %4989 = vmatprep.mubr.msk.bf16.mxu1 %vm5430_vm3, %v5429_v38 }
 0xcb3   : > { %4990 = vmatmul.mubr.msk.bf16.gmra.mrb[112].mxu1 %vm994_vm4, %v3369_v55 }
 0xcb4   : > { %4993 = vmatprep.mubr.msk.bf16.mxu1 %vm5430_vm3, %v5429_v38 }
 0xcbb   : > { %4994 = vmatmul.mubr.msk.bf16.gmra.mrb[116].mxu1 %vm994_vm4, %v3371_v9 }
 0xcbc   : > { %5019 = vmatprep.mubr.msk.bf16.mxu1 %vm5430_vm3, %v5429_v38 }
 0xd36   : > { %v2740_v62 = vpop.f32.mrb[72].mxu1 }
 0xd37   : > { %v2762_v56 = vmul.f32 0.35355338, %v2740_v62  ;;  %v4879_v11 = vpop.f32.mrb[73].mxu1 }
 0xd38   : > { %v2743_v12 = vpop.f32.mrb[74].mxu1 }
 0xd39   : > { %v6490_v6 = vadd.f32 %v6487_v47, %v2762_v56  ;;  %v2763_v4 = vmul.f32 0.35355338, %v2743_v12  ;;  %v4880_v49 = vpop.f32.mrb[75].mxu1 }
 0xd3b   : > { %v6498_v42 = vadd.f32 %v6495_v51, %v2763_v4  ;;  %v2772_v3 = vsel %vm1079_vm6, %v6490_v6, -inf }
 0xd3c   : > { %2773 = vmax.xlane.f32.xlu0 %v2772_v3 }
 0xd3d   : > { %v2775_v17 = vsel %vm1079_vm6, %v6498_v42, -inf }
 0xd3e   : > { %2776 = vmax.xlane.f32.xlu1 %v2775_v17  ;;  %v2748_v52 = vpop.f32.mrb[76].mxu1 }
 0xd3f   : > { %v2764_v58 = vmul.f32 0.35355338, %v2748_v52  ;;  %v4883_v0 = vpop.f32.mrb[77].mxu1 }
 0xd40   : > { %v2751_v25 = vpop.f32.mrb[78].mxu1 }
 0xd41   : > { %v6510_v16 = vadd.f32 %v6507_v15, %v2764_v58  ;;  %v2765_v10 = vmul.f32 0.35355338, %v2751_v25  ;;  %v4884_v23 = vpop.f32.mrb[79].mxu1 }
 0xd43   : > { %v6518_v14 = vadd.f32 %v6515_v46, %v2765_v10  ;;  %v2778_v19 = vsel %vm1079_vm6, %v6510_v16, -inf }
 0xd44   : > { %2779 = vmax.xlane.f32.xlu0 %v2778_v19 }
 0xd45   : > { %v2781_v57 = vsel %vm1079_vm6, %v6518_v14, -inf }
 0xd46   : > { %v2756_v22 = vpop.f32.mrb[80].mxu1 }
 0xd47   : > { %v2766_v18 = vmul.f32 0.35355338, %v2756_v22  ;;  %v4887_v59 = vpop.f32.mrb[81].mxu1 }
 0xd48   : > { %2782 = vmax.xlane.f32.xlu0 %v2781_v57  ;;  %v2759_v21 = vpop.f32.mrb[82].mxu1 }
 0xd49   : > { %v6530_v60 = vadd.f32 %v6527_v40, %v2766_v18  ;;  %v4888_v29 = vpop.f32.mrb[83].mxu1 }
 0xd4b   : > { %v2784_v50 = vsel %vm1079_vm6, %v6530_v60, -inf }
 0xd4c   : > { %2785 = vmax.xlane.f32.xlu1 %v2784_v50 }
 0xd4e   : > { %v2970_v1 = vpop.f32.mrb[84].mxu1 }
 0xd4f   : > { %v2992_v45 = vmul.f32 0.35355338, %v2970_v1  ;;  %v4915_v26 = vpop.f32.mrb[85].mxu1 }
 0xd50   : > { %v2973_v28 = vpop.f32.mrb[86].mxu1 }
 0xd51   : > { %v6535_v43 = vadd.f32 %v6487_v47, %v2992_v45  ;;  %v2993_v31 = vmul.f32 0.35355338, %v2973_v28  ;;  %v4916_v27 = vpop.f32.mrb[87].mxu1 }
 0xd53   : > { %v6538_v34 = vadd.f32 %v6495_v51, %v2993_v31  ;;  %v3002_v2 = vsel %vm1079_vm6, %v6535_v43, -inf }
 0xd54   : > { %3003 = vmax.xlane.f32.xlu0 %v3002_v2 }
 0xd55   : > { %v3005_v36 = vsel %vm1079_vm6, %v6538_v34, -inf }
 0xd56   : > { %3006 = vmax.xlane.f32.xlu1 %v3005_v36  ;;  %v2978_v24 = vpop.f32.mrb[88].mxu1 }
 0xd57   : > { %v2994_v55 = vmul.f32 0.35355338, %v2978_v24  ;;  %v4919_v54 = vpop.f32.mrb[89].mxu1 }
 0xd58   : > { %v2981_v41 = vpop.f32.mrb[90].mxu1 }
 0xd59   : > { %v6545_v7 = vadd.f32 %v6507_v15, %v2994_v55  ;;  %v4920_v9 = vpop.f32.mrb[91].mxu1  ;;  %v2995_v19 = vmul.f32 0.35355338, %v2981_v41 }
 0xd5b   : > { %v3008_v30 = vsel %vm1079_vm6, %v6545_v7, -inf  ;;  %v6560_v29 = vadd.f32 %v6515_v46, %v2995_v19 }
 0xd5c   : > { %3009 = vmax.xlane.f32.xlu0 %v3008_v30 }
 0xd5d   : > { %v3011_v27 = vsel %vm1079_vm6, %v6560_v29, -inf }
 0xd5e   : > { %v2986_v48 = vpop.f32.mrb[92].mxu1 }
 0xd5f   : > { %v4923_v5 = vpop.f32.mrb[93].mxu1  ;;  %v2996_v59 = vmul.f32 0.35355338, %v2986_v48 }
 0xd60   : > { %v2989_v39 = vpop.f32.mrb[94].mxu1 }
 0xd61   : > { %v4924_v32 = vpop.f32.mrb[95].mxu1  ;;  %v6563_v1 = vadd.f32 %v6527_v40, %v2996_v59 }
 0xd63   : > { %v3014_v54 = vsel %vm1079_vm6, %v6563_v1, -inf }
 0xd66   : > { %v3200_v8 = vpop.f32.mrb[96].mxu1 }
 0xd67   : > { %3062 = vrot.lane.b32.xlu1 %v6369_v33, %s7099_s27  ;;  %v4951_v37 = vpop.f32.mrb[97].mxu1  ;;  %v3222_v50 = vmul.f32 0.35355338, %v3200_v8 }
 0xd68   : > { %v3203_v62 = vpop.f32.mrb[98].mxu1 }
 0xd69   : > { %v4952_v56 = vpop.f32.mrb[99].mxu1  ;;  %v3223_v45 = vmul.f32 0.35355338, %v3203_v62  ;;  %v6566_v26 = vadd.f32 %v6487_v47, %v3222_v50 }
 0xd6b   : > { %3064 = vrot.lane.b32.xlu1 %v6373_v20, %s7099_s27  ;;  %v6573_v36 = vadd.f32 %v6495_v51, %v3223_v45  ;;  %v3232_v48 = vsel %vm1079_vm6, %v6566_v26, -inf }
 0xd6d   : > { %v3235_v32 = vsel %vm1079_vm6, %v6573_v36, -inf }
 0xd6e   : > { %v3208_v11 = vpop.f32.mrb[100].mxu1 }
 0xd6f   : > { %v4955_v12 = vpop.f32.mrb[101].mxu1  ;;  %v3224_v28 = vmul.f32 0.35355338, %v3208_v11 }
 0xd70   : > { %v3211_v4 = vpop.f32.mrb[102].mxu1 }
 0xd71   : > { %v4956_v49 = vpop.f32.mrb[103].mxu1  ;;  %v3225_v24 = vmul.f32 0.35355338, %v3211_v4  ;;  %v6578_v9 = vadd.f32 %v6507_v15, %v3224_v28 }
 0xd72   : > { %3060 = vrot.lane.b32.xlu0 %v6363_v35, %s7099_s27 }
 0xd73   : > { %v6583_v5 = vadd.f32 %v6515_v46, %v3225_v24  ;;  %v3238_v62 = vsel %vm1079_vm6, %v6578_v9, -inf }
 0xd75   : > { %v3241_v11 = vsel %vm1079_vm6, %v6583_v5, -inf }
 0xd76   : > { %v3216_v3 = vpop.f32.mrb[104].mxu1 }
 0xd77   : > { %v4959_v17 = vpop.f32.mrb[105].mxu1  ;;  %v3226_v30 = vmul.f32 0.35355338, %v3216_v3 }
 0xd78   : > { %v3219_v52 = vpop.f32.mrb[106].mxu1 }
 0xd79   : > { %v4960_v58 = vpop.f32.mrb[107].mxu1  ;;  %v6588_v8 = vadd.f32 %v6527_v40, %v3226_v30 }
 0xd7b   : > { %v3244_v4 = vsel %vm1079_vm6, %v6588_v8, -inf }
 0xd7e   : > { %v3430_v0 = vpop.f32.mrb[108].mxu1 }
 0xd7f   : > { %v4987_v25 = vpop.f32.mrb[109].mxu1  ;;  %v3452_v39 = vmul.f32 0.35355338, %v3430_v0 }
 0xd80   : > { %v3433_v10 = vpop.f32.mrb[110].mxu1 }
 0xd81   : > { %v4988_v23 = vpop.f32.mrb[111].mxu1  ;;  %v3453_v37 = vmul.f32 0.35355338, %v3433_v10  ;;  %v6593_v56 = vadd.f32 %v6487_v47, %v3452_v39 }
 0xd83   : > { %v6598_v12 = vadd.f32 %v6495_v51, %v3453_v37  ;;  %v3462_v49 = vsel %vm1079_vm6, %v6593_v56, -inf }
 0xd85   : > { %v3465_v3 = vsel %vm1079_vm6, %v6598_v12, -inf }
 0xd86   : > { %v6555_v22 = vpop.f32.mrb[112].mxu1 }
 0xd87   : > { %v4991_v18 = vpop.f32.mrb[113].mxu1 }
 0xd88   : > { %v6557_v57 = vpop.f32.mrb[114].mxu1 }
 0xd89   : > { %v4992_v21 = vpop.f32.mrb[115].mxu1 }
 0xd8e   : > { %v6568_v31 = vpop.f32.mrb[116].mxu1 }
 0xd8f   : > { %3012 = vmax.xlane.f32.xlu1 %v3011_v27  ;;  %v4995_v2 = vpop.f32.mrb[117].mxu1 }
 0xd90   : > { %v3449_v55 = vpop.f32.mrb[118].mxu1 }
 0xd91   : > { %3015 = vmax.xlane.f32.xlu0 %v3014_v54  ;;  %v4996_v41 = vpop.f32.mrb[119].mxu1 }
 0xd93   : > { %3233 = vmax.xlane.f32.xlu1 %v3232_v48 }
 0xd95   : > { %3236 = vmax.xlane.f32.xlu0 %v3235_v32 }
 0xd97   : > { %3239 = vmax.xlane.f32.xlu1 %v3238_v62 }
 0xd99   : > { %3242 = vmax.xlane.f32.xlu0 %v3241_v11 }
 0xd9b   : > { %3245 = vmax.xlane.f32.xlu1 %v3244_v4 }
 0xd9d   : > { %3463 = vmax.xlane.f32.xlu0 %v3462_v49 }
 0xd9f   : > { %3466 = vmax.xlane.f32.xlu1 %v3465_v3 }
 0xdb0   : > { %3290 = vrot.lane.b32.xlu1 %v6363_v35, %s7100_s5 }
 0xdc9   : > { %v2774_v47 = vpop.xlane.xlu0 %2773 }
 0xdca   : > { %v2787_v17 = vsub.f32 %v6490_v6, %v2774_v47 }
 0xdcb   : > { %v2777_v51 = vpop.xlane.xlu1 %2776 }
 0xdcc   : > { %v2792_v52 = vmul.f32 1.442695, %v2787_v17  ;;  %v2788_v58 = vsub.f32 %v6498_v42, %v2777_v51 }
 0xdce   : > { %5313 = vpow2.f32 %v2792_v52  ;;  %v2794_v0 = vmul.f32 1.442695, %v2788_v58 }
 0xdd0   : > { %5315 = vpow2.f32 %v2794_v0 }
 0xdd1   : > { %v2780_v25 = vpop.xlane.xlu0 %2779 }
 0xdd2   : > { %v2789_v10 = vsub.f32 %v6510_v16, %v2780_v25 }
 0xdd4   : > { %v2796_v23 = vmul.f32 1.442695, %v2789_v10 }
 0xdd5   : > { %v2783_v19 = vpop.xlane.xlu0 %2782 }
 0xdd6   : > { %5317 = vpow2.f32 %v2796_v23  ;;  %v2790_v18 = vsub.f32 %v6518_v14, %v2783_v19 }
 0xdd8   : > { %v6612_v59 = vpop.eup %5313  ;;  %v2798_v21 = vmul.f32 1.442695, %v2790_v18 }
 0xdd9   : > { %v2786_v50 = vpop.xlane.xlu1 %2785  ;;  %v2802_v6 = vsel %vm1079_vm6, %v6612_v59, 0.0 }
 0xdda   : > { %v6616_v45 = vpop.eup %5315  ;;  %5319 = vpow2.f32 %v2798_v21  ;;  %v2791_v42 = vsub.f32 %v6530_v60, %v2786_v50  ;;  %2803 = vadd.xlane.f32.xlu0 %v2802_v6 }
 0xddb   : > { %v2805_v16 = vsel %vm1079_vm6, %v6616_v45, 0.0 }
 0xddc   : > { %v2800_v28 = vmul.f32 1.442695, %v2791_v42  ;;  %2806 = vadd.xlane.f32.xlu1 %v2805_v16 }
 0xdde   : > { %5321 = vpow2.f32 %v2800_v28 }
 0xde0   : > { %v6621_v14 = vpop.eup %5317 }
 0xde1   : > { %v3004_v27 = vpop.xlane.xlu0 %3003  ;;  %v2808_v2 = vsel %vm1079_vm6, %v6621_v14, 0.0 }
 0xde2   : > { %v3017_v24 = vsub.f32 %v6535_v43, %v3004_v27  ;;  %2809 = vadd.xlane.f32.xlu0 %v2808_v2 }
 0xde3   : > { %v3007_v55 = vpop.xlane.xlu1 %3006 }
 0xde4   : > { %v6626_v54 = vpop.eup %5319  ;;  %v3022_v60 = vmul.f32 1.442695, %v3017_v24  ;;  %v3018_v41 = vsub.f32 %v6538_v34, %v3007_v55 }
 0xde5   : > { %v2811_v30 = vsel %vm1079_vm6, %v6626_v54, 0.0 }
 0xde6   : > { %5323 = vpow2.f32 %v3022_v60  ;;  %v3024_v48 = vmul.f32 1.442695, %v3018_v41  ;;  %2812 = vadd.xlane.f32.xlu1 %v2811_v30 }
 0xde7   : > { %v6648_v47 = vpop.permute.xlu1 %3062 }
 0xde8   : > { %v6631_v39 = vpop.eup %5321  ;;  %5325 = vpow2.f32 %v3024_v48 }
 0xde9   : > { %v3010_v32 = vpop.xlane.xlu0 %3009  ;;  %v2814_v43 = vsel %vm1079_vm6, %v6631_v39, 0.0 }
 0xdea   : > { %v3019_v37 = vsub.f32 %v6545_v7, %v3010_v32  ;;  %2815 = vadd.xlane.f32.xlu0 %v2814_v43 }
 0xdeb   : > { %v6650_v17 = vpop.permute.xlu1 %3064 }
 0xdec   : > { %v3026_v62 = vmul.f32 1.442695, %v3019_v37 }
 0xdee   : > { %5327 = vpow2.f32 %v3026_v62 }
 0xdf0   : > { %v6636_v11 = vpop.eup %5323 }
 0xdf1   : > { %v3032_v34 = vsel %vm1079_vm6, %v6636_v11, 0.0 }
 0xdf2   : > { %v6640_v4 = vpop.eup %5325  ;;  %3033 = vadd.xlane.f32.xlu1 %v3032_v34 }
 0xdf3   : > { %v3035_v49 = vsel %vm1079_vm6, %v6640_v4, 0.0 }
 0xdf4   : > { %3036 = vadd.xlane.f32.xlu0 %v3035_v49 }
 0xdf8   : > { %v6644_v3 = vpop.eup %5327 }
 0xdf9   : > { %v3038_v7 = vsel %vm1079_vm6, %v6644_v3, 0.0 }
 0xdfa   : > { %3039 = vadd.xlane.f32.xlu0 %v3038_v7 }
 0xe1c   : > { %v3013_v51 = vpop.xlane.xlu1 %3012 }
 0xe1d   : > { %v3020_v52 = vsub.f32 %v6560_v29, %v3013_v51  ;;  %v6662_v29 = vpop.permute.xlu0 %3060 }
 0xe1f   : > { %v3028_v58 = vmul.f32 1.442695, %v3020_v52 }
 0xe20   : > { %v3234_v0 = vpop.xlane.xlu1 %3233 }
 0xe21   : > { %5329 = vpow2.f32 %v3028_v58  ;;  %v3247_v25 = vsub.f32 %v6566_v26, %v3234_v0  ;;  %v3016_v50 = vpop.xlane.xlu0 %3015 }
 0xe22   : > { %v3021_v42 = vsub.f32 %v6563_v1, %v3016_v50 }
 0xe23   : > { %v3252_v10 = vmul.f32 1.442695, %v3247_v25 }
 0xe24   : > { %v3030_v27 = vmul.f32 1.442695, %v3021_v42  ;;  %v3240_v2 = vpop.xlane.xlu1 %3239 }
 0xe25   : > { %5331 = vpow2.f32 %v3252_v10  ;;  %v3237_v6 = vpop.xlane.xlu0 %3236  ;;  %v3249_v60 = vsub.f32 %v6578_v9, %v3240_v2 }
 0xe26   : > { %v3248_v28 = vsub.f32 %v6573_v36, %v3237_v6  ;;  %5333 = vpow2.f32 %v3030_v27 }
 0xe27   : > { %v3256_v48 = vmul.f32 1.442695, %v3249_v60 }
 0xe28   : > { %v3254_v55 = vmul.f32 1.442695, %v3248_v28  ;;  %v3246_v30 = vpop.xlane.xlu1 %3245 }
 0xe29   : > { %v3243_v26 = vpop.xlane.xlu0 %3242  ;;  %v3251_v43 = vsub.f32 %v6588_v8, %v3246_v30 }
 0xe2a   : > { %5335 = vpow2.f32 %v3254_v55  ;;  %v3250_v32 = vsub.f32 %v6583_v5, %v3243_v26 }
 0xe2b   : > { %v6654_v23 = vpop.eup %5329  ;;  %v3260_v62 = vmul.f32 1.442695, %v3251_v43 }
 0xe2c   : > { %v3041_v19 = vsel %vm1079_vm6, %v6654_v23, 0.0  ;;  %v3258_v1 = vmul.f32 1.442695, %v3250_v32  ;;  %v3467_v36 = vpop.xlane.xlu1 %3466 }
 0xe2d   : > { %3042 = vadd.xlane.f32.xlu0 %v3041_v19  ;;  %v3464_v16 = vpop.xlane.xlu0 %3463 }
 0xe2e   : > { %v3477_v24 = vsub.f32 %v6593_v56, %v3464_v16  ;;  %v3478_v56 = vsub.f32 %v6598_v12, %v3467_v36  ;;  %v3456_v36 = vmul.f32 0.35355338, %v6568_v31 }
 0xe2f   : > { %v6658_v18 = vpop.eup %5331 }
 0xe30   : > { %v3262_v21 = vsel %vm1079_vm6, %v6658_v18, 0.0  ;;  %v3482_v41 = vmul.f32 1.442695, %v3477_v24  ;;  %v6674_v37 = vpop.eup %5333  ;;  %v3484_v5 = vmul.f32 1.442695, %v3478_v56  ;;  %v6683_v7 = vpop.permute.xlu1 %3290 }
 0xe31   : > { %3263 = vadd.xlane.f32.xlu1 %v3262_v21  ;;  %v3044_v9 = vsel %vm1079_vm6, %v6674_v37, 0.0  ;;  %v3455_v56 = vmul.f32 0.35355338, %v6557_v57 }
 0xe32   : > { %5337 = vpow2.f32 %v3482_v41 }
 0xe33   : > { %5339 = vpow2.f32 %v3256_v48 }
 0xe34   : > { %5341 = vpow2.f32 %v3258_v1  ;;  %v6677_v34 = vpop.eup %5335 }
 0xe35   : > { %5343 = vpow2.f32 %v3260_v62  ;;  %v3265_v8 = vsel %vm1079_vm6, %v6677_v34, 0.0 }
 0xe36   : > { %5345 = vpow2.f32 %v3484_v5 }
 0xe3c   : > { %v6681_v49 = vpop.eup %5337 }
 0xe3d   : > { %v3492_v12 = vsel %vm1079_vm6, %v6681_v49, 0.0  ;;  %v6689_v51 = vpop.eup %5339 }
 0xe3e   : > { %v3268_v0 = vsel %vm1079_vm6, %v6689_v51, 0.0  ;;  %v6693_v25 = vpop.eup %5341 }
 0xe3f   : > { %v3271_v10 = vsel %vm1079_vm6, %v6693_v25, 0.0  ;;  %v6697_v19 = vpop.eup %5343 }
 0xe40   : > { %v6699_v50 = vpop.eup %5345  ;;  %v3274_v6 = vsel %vm1079_vm6, %v6697_v19, 0.0 }
 0xe41   : > { %v3495_v2 = vsel %vm1079_vm6, %v6699_v50, 0.0 }
 0xe42   : > { %3294 = vrot.lane.b32.xlu1 %v6373_v20, %s7100_s5 }
 0xe43   : > { %3292 = vrot.lane.b32.xlu0 %v6369_v33, %s7100_s5  ;;  %s7103_s5 = smov 16  }
 0xe62   : > { %3045 = vadd.xlane.f32.xlu0 %v3044_v9 }
 0xe66   : > { %3266 = vadd.xlane.f32.xlu0 %v3265_v8  ;;  %3493 = vadd.xlane.f32.xlu1 %v3492_v12 }
 0xe67   : > { %v2804_v52 = vpop.xlane.xlu0 %2803 }
 0xe68   : > { %5347 = vrcp.f32 %v2804_v52 }
 0xe69   : > { %v2807_v58 = vpop.xlane.xlu1 %2806 }
 0xe6a   : > { %5349 = vrcp.f32 %v2807_v58  ;;  %3269 = vadd.xlane.f32.xlu0 %v3268_v0 }
 0xe6e   : > { %3272 = vadd.xlane.f32.xlu0 %v3271_v10 }
 0xe6f   : > { %v2810_v21 = vpop.xlane.xlu0 %2809 }
 0xe70   : > { %5351 = vrcp.f32 %v2810_v21 }
 0xe72   : > { %v5348_v26 = vpop.eup %5347  ;;  %3275 = vadd.xlane.f32.xlu0 %v3274_v6 }
 0xe73   : > { %v2813_v42 = vpop.xlane.xlu1 %2812  ;;  %v2822_v28 = vmul.f32 %v5348_v26, %v6612_v59 }
 0xe74   : > { %v5350_v16 = vpop.eup %5349  ;;  %5353 = vrcp.f32 %v2813_v42 }
 0xe75   : > { %v2823_v27 = vmul.f32 %v5350_v16, %v6616_v45 }
 0xe76   : > { %3496 = vadd.xlane.f32.xlu0 %v3495_v2 }
 0xe77   : > { %v2827_v24 = vpack.c.bf16 %v2823_v27, %v2822_v28  ;;  %3522 = vrot.lane.b32.xlu1 %v6369_v33, %s7101_s29  ;;  %v2816_v55 = vpop.xlane.xlu0 %2815 }
 0xe78   : > { %5355 = vrcp.f32 %v2816_v55 }
 0xe79   : > { %4896 = vmatmul.mubr.msk.bf16.vlgmr.msra.gmra.mrb[88].mxu0 %vm1079_vm6, %v2827_v24 }
 0xe7a   : > { %4926 = vmatpush3.bf16.msra.mxu0 %v6662_v29  ;;  %4899 = vmatprep.mubr.msk.bf16.mxu0 %vm5430_vm3, %v5429_v38  ;;  %v5352_v59 = vpop.eup %5351  ;;  %v3078_v29 = vsel %vm1155_vm5, %v6650_v17, 0 }
 0xe7b   : > { %3524 = vrot.lane.b32.xlu1 %v6373_v20, %s7101_s29  ;;  %4927 = vmatprep.subr.bf16.mxu0 %v5429_v38  ;;  %v2824_v33 = vmul.f32 %v5352_v59, %v6621_v14 }
 0xe7e   : > { %v5354_v45 = vpop.eup %5353  ;;  %4928 = vmatpush3.bf16.msra.mxu0 %v6648_v47 }
 0xe7f   : > { %v3034_v60 = vpop.xlane.xlu1 %3033  ;;  %4929 = vmatprep.subr.bf16.mxu0 %v5429_v38  ;;  %v2825_v41 = vmul.f32 %v5354_v45, %v6626_v54 }
 0xe80   : > { %5357 = vrcp.f32 %v3034_v60 }
 0xe81   : > { %v3037_v30 = vpop.xlane.xlu0 %3036  ;;  %v2828_v48 = vpack.c.bf16 %v2825_v41, %v2824_v33 }
 0xe82   : > { %v5356_v20 = vpop.eup %5355  ;;  %4930 = vmatpush3.bf16.msra.mxu0 %v3078_v29  ;;  %5359 = vrcp.f32 %v3037_v30 }
 0xe83   : > { %4900 = vmatmul.mubr.msk.bf16.gmra.mrb[92].mxu0 %vm1079_vm6, %v2828_v48  ;;  %4961 = vmatprep.subr.bf16.mxu0 %v5429_v38  ;;  %v2826_v14 = vmul.f32 %v5356_v20, %v6631_v39  ;;  %v3454_v39 = vmul.f32 0.35355338, %v6555_v22  ;;  %v6753_v22 = vadd.f32 %v6515_v46, %v3455_v56 }
 0xe84   : > { %4903 = vmatprep.mubr.msk.bf16.mxu0 %vm5430_vm3, %v5429_v38 }
 0xe85   : > { %v2829_v47 = vpack.c.bf16 %v2826_v14, %v2826_v14 }
 0xe87   : > { %v3040_v31 = vpop.xlane.xlu0 %3039 }
 0xe88   : > { %5361 = vrcp.f32 %v3040_v31 }
 0xe8a   : > { %v5358_v54 = vpop.eup %5357 }
 0xe8b   : > { %4904 = vmatmul.mubr.msk.bf16.gmra.mrb[96].mxu0 %vm1079_vm6, %v2829_v47  ;;  %v3052_v1 = vmul.f32 %v5358_v54, %v6636_v11 }
 0xe8c   : > { %v5360_v17 = vpop.eup %5359  ;;  %3520 = vrot.lane.b32.xlu0 %v6363_v35, %s7101_s29  ;;  %4931 = vmatprep.mubr.msk.bf16.mxu0 %vm5430_vm3, %v5429_v38  ;;  %v6741_v35 = vadd.f32 %v6507_v15, %v3454_v39  ;;  %v3471_v15 = vsel %vm1079_vm6, %v6753_v22, -inf  ;;  %s7104_s29 = smov 24  }
 0xe8d   : > { %v3053_v32 = vmul.f32 %v5360_v17, %v6640_v4  ;;  %v6745_v4 = vadd.f32 %v6527_v40, %v3456_v36 }
 0xe8e   : > { %v3468_v11 = vsel %vm1079_vm6, %v6741_v35, -inf }
 0xe8f   : > { %v3057_v43 = vpack.c.bf16 %v3053_v32, %v3052_v1  ;;  %v3474_v62 = vsel %vm1079_vm6, %v6745_v4, -inf }
 0xe93   : > { %4932 = vmatmul.mubr.msk.bf16.vlgmr.msra.gmra.mrb[100].mxu0 %vm1079_vm6, %v3057_v43 }
 0xe94   : > { %4962 = vmatpush3.bf16.msra.mxu0 %v6683_v7  ;;  %4935 = vmatprep.mubr.msk.bf16.mxu0 %vm5430_vm3, %v5429_v38  ;;  %v5362_v7 = vpop.eup %5361 }
 0xe95   : > { %4963 = vmatprep.subr.bf16.mxu0 %v5429_v38  ;;  %v3054_v12 = vmul.f32 %v5362_v7, %v6644_v3 }
 0xe9f   : > { %3469 = vmax.xlane.f32.xlu1 %v3468_v11 }
 0xea3   : > { %3475 = vmax.xlane.f32.xlu1 %v3474_v62 }
 0xeab   : > { %3472 = vmax.xlane.f32.xlu0 %v3471_v15 }
 0xeba   : > { %v3043_v40 = vpop.xlane.xlu0 %3042 }
 0xebb   : > { %5363 = vrcp.f32 %v3043_v40 }
 0xebe   : > { %v3264_v9 = vpop.xlane.xlu1 %3263  ;;  %v3293_v5 = vpop.permute.xlu0 %3292 }
 0xebf   : > { %4964 = vmatpush3.bf16.msra.mxu0 %v3293_v5 }
 0xec0   : > { %4965 = vmatprep.subr.bf16.mxu0 %v5429_v38 }
 0xec2   : > { %v3295_v57 = vpop.permute.xlu1 %3294 }
 0xec3   : > { %v3308_v8 = vsel %vm1155_vm5, %v3295_v57, 0 }
 0xec4   : > { %4966 = vmatpush3.bf16.msra.mxu0 %v3308_v8 }
 0xec5   : > { %v5364_v46 = vpop.eup %5363  ;;  %4997 = vmatprep.subr.bf16.mxu0 %v5429_v38 }
 0xec6   : > { %v3055_v52 = vmul.f32 %v5364_v46, %v6654_v23 }
 0xec8   : > { %v3058_v58 = vpack.c.bf16 %v3055_v52, %v3054_v12 }
 0xeca   : > { %4936 = vmatmul.mubr.msk.bf16.gmra.mrb[104].mxu0 %vm1079_vm6, %v3058_v58 }
 0xecb   : > { %4939 = vmatprep.mubr.msk.bf16.mxu0 %vm5430_vm3, %v5429_v38 }
 0xeef   : > { %v3046_v0 = vpop.xlane.xlu0 %3045 }
 0xef0   : > { %5365 = vrcp.f32 %v3046_v0 }
 0xef3   : > { %v3267_v10 = vpop.xlane.xlu0 %3266  ;;  %v3494_v27 = vpop.xlane.xlu1 %3493 }
 0xef4   : > { %5367 = vrcp.f32 %v3267_v10 }
 0xef5   : > { %5369 = vrcp.f32 %v3264_v9 }
 0xef7   : > { %v3270_v21 = vpop.xlane.xlu0 %3269  ;;  %v3523_v45 = vpop.permute.xlu1 %3522 }
 0xefa   : > { %v5366_v6 = vpop.eup %5365 }
 0xefb   : > { %v3273_v26 = vpop.xlane.xlu0 %3272  ;;  %v3056_v42 = vmul.f32 %v5366_v6, %v6674_v37 }
 0xefc   : > { %5371 = vrcp.f32 %v3273_v26 }
 0xefd   : > { %v3059_v3 = vpack.c.bf16 %v3056_v42, %v3056_v42  ;;  %5373 = vrcp.f32 %v3270_v21 }
 0xefe   : > { %v5368_v23 = vpop.eup %5367 }
 0xeff   : > { %4940 = vmatmul.mubr.msk.bf16.gmra.mrb[108].mxu0 %vm1079_vm6, %v3059_v3  ;;  %v3276_v16 = vpop.xlane.xlu0 %3275  ;;  %v5370_v28 = vpop.eup %5369  ;;  %v3283_v2 = vmul.f32 %v5368_v23, %v6677_v34 }
 0xf00   : > { %4967 = vmatprep.mubr.msk.bf16.mxu0 %vm5430_vm3, %v5429_v38  ;;  %v3282_v24 = vmul.f32 %v5370_v28, %v6658_v18  ;;  %5375 = vrcp.f32 %v3276_v16  ;;  %v3525_v18 = vpop.permute.xlu1 %3524 }
 0xf01   : > { %v3538_v48 = vsel %vm1155_vm5, %v3525_v18, 0 }
 0xf02   : > { %v3287_v59 = vpack.c.bf16 %v3283_v2, %v3282_v24 }
 0xf03   : > { %v3497_v55 = vpop.xlane.xlu0 %3496 }
 0xf04   : > { %5377 = vrcp.f32 %v3497_v55 }
 0xf05   : > { %5379 = vrcp.f32 %v3494_v27 }
 0xf06   : > { %v5372_v37 = vpop.eup %5371 }
 0xf07   : > { %4968 = vmatmul.mubr.msk.bf16.vlgmr.msra.gmra.mrb[112].mxu0 %vm1079_vm6, %v3287_v59  ;;  %v3521_v60 = vpop.permute.xlu0 %3520  ;;  %v5374_v33 = vpop.eup %5373  ;;  %v3285_v41 = vmul.f32 %v5372_v37, %v6693_v25  ;;  %v5181_v37 = vld [vmem:[%s7033_s10 + $0x10] sm:$0xff]  }
 0xf08   : > { %4998 = vmatpush3.bf16.msra.mxu0 %v3521_v60  ;;  %4971 = vmatprep.mubr.msk.bf16.mxu0 %vm5430_vm3, %v5429_v38  ;;  %v3284_v34 = vmul.f32 %v5374_v33, %v6689_v51 }
 0xf09   : > { %4999 = vmatprep.subr.bf16.mxu0 %v5429_v38  ;;  %5016 = vmatpush3.bf16.msra.mxu1 %v5181_v37 }
 0xf0a   : > { %v3288_v29 = vpack.c.bf16 %v3285_v41, %v3284_v34  ;;  %v5376_v30 = vpop.eup %5375  ;;  %5017 = vmatprep.subr.bf16.mxu1 %v5429_v38 }
 0xf0b   : > { %v3286_v25 = vmul.f32 %v5376_v30, %v6697_v19 }
 0xf0c   : > { %5000 = vmatpush3.bf16.msra.mxu0 %v3523_v45 }
 0xf0d   : > { %5001 = vmatprep.subr.bf16.mxu0 %v5429_v38  ;;  %v3289_v51 = vpack.c.bf16 %v3286_v25, %v3286_v25 }
 0xf0e   : > { %v5378_v20 = vpop.eup %5377 }
 0xf0f   : > { %4972 = vmatmul.mubr.msk.bf16.gmra.mrb[116].mxu0 %vm1079_vm6, %v3288_v29  ;;  %v5380_v14 = vpop.eup %5379  ;;  %v3513_v47 = vmul.f32 %v5378_v20, %v6699_v50 }
 0xf10   : > { %5002 = vmatpush3.bf16.msra.mxu0 %v3538_v48  ;;  %4975 = vmatprep.mubr.msk.bf16.mxu0 %vm5430_vm3, %v5429_v38  ;;  %v3512_v54 = vmul.f32 %v5380_v14, %v6681_v49  ;;  %v5182_v48 = vld [vmem:[%s7033_s10 + $0x18] sm:$0xff]  }
 0xf11   : > { %5031 = vmatprep.subr.bf16.mxu0 %v5429_v38  ;;  %5018 = vmatpush3.bf16.msra.mxu1 %v5182_v48 }
 0xf12   : > { %v3517_v17 = vpack.c.bf16 %v3513_v47, %v3512_v54  ;;  %5047 = vmatprep.subr.bf16.mxu1 %v5429_v38 }
 0xf17   : > { %4976 = vmatmul.mubr.msk.bf16.gmra.mrb[120].mxu0 %vm1079_vm6, %v3289_v51 }
 0xf18   : > { %5003 = vmatprep.mubr.msk.bf16.mxu0 %vm5430_vm3, %v5429_v38 }
 0xf1f   : > { %5004 = vmatmul.mubr.msk.bf16.vlgmr.msra.gmra.mrb[124].mxu0 %vm1079_vm6, %v3517_v17 }
 0xf20   : > { %5007 = vmatprep.mubr.msk.bf16.mxu0 %vm5430_vm3, %v5429_v38 }
 0xf2c   : > { %v3470_v19 = vpop.xlane.xlu1 %3469 }
 0xf2d   : > { %v3479_v32 = vsub.f32 %v6741_v35, %v3470_v19 }
 0xf2f   : > { %v3486_v1 = vmul.f32 1.442695, %v3479_v32 }
 0xf30   : > { %v3476_v43 = vpop.xlane.xlu1 %3475 }
 0xf31   : > { %5381 = vpow2.f32 %v3486_v1  ;;  %v3481_v39 = vsub.f32 %v6745_v4, %v3476_v43 }
 0xf33   : > { %v3490_v36 = vmul.f32 1.442695, %v3481_v39 }
 0xf35   : > { %5383 = vpow2.f32 %v3490_v36 }
 0xf38   : > { %v3473_v11 = vpop.xlane.xlu0 %3472 }
 0xf39   : > { %v3480_v50 = vsub.f32 %v6753_v22, %v3473_v11 }
 0xf3b   : > { %v5382_v49 = vpop.eup %5381  ;;  %v3488_v56 = vmul.f32 1.442695, %v3480_v50 }
 0xf3c   : > { %v3498_v62 = vsel %vm1079_vm6, %v5382_v49, 0.0 }
 0xf3d   : > { %5385 = vpow2.f32 %v3488_v56  ;;  %3499 = vadd.xlane.f32.xlu1 %v3498_v62 }
 0xf3f   : > { %v6796_v15 = vpop.eup %5383 }
 0xf40   : > { %v3504_v35 = vsel %vm1079_vm6, %v6796_v15, 0.0 }
 0xf41   : > { %3505 = vadd.xlane.f32.xlu0 %v3504_v35 }
 0xf47   : > { %v5386_v31 = vpop.eup %5385 }
 0xf48   : > { %v3501_v4 = vsel %vm1079_vm6, %v5386_v31, 0.0 }
 0xf49   : > { %3502 = vadd.xlane.f32.xlu1 %v3501_v4 }
 0xf4c   : > { %v6801_v40 = vpop.f32.mrb[88].mxu0 }
 0xf4d   : > { %v4897_v9 = vpop.f32.mrb[89].mxu0 }
 0xf4e   : > { %v6803_v22 = vpop.f32.mrb[90].mxu0 }
 0xf4f   : > { %v4898_v5 = vpop.f32.mrb[91].mxu0 }
 0xf56   : > { %v6805_v57 = vpop.f32.mrb[92].mxu0 }
 0xf57   : > { %v4901_v7 = vpop.f32.mrb[93].mxu0 }
 0xf58   : > { %v6807_v8 = vpop.f32.mrb[94].mxu0 }
 0xf59   : > { %v4902_v46 = vpop.f32.mrb[95].mxu0 }
 0xf5e   : > { %v6809_v12 = vpop.f32.mrb[96].mxu0 }
 0xf5f   : > { %v4905_v52 = vpop.f32.mrb[97].mxu0 }
 0xf60   : > { %v2903_v58 = vpop.f32.mrb[98].mxu0 }
 0xf61   : > { %v4906_v0 = vpop.f32.mrb[99].mxu0 }
 0xf66   : > { %v3114_v10 = vpop.f32.mrb[100].mxu0 }
 0xf67   : > { %v4933_v21 = vpop.f32.mrb[101].mxu0 }
 0xf68   : > { %v3117_v6 = vpop.f32.mrb[102].mxu0 }
 0xf69   : > { %v5132_v26 = vpack.i.bf16 %v3117_v6, %v3114_v10  ;;  %v4934_v42 = vpop.f32.mrb[103].mxu0 }
 0xf6b   : > { %5133 = vrot.lane.b32.xlu1 %v5132_v26, %s7102_s30 }
 0xf9d   : > { %v3122_v3 = vpop.f32.mrb[104].mxu0 }
 0xf9e   : > { %v4937_v23 = vpop.f32.mrb[105].mxu0 }
 0xf9f   : > { %v3125_v16 = vpop.f32.mrb[106].mxu0 }
 0xfa0   : > { %v5147_v28 = vpack.i.bf16 %v3125_v16, %v3122_v3  ;;  %v4938_v27 = vpop.f32.mrb[107].mxu0 }
 0xfca   : > { %v3500_v2 = vpop.xlane.xlu1 %3499 }
 0xfcb   : > { %5387 = vrcp.f32 %v3500_v2 }
 0xfce   : > { %v3506_v33 = vpop.xlane.xlu0 %3505 }
 0xfd2   : > { %v3130_v24 = vpop.f32.mrb[108].mxu0 }
 0xfd3   : > { %v4941_v55 = vpop.f32.mrb[109].mxu0 }
 0xfd4   : > { %v3133_v59 = vpop.f32.mrb[110].mxu0 }
 0xfd5   : > { %v4942_v45 = vpop.f32.mrb[111].mxu0  ;;  %v5388_v25 = vpop.eup %5387 }
 0xfd6   : > { %v3503_v60 = vpop.xlane.xlu1 %3502  ;;  %v3514_v14 = vmul.f32 %v5388_v25, %v5382_v49 }
 0xfd7   : > { %5389 = vrcp.f32 %v3503_v60 }
 0xfd8   : > { %5391 = vrcp.f32 %v3506_v33 }
 0xfda   : > { %v3344_v41 = vpop.f32.mrb[112].mxu0 }
 0xfdb   : > { %v4969_v34 = vpop.f32.mrb[113].mxu0 }
 0xfdc   : > { %v3347_v18 = vpop.f32.mrb[114].mxu0 }
 0xfdd   : > { %v5137_v29 = vpack.i.bf16 %v3347_v18, %v3344_v41  ;;  %v4970_v30 = vpop.f32.mrb[115].mxu0 }
 0xfdf   : > { %5138 = vrot.lane.b32.xlu0 %v5137_v29, %s7103_s5 }
 0xfe1   : > { %v5390_v51 = vpop.eup %5389 }
 0xfe2   : > { %v3352_v20 = vpop.f32.mrb[116].mxu0  ;;  %v3515_v47 = vmul.f32 %v5390_v51, %v5386_v31  ;;  %v5392_v32 = vpop.eup %5391 }
 0xfe3   : > { %v4973_v54 = vpop.f32.mrb[117].mxu0  ;;  %v3516_v39 = vmul.f32 %v5392_v32, %v6796_v15  ;;  %v5134_v15 = vpop.permute.xlu1 %5133 }
 0xfe4   : > { %v3355_v17 = vpop.f32.mrb[118].mxu0  ;;  %v3518_v19 = vpack.c.bf16 %v3515_v47, %v3514_v14  ;;  %v5136_v7 = vunpack.i.h.bf16 %v5134_v15  ;;  %v5135_v46 = vunpack.i.l.bf16 %v5134_v15 }
 0xfe5   : > { %v5152_v1 = vpack.i.bf16 %v3355_v17, %v3352_v20  ;;  %v4974_v43 = vpop.f32.mrb[119].mxu0  ;;  %v3519_v49 = vpack.c.bf16 %v3516_v39, %v3516_v39 }
 0xfe6   : > { %5008 = vmatmul.mubr.msk.bf16.gmra.mrb[128].mxu0 %vm1079_vm6, %v3518_v19  ;;  %v3657_v10 = vsel %vm994_vm4, %v6803_v22, %v5136_v7  ;;  %v3656_v21 = vsel %vm994_vm4, %v6801_v40, %v5135_v46 }
 0xfe7   : > { %5153 = vrot.lane.b32.xlu0 %v5152_v1, %s7103_s5  ;;  %5011 = vmatprep.mubr.msk.bf16.mxu0 %vm5430_vm3, %v5429_v38 }
 0xfea   : > { %v3360_v36 = vpop.f32.mrb[120].mxu0 }
 0xfeb   : > { %3609 = vrot.lane.b32.xlu0 %v3130_v24, %s7102_s30  ;;  %v4977_v11 = vpop.f32.mrb[121].mxu0 }
 0xfec   : > { %v3363_v50 = vpop.f32.mrb[122].mxu0 }
 0xfed   : > { %v4978_v56 = vpop.f32.mrb[123].mxu0  ;;  %v6872_v50 = vld [vmem:[%s7035_s12 + $0x1] ss:$0 sm:$0xff] }
 0xfee   : > { %5012 = vmatmul.mubr.msk.bf16.gmra.mrb[132].mxu0 %vm1079_vm6, %v3519_v49 }
 0xfef   : > { %5035 = vmatprep.mubr.msk.bf16.mxu0 %vm5430_vm3, %v5429_v38 }
 0xff2   : > { %v3574_v62 = vpop.f32.mrb[124].mxu0 }
 0xff3   : > { %v5005_v35 = vpop.f32.mrb[125].mxu0 }
 0xff4   : > { %v3577_v31 = vpop.f32.mrb[126].mxu0 }
 0xff5   : > { %v5142_v4 = vpack.i.bf16 %v3577_v31, %v3574_v62  ;;  %v5006_v9 = vpop.f32.mrb[127].mxu0 }
 0xff7   : > { %5143 = vrot.lane.b32.xlu1 %v5142_v4, %s7104_s29 }
 0xffb   : > { %5148 = vrot.lane.b32.xlu1 %v5147_v28, %s7102_s30  ;;  %s5445_s30 = smov 32  }
0x1051   : > { %v5139_v5 = vpop.permute.xlu0 %5138 }
0x1052   : > { %v5141_v52 = vunpack.i.h.bf16 %v5139_v5  ;;  %v5140_v58 = vunpack.i.l.bf16 %v5139_v5 }
0x1054   : > { %v3662_v42 = vsel %vm1970_vm7, %v3657_v10, %v5141_v52  ;;  %v3661_v3 = vsel %vm1970_vm7, %v3656_v21, %v5140_v58  ;;  %v5184_v10 = vld [vmem:[%s7038_s15 + $0x18] sm:$0xff]  }
0x1059   : > { %v5154_v34 = vpop.permute.xlu0 %5153 }
0x105a   : > { %v5156_v30 = vunpack.i.h.bf16 %v5154_v34  ;;  %v5155_v48 = vunpack.i.l.bf16 %v5154_v34 }
0x105d   : > { %v3610_v14 = vpop.permute.xlu0 %3609 }
0x1069   : > { %v5144_v0 = vpop.permute.xlu1 %5143 }
0x106a   : > { %v5146_v6 = vunpack.i.h.bf16 %v5144_v0  ;;  %v5145_v26 = vunpack.i.l.bf16 %v5144_v0 }
0x106c   : > { %v3667_v23 = vsel %vm1976_vm8, %v3662_v42, %v5146_v6  ;;  %v3666_v16 = vsel %vm1976_vm8, %v3661_v3, %v5145_v26 }
0x106d   : > { %v3671_v28 = vpack.c.bf16 %v3667_v23, %v3666_v16  ;;  %v5149_v60 = vpop.permute.xlu1 %5148 }
0x106e   : > { %v5151_v33 = vunpack.i.h.bf16 %v5149_v60  ;;  %v5150_v41 = vunpack.i.l.bf16 %v5149_v60 }
0x106f   : > { %5020 = vmatmul.mubr.msk.bf16.vlgmr.msra.gmra.mrb[120].mxu1 %vm787_vm1, %v3671_v28 }
0x1070   : > { %5023 = vmatprep.mubr.msk.bf16.mxu1 %vm5430_vm3, %v5429_v38  ;;  %v3659_v18 = vsel %vm994_vm4, %v6807_v8, %v5151_v33  ;;  %v3658_v29 = vsel %vm994_vm4, %v6805_v57, %v5150_v41  ;;  %v3660_v8 = vsel %vm994_vm4, %v6809_v12, %v3610_v14  ;;  %v6867_v12 = vld [vmem:[%s7034_s11 + $0x1] ss:$0 sm:$0xff] }
0x1071   : > { %v3663_v47 = vsel %vm1970_vm7, %v3658_v29, %v5155_v48  ;;  %v3664_v54 = vsel %vm1970_vm7, %v3659_v18, %v5156_v30  ;;  %v6899_v33 = vld [vmem:[%s7036_s13 + $0x1] ss:$0 sm:$0xff] }
0x1072   : > { %v6906_v48 = vld [vmem:[%s7037_s14 + $0x1] ss:$0 sm:$0xff] }
0x10b9   : > { %v3582_v22 = vpop.f32.mrb[128].mxu0 }
0x10ba   : > { %v5009_v27 = vpop.f32.mrb[129].mxu0 }
0x10bb   : > { %v3585_v2 = vpop.f32.mrb[130].mxu0 }
0x10bc   : > { %v5157_v40 = vpack.i.bf16 %v3585_v2, %v3582_v22  ;;  %v5010_v24 = vpop.f32.mrb[131].mxu0 }
0x10be   : > { %5158 = vrot.lane.b32.xlu1 %v5157_v40, %s7104_s29 }
0x10c1   : > { %v3590_v55 = vpop.f32.mrb[132].mxu0 }
0x10c2   : > { %3629 = vrot.lane.b32.xlu1 %v3360_v36, %s7103_s5  ;;  %3649 = vrot.lane.b32.xlu0 %v3590_v55, %s7104_s29  ;;  %v5013_v59 = vpop.f32.mrb[133].mxu0 }
0x10c3   : > { %v3593_v37 = vpop.f32.mrb[134].mxu0 }
0x10c4   : > { %v5014_v45 = vpop.f32.mrb[135].mxu0 }
0x1130   : > { %v5159_v25 = vpop.permute.xlu1 %5158 }
0x1131   : > { %v5161_v51 = vunpack.i.h.bf16 %v5159_v25  ;;  %v5160_v20 = vunpack.i.l.bf16 %v5159_v25 }
0x1133   : > { %v3669_v17 = vsel %vm1976_vm8, %v3664_v54, %v5161_v51  ;;  %v3668_v19 = vsel %vm1976_vm8, %v3663_v47, %v5160_v20 }
0x1134   : > { %v3672_v32 = vpack.c.bf16 %v3669_v17, %v3668_v19  ;;  %v3630_v1 = vpop.permute.xlu1 %3629  ;;  %v3650_v43 = vpop.permute.xlu0 %3649 }
0x1135   : > { %v3665_v57 = vsel %vm1970_vm7, %v3660_v8, %v3630_v1 }
0x1136   : > { %5024 = vmatmul.mubr.msk.bf16.gmra.mrb[124].mxu1 %vm787_vm1, %v3672_v32  ;;  %v3670_v39 = vsel %vm1976_vm8, %v3665_v57, %v3650_v43 }
0x1137   : > { %5027 = vmatprep.mubr.msk.bf16.mxu1 %vm5430_vm3, %v5429_v38  ;;  %v3673_v36 = vpack.c.bf16 %v3670_v39, %v3670_v39 }
0x113e   : > { %5028 = vmatmul.mubr.msk.bf16.gmra.mrb[128].mxu1 %vm787_vm1, %v3673_v36 }
0x113f   : > { %5063 = vmatprep.mubr.msk.bf16.mxu1 %vm5430_vm3, %v5429_v38 }
0x1142   : > { %v3742_v11 = vpop.f32.mrb[120].mxu1 }
0x1143   : > { %v3743_v49 = vadd.f32 %v6867_v12, %v3742_v11  ;;  %v5021_v56 = vpop.f32.mrb[121].mxu1 }
0x1144   : > { %v3745_v62 = vpop.f32.mrb[122].mxu1 }
0x1145   : > { %v3772_v35 = vmul.f32 %v6872_v50, %v3743_v49  ;;  %v3746_v31 = vadd.f32 %v6867_v12, %v3745_v62  ;;  %v5022_v4 = vpop.f32.mrb[123].mxu1 }
0x1147   : > { %v6878_v9 = vadd.f32 %v3772_v35, %v6293_v44  ;;  %v3773_v15 = vmul.f32 %v6872_v50, %v3746_v31 }
0x1149   : > { %v3778_v5 = vadd.f32 %v3773_v15, %v6296_v63  ;;  %v3786_v7 = vsel %vm787_vm1, %v6878_v9, 0.0  ;;  %v3806_v58 = vmul.f32 %v6878_v9, %v6878_v9  ;;  %v5183_v63 = vld [vmem:[%s7038_s15 + $0x10] sm:$0xff]  }
0x114a   : > { %3787 = vadd.xlane.f32.xlu1 %v3786_v7  ;;  %5032 = vmatpush3.bf16.msra.mxu0 %v5183_v63  ;;  %v5190_v63 = vld [vmem:[%s7040_s17 + $0x68] sm:$0xff]  }
0x114b   : > { %v3789_v46 = vsel %vm787_vm1, %v3778_v5, 0.0  ;;  %v3807_v52 = vmul.f32 %v3778_v5, %v3778_v5  ;;  %v3811_v44 = vsel %vm787_vm1, %v3806_v58, 0.0  ;;  %5033 = vmatprep.subr.bf16.mxu0 %v5429_v38  ;;  %v5187_v58 = vld [vmem:[%s7040_s17 + $0x50] sm:$0xff]  }
0x114c   : > { %3790 = vadd.xlane.f32.xlu0 %v3789_v46 }
0x114d   : > { %v3814_v0 = vsel %vm787_vm1, %v3807_v52, 0.0 }
0x114e   : > { %3815 = vadd.xlane.f32.xlu1 %v3814_v0  ;;  %5034 = vmatpush3.bf16.msra.mxu0 %v5184_v10  ;;  %v5188_v0 = vld [vmem:[%s7040_s17 + $0x58] sm:$0xff]   ;;  %v5191_v10 = vld [vmem:[%s7040_s17 + $0x70] sm:$0xff]  }
0x1150   : > { %3812 = vadd.xlane.f32.xlu0 %v3811_v44  ;;  %v5189_v44 = vld [vmem:[%s7040_s17 + $0x60] sm:$0xff]  }
0x11d7   : > { %v3788_v21 = vpop.xlane.xlu1 %3787 }
0x11d8   : > { %v3801_v26 = vmul.f32 0.03125, %v3788_v21  ;;  %v5192_v21 = vld [vmem:[%s7040_s17 + $0x78] sm:$0xff]  }
0x11d9   : > { %v3791_v6 = vpop.xlane.xlu0 %3790 }
0x11da   : > { %v3802_v42 = vmul.f32 0.03125, %v3791_v6  ;;  %v3831_v22 = vmul.f32 %v3801_v26, %v3801_v26  ;;  %v3846_v41 = vsub.f32 %v6878_v9, %v3801_v26 }
0x11db   : > { %v3816_v3 = vpop.xlane.xlu1 %3815 }
0x11dc   : > { %v3832_v23 = vmul.f32 %v3802_v42, %v3802_v42  ;;  %v3827_v16 = vmul.f32 0.03125, %v3816_v3  ;;  %v3847_v45 = vsub.f32 %v3778_v5, %v3802_v42 }
0x11dd   : > { %v3813_v28 = vpop.xlane.xlu0 %3812 }
0x11de   : > { %v3837_v27 = vsub.f32 %v3827_v16, %v3832_v23  ;;  %v3826_v2 = vmul.f32 0.03125, %v3813_v28 }
0x11e0   : > { %v3842_v40 = vmax.f32 %v3837_v27, 0.0  ;;  %v3836_v24 = vsub.f32 %v3826_v2, %v3831_v22 }
0x11e2   : > { %v3852_v55 = vadd.f32 1e-06, %v3842_v40  ;;  %v3841_v59 = vmax.f32 %v3836_v24, 0.0 }
0x11e4   : > { %5393 = vrsqrt.f32 %v3852_v55  ;;  %v3851_v37 = vadd.f32 1e-06, %v3841_v59 }
0x11e6   : > { %5395 = vrsqrt.f32 %v3851_v37 }
0x11ee   : > { %v5394_v60 = vpop.eup %5393 }
0x11ef   : > { %v3862_v34 = vmul.f32 %v5394_v60, %v3847_v45 }
0x11f0   : > { %v5396_v18 = vpop.eup %5395 }
0x11f1   : > { %v3873_v29 = vmul.f32 %v6899_v33, %v3862_v34  ;;  %v3861_v30 = vmul.f32 %v5396_v18, %v3846_v41 }
0x11f3   : > { %v3872_v25 = vmul.f32 %v6899_v33, %v3861_v30  ;;  %v3884_v51 = vadd.f32 %v6906_v48, %v3873_v29 }
0x11f5   : > { %v3883_v20 = vadd.f32 %v6906_v48, %v3872_v25 }
0x11f7   : > { %v3888_v14 = vpack.c.bf16 %v3884_v51, %v3883_v20 }
0x11f9   : > { %5036 = vmatmul.mubr.msk.bf16.vlgmr.msra.gmra.mrb[136].mxu0 %vm787_vm1, %v3888_v14 }
0x11fa   : > { %5039 = vmatprep.mubr.msk.bf16.mxu0 %vm5430_vm3, %v5429_v38 }
0x1209   : > { %v3750_v47 = vpop.f32.mrb[124].mxu1 }
0x120a   : > { %v3751_v54 = vadd.f32 %v6867_v12, %v3750_v47  ;;  %v5025_v17 = vpop.f32.mrb[125].mxu1 }
0x120b   : > { %v3753_v19 = vpop.f32.mrb[126].mxu1 }
0x120c   : > { %v3774_v32 = vmul.f32 %v6872_v50, %v3751_v54  ;;  %v3754_v1 = vadd.f32 %v6867_v12, %v3753_v19  ;;  %v5026_v8 = vpop.f32.mrb[127].mxu1 }
0x120e   : > { %v6918_v57 = vadd.f32 %v3774_v32, %v6308_v13  ;;  %v3775_v43 = vmul.f32 %v6872_v50, %v3754_v1 }
0x1210   : > { %v6922_v39 = vadd.f32 %v3775_v43, %v6312_v53  ;;  %v3792_v36 = vsel %vm787_vm1, %v6918_v57, 0.0  ;;  %v3808_v11 = vmul.f32 %v6918_v57, %v6918_v57 }
0x1211   : > { %3793 = vadd.xlane.f32.xlu0 %v3792_v36  ;;  %v3758_v49 = vpop.f32.mrb[128].mxu1 }
0x1212   : > { %v3759_v56 = vadd.f32 %v6867_v12, %v3758_v49  ;;  %v5029_v62 = vpop.f32.mrb[129].mxu1  ;;  %v3795_v13 = vsel %vm787_vm1, %v6922_v39, 0.0  ;;  %v3809_v35 = vmul.f32 %v6922_v39, %v6922_v39  ;;  %v3817_v15 = vsel %vm787_vm1, %v3808_v11, 0.0 }
0x1213   : > { %3796 = vadd.xlane.f32.xlu1 %v3795_v13  ;;  %v3761_v53 = vpop.f32.mrb[130].mxu1  ;;  %v4439_v13 = vld [vmem:[%s7039_s16 + $0x1] ss:$0 sm:$0xff] }
0x1214   : > { %v3776_v31 = vmul.f32 %v6872_v50, %v3759_v56  ;;  %v5030_v4 = vpop.f32.mrb[131].mxu1  ;;  %v3820_v12 = vsel %vm787_vm1, %v3809_v35, 0.0  ;;  %v5185_v50 = vld [vmem:[%s7040_s17 + $0x40] sm:$0xff]  }
0x1215   : > { %3818 = vadd.xlane.f32.xlu0 %v3817_v15  ;;  %5048 = vmatpush3.bf16.msra.mxu1 %v5185_v50 }
0x1216   : > { %v6936_v5 = vadd.f32 %v3776_v31, %v6325_v61  ;;  %5049 = vmatprep.subr.bf16.mxu1 %v5429_v38  ;;  %v5186_v61 = vld [vmem:[%s7040_s17 + $0x48] sm:$0xff]  }
0x1217   : > { %3821 = vadd.xlane.f32.xlu1 %v3820_v12 }
0x1218   : > { %v3798_v7 = vsel %vm787_vm1, %v6936_v5, 0.0  ;;  %v3810_v46 = vmul.f32 %v6936_v5, %v6936_v5 }
0x1219   : > { %3799 = vadd.xlane.f32.xlu0 %v3798_v7  ;;  %5050 = vmatpush3.bf16.msra.mxu1 %v5186_v61 }
0x121a   : > { %v3823_v52 = vsel %vm787_vm1, %v3810_v46, 0.0  ;;  %5051 = vmatprep.subr.bf16.mxu1 %v5429_v38 }
0x121b   : > { %3824 = vadd.xlane.f32.xlu1 %v3823_v52 }
0x121d   : > { %5052 = vmatpush3.bf16.msra.mxu1 %v5187_v58 }
0x121e   : > { %5053 = vmatprep.subr.bf16.mxu1 %v5429_v38 }
0x1221   : > { %5054 = vmatpush3.bf16.msra.mxu1 %v5188_v0 }
0x1222   : > { %5055 = vmatprep.subr.bf16.mxu1 %v5429_v38 }
0x1225   : > { %5056 = vmatpush3.bf16.msra.mxu1 %v5189_v44 }
0x1226   : > { %5057 = vmatprep.subr.bf16.mxu1 %v5429_v38 }
0x1229   : > { %5058 = vmatpush3.bf16.msra.mxu1 %v5190_v63 }
0x122a   : > { %5059 = vmatprep.subr.bf16.mxu1 %v5429_v38 }
0x122d   : > { %5060 = vmatpush3.bf16.msra.mxu1 %v5191_v10 }
0x122e   : > { %5061 = vmatprep.subr.bf16.mxu1 %v5429_v38 }
0x1231   : > { %5062 = vmatpush3.bf16.msra.mxu1 %v5192_v21 }
0x129e   : > { %v3794_v6 = vpop.xlane.xlu0 %3793 }
0x129f   : > { %v3803_v26 = vmul.f32 0.03125, %v3794_v6 }
0x12a0   : > { %v3797_v42 = vpop.xlane.xlu1 %3796 }
0x12a1   : > { %v3804_v3 = vmul.f32 0.03125, %v3797_v42  ;;  %v3833_v16 = vmul.f32 %v3803_v26, %v3803_v26  ;;  %v3848_v20 = vsub.f32 %v6918_v57, %v3803_v26 }
0x12a2   : > { %v3819_v23 = vpop.xlane.xlu0 %3818 }
0x12a3   : > { %v3828_v28 = vmul.f32 0.03125, %v3819_v23  ;;  %v3834_v27 = vmul.f32 %v3804_v3, %v3804_v3  ;;  %v3849_v47 = vsub.f32 %v6922_v39, %v3804_v3 }
0x12a4   : > { %v3822_v22 = vpop.xlane.xlu1 %3821 }
0x12a5   : > { %v3838_v2 = vsub.f32 %v3828_v28, %v3833_v16  ;;  %v3829_v40 = vmul.f32 0.03125, %v3822_v22 }
0x12a6   : > { %v3800_v24 = vpop.xlane.xlu0 %3799 }
0x12a7   : > { %v3843_v55 = vmax.f32 %v3838_v2, 0.0  ;;  %v3839_v59 = vsub.f32 %v3829_v40, %v3834_v27  ;;  %v3805_v37 = vmul.f32 0.03125, %v3800_v24 }
0x12a8   : > { %v3825_v45 = vpop.xlane.xlu1 %3824 }
0x12a9   : > { %v3853_v60 = vadd.f32 1e-06, %v3843_v55  ;;  %v3844_v41 = vmax.f32 %v3839_v59, 0.0  ;;  %v3835_v34 = vmul.f32 %v3805_v37, %v3805_v37  ;;  %v3830_v18 = vmul.f32 0.03125, %v3825_v45 }
0x12aa   : > { %v3850_v8 = vsub.f32 %v6936_v5, %v3805_v37 }
0x12ab   : > { %5397 = vrsqrt.f32 %v3853_v60  ;;  %v3854_v29 = vadd.f32 1e-06, %v3844_v41  ;;  %v3840_v30 = vsub.f32 %v3830_v18, %v3835_v34 }
0x12ad   : > { %5399 = vrsqrt.f32 %v3854_v29  ;;  %v3845_v25 = vmax.f32 %v3840_v30, 0.0 }
0x12af   : > { %v3855_v51 = vadd.f32 1e-06, %v3845_v25 }
0x12b1   : > { %5401 = vrsqrt.f32 %v3855_v51 }
0x12b5   : > { %v5398_v14 = vpop.eup %5397 }
0x12b6   : > { %v3863_v54 = vmul.f32 %v5398_v14, %v3848_v20 }
0x12b7   : > { %v5400_v17 = vpop.eup %5399 }
0x12b8   : > { %v3864_v19 = vmul.f32 %v5400_v17, %v3849_v47  ;;  %v3874_v32 = vmul.f32 %v6899_v33, %v3863_v54 }
0x12ba   : > { %v3875_v1 = vmul.f32 %v6899_v33, %v3864_v19  ;;  %v3885_v36 = vadd.f32 %v6906_v48, %v3874_v32 }
0x12bb   : > { %v5402_v43 = vpop.eup %5401 }
0x12bc   : > { %v3886_v11 = vadd.f32 %v6906_v48, %v3875_v1  ;;  %v3865_v49 = vmul.f32 %v5402_v43, %v3850_v8 }
0x12be   : > { %v3889_v56 = vpack.c.bf16 %v3886_v11, %v3885_v36  ;;  %v3876_v57 = vmul.f32 %v6899_v33, %v3865_v49 }
0x12c0   : > { %5040 = vmatmul.mubr.msk.bf16.gmra.mrb[140].mxu0 %vm787_vm1, %v3889_v56  ;;  %v3887_v39 = vadd.f32 %v6906_v48, %v3876_v57 }
0x12c1   : > { %5043 = vmatprep.mubr.msk.bf16.mxu0 %vm5430_vm3, %v5429_v38 }
0x12c2   : > { %v3890_v62 = vpack.c.bf16 %v3887_v39, %v3887_v39 }
0x12c8   : > { %5044 = vmatmul.mubr.msk.bf16.gmra.mrb[144].mxu0 %vm787_vm1, %v3890_v62 }
0x12cc   : > { %v3959_v35 = vpop.f32.mrb[136].mxu0 }
0x12cd   : > { %v3960_v53 = vadd.f32 %v4439_v13, %v3959_v35  ;;  %v5037_v31 = vpop.f32.mrb[137].mxu0 }
0x12ce   : > { %v3962_v4 = vpop.f32.mrb[138].mxu0 }
0x12cf   : > { %v3986_v15 = vmul.f32 0.044715, %v3960_v53  ;;  %v3963_v33 = vadd.f32 %v4439_v13, %v3962_v4  ;;  %v5038_v5 = vpop.f32.mrb[139].mxu0  ;;  %v3981_v21 = vmul.f32 0.5, %v3960_v53  ;;  %v4462_v4 = vld [vmem:[%s7041_s18 + $0x1] ss:$0 sm:$0xff] }
0x12d1   : > { %v3991_v12 = vmul.f32 %v3986_v15, %v3960_v53  ;;  %v3987_v7 = vmul.f32 0.044715, %v3963_v33  ;;  %v3982_v6 = vmul.f32 0.5, %v3963_v33 }
0x12d3   : > { %v3996_v46 = vmul.f32 %v3991_v12, %v3960_v53  ;;  %v3992_v52 = vmul.f32 %v3987_v7, %v3963_v33 }
0x12d5   : > { %v4001_v50 = vadd.f32 %v3996_v46, %v3960_v53  ;;  %v3997_v48 = vmul.f32 %v3992_v52, %v3963_v33 }
0x12d7   : > { %v4006_v61 = vmul.f32 0.7978846, %v4001_v50  ;;  %v4002_v58 = vadd.f32 %v3997_v48, %v3963_v33  ;;  %v4472_v33 = vld [vmem:[%s7042_s19 + $0x1] ss:$0 sm:$0xff] }
0x12d9   : > { %5403 = vtanh.f32 %v4006_v61  ;;  %v4007_v0 = vmul.f32 0.7978846, %v4002_v58 }
0x12db   : > { %5405 = vtanh.f32 %v4007_v0 }
0x12e3   : > { %v5404_v44 = vpop.eup %5403 }
0x12e4   : > { %v4016_v63 = vadd.f32 1.0, %v5404_v44 }
0x12e5   : > { %v5406_v10 = vpop.eup %5405 }
0x12e6   : > { %v4017_v26 = vadd.f32 1.0, %v5406_v10  ;;  %v4021_v42 = vmul.f32 %v4016_v63, %v3981_v21 }
0x12e8   : > { %v4022_v3 = vmul.f32 %v4017_v26, %v3982_v6 }
0x12ea   : > { %v4026_v23 = vpack.c.bf16 %v4022_v3, %v4021_v42 }
0x12ec   : > { %5064 = vmatmul.mubr.bf16.vlgmr.msra.gmra.mrb[132].mxu1 %v4026_v23 }
0x12ed   : > { %5067 = vmatprep.mubr.msk.bf16.mxu1 %vm5430_vm3, %v5429_v38 }
0x1393   : > { %v3967_v16 = vpop.f32.mrb[140].mxu0 }
0x1394   : > { %v3968_v28 = vadd.f32 %v4439_v13, %v3967_v16  ;;  %v5041_v22 = vpop.f32.mrb[141].mxu0  ;;  %v4474_v16 = vld [vmem:[%s7044_s21] ss:$0 sm:$0xff] }
0x1395   : > { %v3970_v27 = vpop.f32.mrb[142].mxu0 }
0x1396   : > { %v3988_v2 = vmul.f32 0.044715, %v3968_v28  ;;  %v3971_v40 = vadd.f32 %v4439_v13, %v3970_v27  ;;  %v5042_v24 = vpop.f32.mrb[143].mxu0  ;;  %v3983_v36 = vmul.f32 0.5, %v3968_v28 }
0x1398   : > { %v3993_v55 = vmul.f32 %v3988_v2, %v3968_v28  ;;  %v3989_v59 = vmul.f32 0.044715, %v3971_v40  ;;  %v3984_v11 = vmul.f32 0.5, %v3971_v40 }
0x139a   : > { %v3998_v37 = vmul.f32 %v3993_v55, %v3968_v28  ;;  %v3994_v45 = vmul.f32 %v3989_v59, %v3971_v40 }
0x139b   : > { %v3975_v60 = vpop.f32.mrb[144].mxu0 }
0x139c   : > { %v3999_v41 = vmul.f32 %v3994_v45, %v3971_v40  ;;  %v3976_v34 = vadd.f32 %v4439_v13, %v3975_v60  ;;  %v5045_v18 = vpop.f32.mrb[145].mxu0  ;;  %v4003_v29 = vadd.f32 %v3998_v37, %v3968_v28 }
0x139d   : > { %v3978_v30 = vpop.f32.mrb[146].mxu0 }
0x139e   : > { %v3990_v25 = vmul.f32 0.044715, %v3976_v34  ;;  %v5046_v51 = vpop.f32.mrb[147].mxu0  ;;  %v4004_v20 = vadd.f32 %v3999_v41, %v3971_v40  ;;  %v4008_v14 = vmul.f32 0.7978846, %v4003_v29  ;;  %v3985_v13 = vmul.f32 0.5, %v3976_v34 }
0x13a0   : > { %v3995_v47 = vmul.f32 %v3990_v25, %v3976_v34  ;;  %v4009_v54 = vmul.f32 0.7978846, %v4004_v20  ;;  %5407 = vtanh.f32 %v4008_v14  ;;  %v5446_v20 = vmov 1966171168  }
0x13a1   : > { %v4235_v14 = vunpack.c.l.s4 %v5446_v20 }
0x13a2   : > { %5409 = vtanh.f32 %v4009_v54  ;;  %v4000_v17 = vmul.f32 %v3995_v47, %v3976_v34  ;;  %v4237_v47 = vlaneseq }
0x13a4   : > { %v4005_v19 = vadd.f32 %v4000_v17, %v3976_v34  ;;  %vm4251_vm11 = vcmp.lt.s32.totalorder %v4237_v47, 256 }
0x13a6   : > { %v4010_v32 = vmul.f32 0.7978846, %v4005_v19  ;;  %v4236_v19 = vunpack.c.0.s8 %v4235_v14 }
0x13a8   : > { %5411 = vtanh.f32 %v4010_v32  ;;  %v4238_v32 = vshrl.u32 %v4237_v47, 7 }
0x13aa   : > { %v5408_v1 = vpop.eup %5407 }
0x13ab   : > { %v4018_v8 = vadd.f32 1.0, %v5408_v1 }
0x13ac   : > { %v5410_v43 = vpop.eup %5409 }
0x13ad   : > { %v4019_v49 = vadd.f32 1.0, %v5410_v43  ;;  %v4023_v56 = vmul.f32 %v4018_v8, %v3983_v36 }
0x13af   : > { %v4024_v57 = vmul.f32 %v4019_v49, %v3984_v11 }
0x13b1   : > { %v4027_v39 = vpack.c.bf16 %v4024_v57, %v4023_v56  ;;  %v4239_v56 = vsub.s32 %v4236_v19, %v4238_v32 }
0x13b2   : > { %v5412_v62 = vpop.eup %5411 }
0x13b3   : > { %5068 = vmatmul.mubr.bf16.gmra.mrb[136].mxu1 %v4027_v39  ;;  %v4020_v35 = vadd.f32 1.0, %v5412_v62 }
0x13b4   : > { %5071 = vmatprep.mubr.msk.bf16.mxu1 %vm5430_vm3, %v5429_v38 }
0x13b5   : > { %v4025_v53 = vmul.f32 %v4020_v35, %v3985_v13 }
0x13b7   : > { %v4028_v31 = vpack.c.bf16 %v4025_v53, %v4025_v53 }
0x13bb   : > { %5072 = vmatmul.mubr.bf16.gmra.mrb[140].mxu1 %v4028_v31 }
0x13bf   : > { %v4136_v15 = vpop.f32.mrb[132].mxu1 }
0x13c0   : > { %v4137_v5 = vadd.f32 %v4462_v4, %v4136_v15  ;;  %v5065_v12 = vpop.f32.mrb[133].mxu1 }
0x13c1   : > { %v4139_v7 = vpop.f32.mrb[134].mxu1 }
0x13c2   : > { %v4162_v46 = vmul.f32 %v4472_v33, %v4137_v5  ;;  %v5066_v52 = vpop.f32.mrb[135].mxu1 }
0x13c4   : > { %v4163_v50 = vadd.f32 %v4162_v46, %v6878_v9  ;;  %v4473_v9 = vld [vmem:[%s7043_s20] ss:$0 sm:$0xff] }
0x13c6   : > { %v4166_v38 = vsel %vm787_vm1, %v4163_v50, 0.0  ;;  %v4170_v48 = vmul.f32 %v4163_v50, %v4163_v50 }
0x13c7   : > { %4167 = vadd.xlane.f32.xlu0 %v4166_v38 }
0x13c8   : > { %v4171_v61 = vsel %vm787_vm1, %v4170_v48, 0.0 }
0x13c9   : > { %4172 = vadd.xlane.f32.xlu1 %v4171_v61 }
0x1454   : > { %v4168_v58 = vpop.xlane.xlu0 %4167 }
0x1455   : > { %v4169_v0 = vmul.f32 0.03125, %v4168_v58 }
0x1456   : > { %v4173_v44 = vpop.xlane.xlu1 %4172 }
0x1457   : > { %v4175_v63 = vmul.f32 %v4169_v0, %v4169_v0  ;;  %v4174_v10 = vmul.f32 0.03125, %v4173_v44  ;;  %v4178_v42 = vsub.f32 %v4163_v50, %v4169_v0 }
0x1459   : > { %v4176_v21 = vsub.f32 %v4174_v10, %v4175_v63 }
0x145b   : > { %v4177_v6 = vmax.f32 %v4176_v21, 0.0 }
0x145d   : > { %v4179_v26 = vadd.f32 1e-06, %v4177_v6 }
0x145f   : > { %5413 = vrsqrt.f32 %v4179_v26 }
0x1469   : > { %v5414_v3 = vpop.eup %5413 }
0x146a   : > { %v4181_v23 = vmul.f32 %v5414_v3, %v4178_v42 }
0x146c   : > { %v4188_v28 = vmul.f32 %v4473_v9, %v4181_v23 }
0x146e   : > { %v4195_v22 = vadd.f32 %v4474_v16, %v4188_v28 }
0x1470   : > { %v4211_v27 = vrot.slane %v4195_v22, 5  ;;  %v4197_v2 = vrot.slane %v4195_v22, 1  ;;  %v4201_v40 = vrot.slane %v4195_v22, 2  ;;  %v4215_v24 = vrot.slane %v4195_v22, 6 }
0x1471   : > { %v4205_v55 = vrot.slane %v4195_v22, 3  ;;  %v4219_v59 = vrot.slane %v4195_v22, 7  ;;  %v4209_v1 = vrot.slane %v4195_v22, 4 }
0x1472   : > { %4212 = vrot.lane.b32.xlu1 %v4211_v27, %s5445_s30  ;;  %4198 = vrot.lane.b32.xlu0 %v4197_v2, %s5445_s30 }
0x1476   : > { %4202 = vrot.lane.b32.xlu1 %v4201_v40, %s7098_s4  ;;  %4216 = vrot.lane.b32.xlu0 %v4215_v24, %s7098_s4  ;;  %s4314_s4 = sshll.u32 %s7107_s28, 1 }
0x1477   : > { %s681_s27 = scalar_lea.vmem %s7045_s22, %s4314_s4 }
0x147a   : > { %4206 = vrot.lane.b32.xlu1 %v4205_v55, %s7105_s25  ;;  %4220 = vrot.lane.b32.xlu0 %v4219_v59, %s7105_s25 }
0x1486   : > { %v4143_v37 = vpop.f32.mrb[136].mxu1 }
0x1487   : > { %v5069_v45 = vpop.f32.mrb[137].mxu1 }
0x1488   : > { %v4145_v60 = vpop.f32.mrb[138].mxu1 }
0x1489   : > { %v5070_v41 = vpop.f32.mrb[139].mxu1 }
0x148e   : > { %v4149_v34 = vpop.f32.mrb[140].mxu1 }
0x148f   : > { %v5073_v18 = vpop.f32.mrb[141].mxu1 }
0x1490   : > { %v4151_v29 = vpop.f32.mrb[142].mxu1 }
0x1491   : > { %v5074_v30 = vpop.f32.mrb[143].mxu1 }
0x14e4   : > { %v4213_v25 = vpop.permute.xlu1 %4212  ;;  %v4199_v51 = vpop.permute.xlu0 %4198 }
0x14e5   : > { %v4228_v8 = vsel %vm787_vm1, %v4209_v1, %v4213_v25  ;;  %v4223_v43 = vsel %vm787_vm1, %v4195_v22, %v4199_v51 }
0x14e8   : > { %v4203_v54 = vpop.permute.xlu1 %4202  ;;  %v4217_v17 = vpop.permute.xlu0 %4216 }
0x14e9   : > { %v4225_v36 = vsel %vm4224_vm9, %v4223_v43, %v4203_v54  ;;  %v4229_v11 = vsel %vm4224_vm9, %v4228_v8, %v4217_v17 }
0x14ec   : > { %v4207_v49 = vpop.permute.xlu1 %4206  ;;  %v4221_v57 = vpop.permute.xlu0 %4220 }
0x14ed   : > { %v4227_v39 = vsel %vm4226_vm10, %v4225_v36, %v4207_v49  ;;  %v4230_v62 = vsel %vm4226_vm10, %v4229_v11, %v4221_v57 }
0x14ee   : > { %v4233_v13 = vcombine.low %v4227_v39, %v4230_v62 }
0x14f0   : > { %v4240_v35 = vrot.slane %v4233_v13, %v4239_v56 }
0x14f2   : > { %v4247_v53 = vrot.slane %v4240_v35, %v4239_v56 }
0x14f4   : > { %4253 = vst.msk [vmem:[%s681_s27] sm:$0x3] %vm4251_vm11, %v4247_v53 }
0x14f5 PF: > { %s32_s3 = sadd.s32 1, %s5427_s3  }
0x14f6   : > { %p29_p4 = scmp.ge.s32.totalorder %s32_s3, 4  }
0x14f8   :  { %31 = sbr.rel (!%p29_p4) target bundleno = 8 (0x8), region = 152 }

</bundles_post_ra>
